<compile_context>
chip_gen: v5e
topology: v5e:2x2
jax: 0.10.0
libtpu: 0.0.40
codegen_flags: <defaults>
</compile_context>

<pallas_src>
import functools
import math

import jax
import jax.numpy as jnp
from jax import lax
from jax.experimental import pallas as pl
from jax.experimental.pallas import tpu as pltpu


# ------------------------------ config -------------------------------------
class SiglipVisionModelConfig:
    input_channels = 3
    image_size = 16
    conv2d_patch_size = 2          # -> num_patches = (16/2)^2 = 64 (width 8)
    embedding_dim = 32
    num_attention_heads = 4
    head_dim = 8
    intermediate_size = 64
    num_hidden_layers = 2
    layer_norm_eps = 1e-6
    embedding_use_bias = True


# --------------------------- math helpers -----------------------------------
def _layer_norm(x, gamma, beta, eps):
    mean = jnp.mean(x, axis=-1, keepdims=True)
    var = jnp.mean((x - mean) ** 2, axis=-1, keepdims=True)
    return (x - mean) * lax.rsqrt(var + eps) * gamma + beta


def _gelu_tanh(x):
    return 0.5 * x * (1.0 + jnp.tanh(math.sqrt(2.0 / math.pi)
                                     * (x + 0.044715 * x ** 3)))


# ------------------------------ fused kernel --------------------------------
def siglip_fused_kernel(patches_ref, pw_ref, pos_ref,
                        ln1_g_ref, ln1_b_ref, wqkv_ref, bqkv_ref,
                        wo_ref, bo_ref, ln2_g_ref, ln2_b_ref,
                        w1_ref, b1_ref, w2_ref, b2_ref,
                        fg_ref, fb_ref, pool_ref,
                        o_ref, ctx_ref,
                        *, num_heads, head_dim, num_layers, eps):
    """One grid step = one batch element (grid=(B,), 'parallel')."""
    hd_total = num_heads * head_dim

    # ---- patch embedding (conv-as-matmul); conv bias pre-folded into pos ----
    x0 = (jnp.dot(patches_ref[...], pw_ref[...],
                  preferred_element_type=jnp.float32)
          + pos_ref[...])                                   # [S, D]

    # ---- encoder blocks: fori_loop bounds live ranges per layer -------------
    def layer_body(layer, x):
        # single dynamic-index load of this layer's stacked params
        ln1_g, ln1_b = ln1_g_ref[layer], ln1_b_ref[layer]
        wqkv, bqkv = wqkv_ref[layer], bqkv_ref[layer]
        wo, bo = wo_ref[layer], bo_ref[layer]
        ln2_g, ln2_b = ln2_g_ref[layer], ln2_b_ref[layer]
        w1, b1 = w1_ref[layer], b1_ref[layer]
        w2, b2 = w2_ref[layer], b2_ref[layer]

        # --- LayerNorm 1 + multi-head self-attention ---
        residual = x
        h = _layer_norm(x, ln1_g, ln1_b, eps)
        # Q columns of wqkv/bqkv were pre-scaled by 1/sqrt(head_dim)
        qkv = jnp.dot(h, wqkv, preferred_element_type=jnp.float32) + bqkv
        q = qkv[:, :hd_total]
        k = qkv[:, hd_total:2 * hd_total]
        v = qkv[:, 2 * hd_total:]

        for hd in range(num_heads):                      # static unrolled heads
            cs = slice(hd * head_dim, (hd + 1) * head_dim)
            # contract last dims of both operands -> no explicit K transpose
            s = lax.dot_general(q[:, cs], k[:, cs],
                                dimension_numbers=(((1,), (1,)), ((), ())),
                                preferred_element_type=jnp.float32)  # [S, S]
            s = s - jnp.max(s, axis=-1, keepdims=True)
            e = jnp.exp(s)
            p = e * pl.reciprocal(jnp.sum(e, axis=-1, keepdims=True),
                                  approx=True)
            ctx_ref[:, cs] = jnp.dot(p, v[:, cs],
                                     preferred_element_type=jnp.float32)

        # one wide output projection over the full [S, HD] context slab
        x = residual + jnp.dot(ctx_ref[...], wo,
                               preferred_element_type=jnp.float32) + bo

        # --- LayerNorm 2 + MLP ---
        residual = x
        h = _layer_norm(x, ln2_g, ln2_b, eps)
        h1 = _gelu_tanh(jnp.dot(h, w1, preferred_element_type=jnp.float32) + b1)
        x = residual + jnp.dot(h1, w2, preferred_element_type=jnp.float32) + b2
        return x

    x = lax.fori_loop(0, num_layers, layer_body, x0)

    # ---- final LayerNorm + 4x4 average pool (as a [S_out, S] matmul) --------
    xn = _layer_norm(x, fg_ref[...], fb_ref[...], eps)
    o_ref[0] = jnp.dot(pool_ref[...], xn, preferred_element_type=jnp.float32)


# ------------------------------ wrapper -------------------------------------
def extract_patches(pixel_values, patch):
    # NCHW -> [B, num_patches, C*P*P] with (C, P, P) channel-major patch order,
    # matching torch.nn.Conv2d weight layout [D, C, P, P].
    B, C, H, W = pixel_values.shape
    hp, wp = H // patch, W // patch
    x = pixel_values.reshape(B, C, hp, patch, wp, patch)
    x = x.transpose(0, 2, 4, 1, 3, 5)            # [B, hp, wp, C, P, P]
    return x.reshape(B, hp * wp, C * patch * patch)


def siglip_forward(params, pixel_values, cfg):
    patches = extract_patches(pixel_values, cfg.conv2d_patch_size)
    B, S, CP = patches.shape
    D = cfg.embedding_dim
    I = cfg.intermediate_size
    H, Dh = cfg.num_attention_heads, cfg.head_dim
    HD = H * Dh
    L = cfg.num_hidden_layers
    pool = params["pool"]
    S_out = pool.shape[0]
    patches2d = patches.reshape(B * S, CP)

    # fold the 1/sqrt(head_dim) attention scale into the Q third of the fused
    # QKV projection (one-time, outside the kernel)
    scale = 1.0 / math.sqrt(Dh)
    col_scale = jnp.concatenate([jnp.full((HD,), scale, jnp.float32),
                                 jnp.ones((2 * HD,), jnp.float32)])
    wqkv = params["wqkv"] * col_scale
    bqkv = params["bqkv"] * col_scale

    # fold the conv bias into the (batch-shared) position embedding
    pos_bias = params["pos_emb"] + params["patch_b"]          # [S, D]

    kernel = functools.partial(
        siglip_fused_kernel, num_heads=H, head_dim=Dh,
        num_layers=L, eps=cfg.layer_norm_eps)

    args = (patches2d, params["patch_w"], pos_bias,
            params["ln1_g"], params["ln1_b"], wqkv, bqkv,
            params["wo"], params["bo"], params["ln2_g"], params["ln2_b"],
            params["w1"], params["b1"], params["w2"], params["b2"],
            params["final_g"], params["final_b"], pool)

    def full_spec(shape):
        nd = len(shape)
        return pl.BlockSpec(shape, lambda b, _nd=nd: (0,) * _nd)

    in_specs = ([pl.BlockSpec((S, CP), lambda b: (b, 0))]      # per-batch rows
                + [full_spec(a.shape) for a in args[1:]])      # resident weights
    out_specs = pl.BlockSpec((1, S_out, D), lambda b: (b, 0, 0))

    # advisory cost estimate (keeps XLA from serializing this tiny call)
    BS = B * S
    flops = 2 * BS * CP * D
    flops += L * (2 * BS * D * 3 * HD            # fused QKV projection
                  + 4 * B * H * S * S * Dh       # scores + context
                  + 2 * BS * HD * D              # output projection
                  + 4 * BS * D * I)              # MLP fc1 + fc2
    flops += 2 * B * S_out * S * D               # pooling matmul
    transcendentals = L * (B * H * S * S + BS * I) + (2 * L + 1) * BS
    bytes_accessed = (sum(int(a.size) * a.dtype.itemsize for a in args)
                      + B * S_out * D * 4)

    return pl.pallas_call(
        kernel,
        out_shape=jax.ShapeDtypeStruct((B, S_out, D), jnp.float32),
        grid=(B,),
        in_specs=in_specs,
        out_specs=out_specs,
        scratch_shapes=[pltpu.VMEM((S, HD), jnp.float32)],
        compiler_params=pltpu.CompilerParams(
            dimension_semantics=("parallel",)),
        cost_estimate=pl.CostEstimate(flops=int(flops),
                                      transcendentals=int(transcendentals),
                                      bytes_accessed=int(bytes_accessed)),
    )(*args)


# ------------------------------ params --------------------------------------
def build_pool_matrix(seq_len):
    width = int(math.isqrt(seq_len))
    assert width * width == seq_len
    ow = width // 4
    rows = jnp.arange(seq_len) // width
    cols = jnp.arange(seq_len) % width
    out_idx = (rows // 4) * ow + (cols // 4)
    pool = jnp.zeros((ow * ow, seq_len), jnp.float32)
    pool = pool.at[out_idx, jnp.arange(seq_len)].set(1.0 / 16.0)
    return pool


def init_params(cfg, key):
    D = cfg.embedding_dim
    I = cfg.intermediate_size
    HD = cfg.num_attention_heads * cfg.head_dim
    CP = cfg.input_channels * cfg.conv2d_patch_size ** 2
    L = cfg.num_hidden_layers
    S = (cfg.image_size // cfg.conv2d_patch_size) ** 2

    def nrm(k, shape, scale=0.02):
        return scale * jax.random.normal(k, shape, jnp.float32)

    # 3 keys up front + 10 per layer; split a few extra for safety
    keys = iter(jax.random.split(key, 8 + 10 * L))
    params = {
        "patch_w": nrm(next(keys), (CP, D)),      # conv weight, matmul form
        "patch_b": nrm(next(keys), (1, D)),
        "pos_emb": nrm(next(keys), (S, D)),
        "final_g": jnp.ones((1, D), jnp.float32),
        "final_b": jnp.zeros((1, D), jnp.float32),
        "pool": build_pool_matrix(S),
        "ln1_g": jnp.ones((L, 1, D), jnp.float32),
        "ln1_b": jnp.zeros((L, 1, D), jnp.float32),
        "ln2_g": jnp.ones((L, 1, D), jnp.float32),
        "ln2_b": jnp.zeros((L, 1, D), jnp.float32),
    }
    wqkv, bqkv, wo, bo, w1, b1, w2, b2 = [], [], [], [], [], [], [], []
    for _ in range(L):
        # fused QKV projection: concat(Wq, Wk, Wv) along output dim
        wqkv.append(jnp.concatenate(
            [nrm(next(keys), (D, HD)) for _ in range(3)], axis=1))
        bqkv.append(nrm(next(keys), (1, 3 * HD)))
        wo.append(nrm(next(keys), (HD, D)))
        bo.append(nrm(next(keys), (1, D)))
        w1.append(nrm(next(keys), (D, I)))
        b1.append(nrm(next(keys), (1, I)))
        w2.append(nrm(next(keys), (I, D)))
        b2.append(nrm(next(keys), (1, D)))
    params.update(
        wqkv=jnp.stack(wqkv), bqkv=jnp.stack(bqkv),
        wo=jnp.stack(wo), bo=jnp.stack(bo),
        w1=jnp.stack(w1), b1=jnp.stack(b1),
        w2=jnp.stack(w2), b2=jnp.stack(b2))
    return params


# ------------------------- pure-JAX reference --------------------------------
def reference_forward(params, pixel_values, cfg):
    patches = extract_patches(pixel_values, cfg.conv2d_patch_size)
    B, S, _ = patches.shape
    x = patches @ params["patch_w"] + params["patch_b"] + params["pos_emb"]
    H, Dh = cfg.num_attention_heads, cfg.head_dim
    HD = H * Dh
    eps = cfg.layer_norm_eps
    for l in range(cfg.num_hidden_layers):
        res = x
        h = _layer_norm(x, params["ln1_g"][l], params["ln1_b"][l], eps)
        qkv = h @ params["wqkv"][l] + params["bqkv"][l]
        q, k, v = jnp.split(qkv, 3, axis=-1)
        q = q.reshape(B, S, H, Dh)
        k = k.reshape(B, S, H, Dh)
        v = v.reshape(B, S, H, Dh)
        s = jnp.einsum("bqhd,bkhd->bhqk", q, k) / math.sqrt(Dh)
        a = jax.nn.softmax(s, axis=-1)
        ctx = jnp.einsum("bhqk,bkhd->bqhd", a, v).reshape(B, S, HD)
        x = res + ctx @ params["wo"][l] + params["bo"][l]
        res = x
        h = _layer_norm(x, params["ln2_g"][l], params["ln2_b"][l], eps)
        x = res + _gelu_tanh(h @ params["w1"][l] + params["b1"][l]) \
            @ params["w2"][l] + params["b2"][l]
    x = _layer_norm(x, params["final_g"], params["final_b"], eps)
    return jnp.einsum("os,bsd->bod", params["pool"], x)


# ------------------------------- main ----------------------------------------
if __name__ == "__main__":
    cfg = SiglipVisionModelConfig()
    key = jax.random.PRNGKey(0)
    pkey, xkey = jax.random.split(key)
    params = init_params(cfg, pkey)

    pixel_values = jax.random.normal(
        xkey, (2, cfg.input_channels, cfg.image_size, cfg.image_size),
        jnp.float32)

    fwd = jax.jit(lambda p, x: siglip_forward(p, x, cfg))
    out = jax.block_until_ready(fwd(params, pixel_values))

    ref = reference_forward(params, pixel_values, cfg)
    assert out.shape == ref.shape == (2, 4, cfg.embedding_dim)
    max_err = float(jnp.max(jnp.abs(out - ref)))
    assert jnp.allclose(out, ref, rtol=2e-3, atol=2e-3), max_err

    print("KERNEL_OK")
</pallas_src>

<mosaic_0001>
module attributes {stable_mosaic.version = 11 : i64} {
  func.func @siglip_fused_kernel(%arg0: i32, %arg1: memref<64x12xf32, #tpu.memory_space<vmem>>, %arg2: memref<12x32xf32, #tpu.memory_space<vmem>>, %arg3: memref<64x32xf32, #tpu.memory_space<vmem>>, %arg4: memref<2x1x32xf32, #tpu.memory_space<vmem>>, %arg5: memref<2x1x32xf32, #tpu.memory_space<vmem>>, %arg6: memref<2x32x96xf32, #tpu.memory_space<vmem>>, %arg7: memref<2x1x96xf32, #tpu.memory_space<vmem>>, %arg8: memref<2x32x32xf32, #tpu.memory_space<vmem>>, %arg9: memref<2x1x32xf32, #tpu.memory_space<vmem>>, %arg10: memref<2x1x32xf32, #tpu.memory_space<vmem>>, %arg11: memref<2x1x32xf32, #tpu.memory_space<vmem>>, %arg12: memref<2x32x64xf32, #tpu.memory_space<vmem>>, %arg13: memref<2x1x64xf32, #tpu.memory_space<vmem>>, %arg14: memref<2x64x32xf32, #tpu.memory_space<vmem>>, %arg15: memref<2x1x32xf32, #tpu.memory_space<vmem>>, %arg16: memref<1x32xf32, #tpu.memory_space<vmem>>, %arg17: memref<1x32xf32, #tpu.memory_space<vmem>>, %arg18: memref<4x64xf32, #tpu.memory_space<vmem>>, %arg19: memref<1x4x32xf32, #tpu.memory_space<vmem>>, %arg20: memref<64x32xf32, #tpu.memory_space<vmem>>) attributes {dimension_semantics = [#tpu.dimension_semantics<parallel>], iteration_bounds = array<i64: 2>, scalar_prefetch = 0 : i64, scratch_operands = 1 : i64, tpu.core_type = #tpu.core_type<tc>, window_params = [{transform_indices = @transform_0, window_bounds = array<i64: 64, 12>}, {pipeline_mode = #tpu.pipeline_mode<synchronous>, transform_indices = @transform_1, window_bounds = array<i64: 12, 32>}, {pipeline_mode = #tpu.pipeline_mode<synchronous>, transform_indices = @transform_2, window_bounds = array<i64: 64, 32>}, {pipeline_mode = #tpu.pipeline_mode<synchronous>, transform_indices = @transform_3, window_bounds = array<i64: 2, 1, 32>}, {pipeline_mode = #tpu.pipeline_mode<synchronous>, transform_indices = @transform_4, window_bounds = array<i64: 2, 1, 32>}, {pipeline_mode = #tpu.pipeline_mode<synchronous>, transform_indices = @transform_5, window_bounds = array<i64: 2, 32, 96>}, {pipeline_mode = #tpu.pipeline_mode<synchronous>, transform_indices = @transform_6, window_bounds = array<i64: 2, 1, 96>}, {pipeline_mode = #tpu.pipeline_mode<synchronous>, transform_indices = @transform_7, window_bounds = array<i64: 2, 32, 32>}, {pipeline_mode = #tpu.pipeline_mode<synchronous>, transform_indices = @transform_8, window_bounds = array<i64: 2, 1, 32>}, {pipeline_mode = #tpu.pipeline_mode<synchronous>, transform_indices = @transform_9, window_bounds = array<i64: 2, 1, 32>}, {pipeline_mode = #tpu.pipeline_mode<synchronous>, transform_indices = @transform_10, window_bounds = array<i64: 2, 1, 32>}, {pipeline_mode = #tpu.pipeline_mode<synchronous>, transform_indices = @transform_11, window_bounds = array<i64: 2, 32, 64>}, {pipeline_mode = #tpu.pipeline_mode<synchronous>, transform_indices = @transform_12, window_bounds = array<i64: 2, 1, 64>}, {pipeline_mode = #tpu.pipeline_mode<synchronous>, transform_indices = @transform_13, window_bounds = array<i64: 2, 64, 32>}, {pipeline_mode = #tpu.pipeline_mode<synchronous>, transform_indices = @transform_14, window_bounds = array<i64: 2, 1, 32>}, {pipeline_mode = #tpu.pipeline_mode<synchronous>, transform_indices = @transform_15, window_bounds = array<i64: 1, 32>}, {pipeline_mode = #tpu.pipeline_mode<synchronous>, transform_indices = @transform_16, window_bounds = array<i64: 1, 32>}, {pipeline_mode = #tpu.pipeline_mode<synchronous>, transform_indices = @transform_17, window_bounds = array<i64: 4, 64>}, {transform_indices = @transform_18, window_bounds = array<i64: 1, 4, 32>}]} {
    %c0 = arith.constant 0 : index
    %c0_0 = arith.constant 0 : index
    %0 = vector.load %arg1[%c0, %c0_0] : memref<64x12xf32, #tpu.memory_space<vmem>>, vector<64x12xf32>
    %c0_1 = arith.constant 0 : index
    %c0_2 = arith.constant 0 : index
    %1 = vector.load %arg2[%c0_1, %c0_2] : memref<12x32xf32, #tpu.memory_space<vmem>>, vector<12x32xf32>
    %cst = arith.constant dense<0.000000e+00> : vector<64x32xf32>
    %2 = tpu.matmul %0, %1, %cst {dimension_numbers = #tpu.dot_dimension_numbers<[1], [0], [0], [1], [0, 0, 1, 1], [], []>} : vector<64x12xf32>, vector<12x32xf32>, vector<64x32xf32> -> vector<64x32xf32>
    %c0_3 = arith.constant 0 : index
    %c0_4 = arith.constant 0 : index
    %3 = vector.load %arg3[%c0_3, %c0_4] : memref<64x32xf32, #tpu.memory_space<vmem>>, vector<64x32xf32>
    %4 = arith.addf %2, %3 : vector<64x32xf32>
    %c0_i32 = arith.constant 0 : i32
    %c2_i32 = arith.constant 2 : i32
    %5 = arith.addi %c0_i32, %c2_i32 : i32
    %c1_i32 = arith.constant 1 : i32
    %6 = scf.for %arg21 = %c0_i32 to %5 step %c1_i32 iter_args(%arg22 = %4) -> (vector<64x32xf32>)  : i32 {
      %36 = arith.index_cast %arg21 : i32 to index
      %c0_21 = arith.constant 0 : index
      %c0_22 = arith.constant 0 : index
      %37 = vector.load %arg4[%36, %c0_21, %c0_22] : memref<2x1x32xf32, #tpu.memory_space<vmem>>, vector<1x1x32xf32>
      %38 = vector.shape_cast %37 : vector<1x1x32xf32> to vector<1x32xf32>
      %39 = arith.index_cast %arg21 : i32 to index
      %c0_23 = arith.constant 0 : index
      %c0_24 = arith.constant 0 : index
      %40 = vector.load %arg5[%39, %c0_23, %c0_24] : memref<2x1x32xf32, #tpu.memory_space<vmem>>, vector<1x1x32xf32>
      %41 = vector.shape_cast %40 : vector<1x1x32xf32> to vector<1x32xf32>
      %42 = arith.index_cast %arg21 : i32 to index
      %c0_25 = arith.constant 0 : index
      %c0_26 = arith.constant 0 : index
      %43 = vector.load %arg6[%42, %c0_25, %c0_26] : memref<2x32x96xf32, #tpu.memory_space<vmem>>, vector<1x32x96xf32>
      %44 = vector.shape_cast %43 : vector<1x32x96xf32> to vector<32x96xf32>
      %45 = arith.index_cast %arg21 : i32 to index
      %c0_27 = arith.constant 0 : index
      %c0_28 = arith.constant 0 : index
      %46 = vector.load %arg7[%45, %c0_27, %c0_28] : memref<2x1x96xf32, #tpu.memory_space<vmem>>, vector<1x1x96xf32>
      %47 = vector.shape_cast %46 : vector<1x1x96xf32> to vector<1x96xf32>
      %48 = arith.index_cast %arg21 : i32 to index
      %c0_29 = arith.constant 0 : index
      %c0_30 = arith.constant 0 : index
      %49 = vector.load %arg8[%48, %c0_29, %c0_30] : memref<2x32x32xf32, #tpu.memory_space<vmem>>, vector<1x32x32xf32>
      %50 = vector.shape_cast %49 : vector<1x32x32xf32> to vector<32x32xf32>
      %51 = arith.index_cast %arg21 : i32 to index
      %c0_31 = arith.constant 0 : index
      %c0_32 = arith.constant 0 : index
      %52 = vector.load %arg9[%51, %c0_31, %c0_32] : memref<2x1x32xf32, #tpu.memory_space<vmem>>, vector<1x1x32xf32>
      %53 = vector.shape_cast %52 : vector<1x1x32xf32> to vector<1x32xf32>
      %54 = arith.index_cast %arg21 : i32 to index
      %c0_33 = arith.constant 0 : index
      %c0_34 = arith.constant 0 : index
      %55 = vector.load %arg10[%54, %c0_33, %c0_34] : memref<2x1x32xf32, #tpu.memory_space<vmem>>, vector<1x1x32xf32>
      %56 = vector.shape_cast %55 : vector<1x1x32xf32> to vector<1x32xf32>
      %57 = arith.index_cast %arg21 : i32 to index
      %c0_35 = arith.constant 0 : index
      %c0_36 = arith.constant 0 : index
      %58 = vector.load %arg11[%57, %c0_35, %c0_36] : memref<2x1x32xf32, #tpu.memory_space<vmem>>, vector<1x1x32xf32>
      %59 = vector.shape_cast %58 : vector<1x1x32xf32> to vector<1x32xf32>
      %60 = arith.index_cast %arg21 : i32 to index
      %c0_37 = arith.constant 0 : index
      %c0_38 = arith.constant 0 : index
      %61 = vector.load %arg12[%60, %c0_37, %c0_38] : memref<2x32x64xf32, #tpu.memory_space<vmem>>, vector<1x32x64xf32>
      %62 = vector.shape_cast %61 : vector<1x32x64xf32> to vector<32x64xf32>
      %63 = arith.index_cast %arg21 : i32 to index
      %c0_39 = arith.constant 0 : index
      %c0_40 = arith.constant 0 : index
      %64 = vector.load %arg13[%63, %c0_39, %c0_40] : memref<2x1x64xf32, #tpu.memory_space<vmem>>, vector<1x1x64xf32>
      %65 = vector.shape_cast %64 : vector<1x1x64xf32> to vector<1x64xf32>
      %66 = arith.index_cast %arg21 : i32 to index
      %c0_41 = arith.constant 0 : index
      %c0_42 = arith.constant 0 : index
      %67 = vector.load %arg14[%66, %c0_41, %c0_42] : memref<2x64x32xf32, #tpu.memory_space<vmem>>, vector<1x64x32xf32>
      %68 = vector.shape_cast %67 : vector<1x64x32xf32> to vector<64x32xf32>
      %69 = arith.index_cast %arg21 : i32 to index
      %c0_43 = arith.constant 0 : index
      %c0_44 = arith.constant 0 : index
      %70 = vector.load %arg15[%69, %c0_43, %c0_44] : memref<2x1x32xf32, #tpu.memory_space<vmem>>, vector<1x1x32xf32>
      %71 = vector.shape_cast %70 : vector<1x1x32xf32> to vector<1x32xf32>
      %cst_45 = arith.constant dense<0.000000e+00> : vector<64xf32>
      %72 = vector.multi_reduction <add>, %arg22, %cst_45 [1] : vector<64x32xf32> to vector<64xf32>
      %73 = vector.shape_cast %72 : vector<64xf32> to vector<64x1xf32>
      %cst_46 = arith.constant 3.200000e+01 : f32
      %74 = vector.broadcast %cst_46 : f32 to vector<64x1xf32>
      %75 = arith.divf %73, %74 : vector<64x1xf32>
      %76 = vector.broadcast %75 : vector<64x1xf32> to vector<64x32xf32>
      %77 = arith.subf %arg22, %76 : vector<64x32xf32>
      %78 = arith.mulf %77, %77 : vector<64x32xf32>
      %cst_47 = arith.constant dense<0.000000e+00> : vector<64xf32>
      %79 = vector.multi_reduction <add>, %78, %cst_47 [1] : vector<64x32xf32> to vector<64xf32>
      %80 = vector.shape_cast %79 : vector<64xf32> to vector<64x1xf32>
      %cst_48 = arith.constant 3.200000e+01 : f32
      %81 = vector.broadcast %cst_48 : f32 to vector<64x1xf32>
      %82 = arith.divf %80, %81 : vector<64x1xf32>
      %83 = vector.broadcast %75 : vector<64x1xf32> to vector<64x32xf32>
      %84 = arith.subf %arg22, %83 : vector<64x32xf32>
      %cst_49 = arith.constant 9.99999997E-7 : f32
      %85 = vector.broadcast %cst_49 : f32 to vector<64x1xf32>
      %86 = arith.addf %82, %85 : vector<64x1xf32>
      %87 = math.rsqrt %86 : vector<64x1xf32>
      %88 = vector.broadcast %87 : vector<64x1xf32> to vector<64x32xf32>
      %89 = arith.mulf %84, %88 : vector<64x32xf32>
      %90 = vector.broadcast %38 : vector<1x32xf32> to vector<64x32xf32>
      %91 = arith.mulf %89, %90 : vector<64x32xf32>
      %92 = vector.broadcast %41 : vector<1x32xf32> to vector<64x32xf32>
      %93 = arith.addf %91, %92 : vector<64x32xf32>
      %cst_50 = arith.constant dense<0.000000e+00> : vector<64x96xf32>
      %94 = tpu.matmul %93, %44, %cst_50 {dimension_numbers = #tpu.dot_dimension_numbers<[1], [0], [0], [1], [0, 0, 1, 1], [], []>} : vector<64x32xf32>, vector<32x96xf32>, vector<64x96xf32> -> vector<64x96xf32>
      %95 = vector.broadcast %47 : vector<1x96xf32> to vector<64x96xf32>
      %96 = arith.addf %94, %95 : vector<64x96xf32>
      %97 = vector.extract_strided_slice %96 {offsets = [0, 0], sizes = [64, 32], strides = [1, 1]} : vector<64x96xf32> to vector<64x32xf32>
      %98 = vector.extract_strided_slice %96 {offsets = [0, 32], sizes = [64, 32], strides = [1, 1]} : vector<64x96xf32> to vector<64x32xf32>
      %99 = vector.extract_strided_slice %96 {offsets = [0, 64], sizes = [64, 32], strides = [1, 1]} : vector<64x96xf32> to vector<64x32xf32>
      %100 = vector.extract_strided_slice %97 {offsets = [0, 0], sizes = [64, 8], strides = [1, 1]} : vector<64x32xf32> to vector<64x8xf32>
      %101 = vector.extract_strided_slice %98 {offsets = [0, 0], sizes = [64, 8], strides = [1, 1]} : vector<64x32xf32> to vector<64x8xf32>
      %cst_51 = arith.constant dense<0.000000e+00> : vector<64x64xf32>
      %102 = tpu.matmul %100, %101, %cst_51 {dimension_numbers = #tpu.dot_dimension_numbers<[1], [1], [0], [0], [0, 0, 1, 0], [], []>} : vector<64x8xf32>, vector<64x8xf32>, vector<64x64xf32> -> vector<64x64xf32>
      %cst_52 = arith.constant dense<0xFF800000> : vector<64xf32>
      %103 = vector.multi_reduction <maximumf>, %102, %cst_52 [1] : vector<64x64xf32> to vector<64xf32>
      %104 = vector.shape_cast %103 : vector<64xf32> to vector<64x1xf32>
      %105 = vector.broadcast %104 : vector<64x1xf32> to vector<64x64xf32>
      %106 = arith.subf %102, %105 : vector<64x64xf32>
      %107 = math.exp %106 : vector<64x64xf32>
      %cst_53 = arith.constant dense<0.000000e+00> : vector<64xf32>
      %108 = vector.multi_reduction <add>, %107, %cst_53 [1] : vector<64x64xf32> to vector<64xf32>
      %109 = vector.shape_cast %108 : vector<64xf32> to vector<64x1xf32>
      %110 = tpu.reciprocal %109 {approx = true} : vector<64x1xf32> -> vector<64x1xf32>
      %111 = vector.broadcast %110 : vector<64x1xf32> to vector<64x64xf32>
      %112 = arith.mulf %107, %111 : vector<64x64xf32>
      %113 = vector.extract_strided_slice %99 {offsets = [0, 0], sizes = [64, 8], strides = [1, 1]} : vector<64x32xf32> to vector<64x8xf32>
      %cst_54 = arith.constant dense<0.000000e+00> : vector<64x8xf32>
      %114 = tpu.matmul %112, %113, %cst_54 {dimension_numbers = #tpu.dot_dimension_numbers<[1], [0], [0], [1], [0, 0, 1, 1], [], []>} : vector<64x64xf32>, vector<64x8xf32>, vector<64x8xf32> -> vector<64x8xf32>
      %c0_55 = arith.constant 0 : index
      %c0_56 = arith.constant 0 : index
      %115 = vector.load %arg20[%c0_55, %c0_56] : memref<64x32xf32, #tpu.memory_space<vmem>>, vector<64x8xf32>
      tpu.vector_store %arg20[%c0_55, %c0_56], %114 {strides = array<i32>} : memref<64x32xf32, #tpu.memory_space<vmem>>, vector<64x8xf32>,
      %116 = vector.extract_strided_slice %97 {offsets = [0, 8], sizes = [64, 8], strides = [1, 1]} : vector<64x32xf32> to vector<64x8xf32>
      %117 = vector.extract_strided_slice %98 {offsets = [0, 8], sizes = [64, 8], strides = [1, 1]} : vector<64x32xf32> to vector<64x8xf32>
      %cst_57 = arith.constant dense<0.000000e+00> : vector<64x64xf32>
      %118 = tpu.matmul %116, %117, %cst_57 {dimension_numbers = #tpu.dot_dimension_numbers<[1], [1], [0], [0], [0, 0, 1, 0], [], []>} : vector<64x8xf32>, vector<64x8xf32>, vector<64x64xf32> -> vector<64x64xf32>
      %cst_58 = arith.constant dense<0xFF800000> : vector<64xf32>
      %119 = vector.multi_reduction <maximumf>, %118, %cst_58 [1] : vector<64x64xf32> to vector<64xf32>
      %120 = vector.shape_cast %119 : vector<64xf32> to vector<64x1xf32>
      %121 = vector.broadcast %120 : vector<64x1xf32> to vector<64x64xf32>
      %122 = arith.subf %118, %121 : vector<64x64xf32>
      %123 = math.exp %122 : vector<64x64xf32>
      %cst_59 = arith.constant dense<0.000000e+00> : vector<64xf32>
      %124 = vector.multi_reduction <add>, %123, %cst_59 [1] : vector<64x64xf32> to vector<64xf32>
      %125 = vector.shape_cast %124 : vector<64xf32> to vector<64x1xf32>
      %126 = tpu.reciprocal %125 {approx = true} : vector<64x1xf32> -> vector<64x1xf32>
      %127 = vector.broadcast %126 : vector<64x1xf32> to vector<64x64xf32>
      %128 = arith.mulf %123, %127 : vector<64x64xf32>
      %129 = vector.extract_strided_slice %99 {offsets = [0, 8], sizes = [64, 8], strides = [1, 1]} : vector<64x32xf32> to vector<64x8xf32>
      %cst_60 = arith.constant dense<0.000000e+00> : vector<64x8xf32>
      %130 = tpu.matmul %128, %129, %cst_60 {dimension_numbers = #tpu.dot_dimension_numbers<[1], [0], [0], [1], [0, 0, 1, 1], [], []>} : vector<64x64xf32>, vector<64x8xf32>, vector<64x8xf32> -> vector<64x8xf32>
      %c0_61 = arith.constant 0 : index
      %c8 = arith.constant 8 : index
      %131 = vector.load %arg20[%c0_61, %c8] : memref<64x32xf32, #tpu.memory_space<vmem>>, vector<64x8xf32>
      tpu.vector_store %arg20[%c0_61, %c8], %130 {strides = array<i32>} : memref<64x32xf32, #tpu.memory_space<vmem>>, vector<64x8xf32>,
      %132 = vector.extract_strided_slice %97 {offsets = [0, 16], sizes = [64, 8], strides = [1, 1]} : vector<64x32xf32> to vector<64x8xf32>
      %133 = vector.extract_strided_slice %98 {offsets = [0, 16], sizes = [64, 8], strides = [1, 1]} : vector<64x32xf32> to vector<64x8xf32>
      %cst_62 = arith.constant dense<0.000000e+00> : vector<64x64xf32>
      %134 = tpu.matmul %132, %133, %cst_62 {dimension_numbers = #tpu.dot_dimension_numbers<[1], [1], [0], [0], [0, 0, 1, 0], [], []>} : vector<64x8xf32>, vector<64x8xf32>, vector<64x64xf32> -> vector<64x64xf32>
      %cst_63 = arith.constant dense<0xFF800000> : vector<64xf32>
      %135 = vector.multi_reduction <maximumf>, %134, %cst_63 [1] : vector<64x64xf32> to vector<64xf32>
      %136 = vector.shape_cast %135 : vector<64xf32> to vector<64x1xf32>
      %137 = vector.broadcast %136 : vector<64x1xf32> to vector<64x64xf32>
      %138 = arith.subf %134, %137 : vector<64x64xf32>
      %139 = math.exp %138 : vector<64x64xf32>
      %cst_64 = arith.constant dense<0.000000e+00> : vector<64xf32>
      %140 = vector.multi_reduction <add>, %139, %cst_64 [1] : vector<64x64xf32> to vector<64xf32>
      %141 = vector.shape_cast %140 : vector<64xf32> to vector<64x1xf32>
      %142 = tpu.reciprocal %141 {approx = true} : vector<64x1xf32> -> vector<64x1xf32>
      %143 = vector.broadcast %142 : vector<64x1xf32> to vector<64x64xf32>
      %144 = arith.mulf %139, %143 : vector<64x64xf32>
      %145 = vector.extract_strided_slice %99 {offsets = [0, 16], sizes = [64, 8], strides = [1, 1]} : vector<64x32xf32> to vector<64x8xf32>
      %cst_65 = arith.constant dense<0.000000e+00> : vector<64x8xf32>
      %146 = tpu.matmul %144, %145, %cst_65 {dimension_numbers = #tpu.dot_dimension_numbers<[1], [0], [0], [1], [0, 0, 1, 1], [], []>} : vector<64x64xf32>, vector<64x8xf32>, vector<64x8xf32> -> vector<64x8xf32>
      %c0_66 = arith.constant 0 : index
      %c16 = arith.constant 16 : index
      %147 = vector.load %arg20[%c0_66, %c16] : memref<64x32xf32, #tpu.memory_space<vmem>>, vector<64x8xf32>
      tpu.vector_store %arg20[%c0_66, %c16], %146 {strides = array<i32>} : memref<64x32xf32, #tpu.memory_space<vmem>>, vector<64x8xf32>,
      %148 = vector.extract_strided_slice %97 {offsets = [0, 24], sizes = [64, 8], strides = [1, 1]} : vector<64x32xf32> to vector<64x8xf32>
      %149 = vector.extract_strided_slice %98 {offsets = [0, 24], sizes = [64, 8], strides = [1, 1]} : vector<64x32xf32> to vector<64x8xf32>
      %cst_67 = arith.constant dense<0.000000e+00> : vector<64x64xf32>
      %150 = tpu.matmul %148, %149, %cst_67 {dimension_numbers = #tpu.dot_dimension_numbers<[1], [1], [0], [0], [0, 0, 1, 0], [], []>} : vector<64x8xf32>, vector<64x8xf32>, vector<64x64xf32> -> vector<64x64xf32>
      %cst_68 = arith.constant dense<0xFF800000> : vector<64xf32>
      %151 = vector.multi_reduction <maximumf>, %150, %cst_68 [1] : vector<64x64xf32> to vector<64xf32>
      %152 = vector.shape_cast %151 : vector<64xf32> to vector<64x1xf32>
      %153 = vector.broadcast %152 : vector<64x1xf32> to vector<64x64xf32>
      %154 = arith.subf %150, %153 : vector<64x64xf32>
      %155 = math.exp %154 : vector<64x64xf32>
      %cst_69 = arith.constant dense<0.000000e+00> : vector<64xf32>
      %156 = vector.multi_reduction <add>, %155, %cst_69 [1] : vector<64x64xf32> to vector<64xf32>
      %157 = vector.shape_cast %156 : vector<64xf32> to vector<64x1xf32>
      %158 = tpu.reciprocal %157 {approx = true} : vector<64x1xf32> -> vector<64x1xf32>
      %159 = vector.broadcast %158 : vector<64x1xf32> to vector<64x64xf32>
      %160 = arith.mulf %155, %159 : vector<64x64xf32>
      %161 = vector.extract_strided_slice %99 {offsets = [0, 24], sizes = [64, 8], strides = [1, 1]} : vector<64x32xf32> to vector<64x8xf32>
      %cst_70 = arith.constant dense<0.000000e+00> : vector<64x8xf32>
      %162 = tpu.matmul %160, %161, %cst_70 {dimension_numbers = #tpu.dot_dimension_numbers<[1], [0], [0], [1], [0, 0, 1, 1], [], []>} : vector<64x64xf32>, vector<64x8xf32>, vector<64x8xf32> -> vector<64x8xf32>
      %c0_71 = arith.constant 0 : index
      %c24 = arith.constant 24 : index
      %163 = vector.load %arg20[%c0_71, %c24] : memref<64x32xf32, #tpu.memory_space<vmem>>, vector<64x8xf32>
      tpu.vector_store %arg20[%c0_71, %c24], %162 {strides = array<i32>} : memref<64x32xf32, #tpu.memory_space<vmem>>, vector<64x8xf32>,
      %c0_72 = arith.constant 0 : index
      %c0_73 = arith.constant 0 : index
      %164 = vector.load %arg20[%c0_72, %c0_73] : memref<64x32xf32, #tpu.memory_space<vmem>>, vector<64x32xf32>
      %cst_74 = arith.constant dense<0.000000e+00> : vector<64x32xf32>
      %165 = tpu.matmul %164, %50, %cst_74 {dimension_numbers = #tpu.dot_dimension_numbers<[1], [0], [0], [1], [0, 0, 1, 1], [], []>} : vector<64x32xf32>, vector<32x32xf32>, vector<64x32xf32> -> vector<64x32xf32>
      %166 = arith.addf %arg22, %165 : vector<64x32xf32>
      %167 = vector.broadcast %53 : vector<1x32xf32> to vector<64x32xf32>
      %168 = arith.addf %166, %167 : vector<64x32xf32>
      %cst_75 = arith.constant dense<0.000000e+00> : vector<64xf32>
      %169 = vector.multi_reduction <add>, %168, %cst_75 [1] : vector<64x32xf32> to vector<64xf32>
      %170 = vector.shape_cast %169 : vector<64xf32> to vector<64x1xf32>
      %cst_76 = arith.constant 3.200000e+01 : f32
      %171 = vector.broadcast %cst_76 : f32 to vector<64x1xf32>
      %172 = arith.divf %170, %171 : vector<64x1xf32>
      %173 = vector.broadcast %172 : vector<64x1xf32> to vector<64x32xf32>
      %174 = arith.subf %168, %173 : vector<64x32xf32>
      %175 = arith.mulf %174, %174 : vector<64x32xf32>
      %cst_77 = arith.constant dense<0.000000e+00> : vector<64xf32>
      %176 = vector.multi_reduction <add>, %175, %cst_77 [1] : vector<64x32xf32> to vector<64xf32>
      %177 = vector.shape_cast %176 : vector<64xf32> to vector<64x1xf32>
      %cst_78 = arith.constant 3.200000e+01 : f32
      %178 = vector.broadcast %cst_78 : f32 to vector<64x1xf32>
      %179 = arith.divf %177, %178 : vector<64x1xf32>
      %180 = vector.broadcast %172 : vector<64x1xf32> to vector<64x32xf32>
      %181 = arith.subf %168, %180 : vector<64x32xf32>
      %cst_79 = arith.constant 9.99999997E-7 : f32
      %182 = vector.broadcast %cst_79 : f32 to vector<64x1xf32>
      %183 = arith.addf %179, %182 : vector<64x1xf32>
      %184 = math.rsqrt %183 : vector<64x1xf32>
      %185 = vector.broadcast %184 : vector<64x1xf32> to vector<64x32xf32>
      %186 = arith.mulf %181, %185 : vector<64x32xf32>
      %187 = vector.broadcast %56 : vector<1x32xf32> to vector<64x32xf32>
      %188 = arith.mulf %186, %187 : vector<64x32xf32>
      %189 = vector.broadcast %59 : vector<1x32xf32> to vector<64x32xf32>
      %190 = arith.addf %188, %189 : vector<64x32xf32>
      %cst_80 = arith.constant dense<0.000000e+00> : vector<64x64xf32>
      %191 = tpu.matmul %190, %62, %cst_80 {dimension_numbers = #tpu.dot_dimension_numbers<[1], [0], [0], [1], [0, 0, 1, 1], [], []>} : vector<64x32xf32>, vector<32x64xf32>, vector<64x64xf32> -> vector<64x64xf32>
      %192 = vector.broadcast %65 : vector<1x64xf32> to vector<64x64xf32>
      %193 = arith.addf %191, %192 : vector<64x64xf32>
      %cst_81 = arith.constant 5.000000e-01 : f32
      %194 = vector.broadcast %cst_81 : f32 to vector<64x64xf32>
      %195 = arith.mulf %194, %193 : vector<64x64xf32>
      %196 = arith.mulf %193, %193 : vector<64x64xf32>
      %197 = arith.mulf %193, %196 : vector<64x64xf32>
      %cst_82 = arith.constant 4.471500e-02 : f32
      %198 = vector.broadcast %cst_82 : f32 to vector<64x64xf32>
      %199 = arith.mulf %198, %197 : vector<64x64xf32>
      %200 = arith.addf %193, %199 : vector<64x64xf32>
      %cst_83 = arith.constant 0.797884583 : f32
      %201 = vector.broadcast %cst_83 : f32 to vector<64x64xf32>
      %202 = arith.mulf %201, %200 : vector<64x64xf32>
      %203 = math.tanh %202 : vector<64x64xf32>
      %cst_84 = arith.constant 1.000000e+00 : f32
      %204 = vector.broadcast %cst_84 : f32 to vector<64x64xf32>
      %205 = arith.addf %204, %203 : vector<64x64xf32>
      %206 = arith.mulf %195, %205 : vector<64x64xf32>
      %cst_85 = arith.constant dense<0.000000e+00> : vector<64x32xf32>
      %207 = tpu.matmul %206, %68, %cst_85 {dimension_numbers = #tpu.dot_dimension_numbers<[1], [0], [0], [1], [0, 0, 1, 1], [], []>} : vector<64x64xf32>, vector<64x32xf32>, vector<64x32xf32> -> vector<64x32xf32>
      %208 = arith.addf %168, %207 : vector<64x32xf32>
      %209 = vector.broadcast %71 : vector<1x32xf32> to vector<64x32xf32>
      %210 = arith.addf %208, %209 : vector<64x32xf32>
      scf.yield %210 : vector<64x32xf32>
    }
    %c2_i32_5 = arith.constant 2 : i32
    %c0_6 = arith.constant 0 : index
    %c0_7 = arith.constant 0 : index
    %7 = vector.load %arg16[%c0_6, %c0_7] : memref<1x32xf32, #tpu.memory_space<vmem>>, vector<1x32xf32>
    %c0_8 = arith.constant 0 : index
    %c0_9 = arith.constant 0 : index
    %8 = vector.load %arg17[%c0_8, %c0_9] : memref<1x32xf32, #tpu.memory_space<vmem>>, vector<1x32xf32>
    %cst_10 = arith.constant dense<0.000000e+00> : vector<64xf32>
    %9 = vector.multi_reduction <add>, %6, %cst_10 [1] : vector<64x32xf32> to vector<64xf32>
    %10 = vector.shape_cast %9 : vector<64xf32> to vector<64x1xf32>
    %cst_11 = arith.constant 3.200000e+01 : f32
    %11 = vector.broadcast %cst_11 : f32 to vector<64x1xf32>
    %12 = arith.divf %10, %11 : vector<64x1xf32>
    %13 = vector.broadcast %12 : vector<64x1xf32> to vector<64x32xf32>
    %14 = arith.subf %6, %13 : vector<64x32xf32>
    %15 = arith.mulf %14, %14 : vector<64x32xf32>
    %cst_12 = arith.constant dense<0.000000e+00> : vector<64xf32>
    %16 = vector.multi_reduction <add>, %15, %cst_12 [1] : vector<64x32xf32> to vector<64xf32>
    %17 = vector.shape_cast %16 : vector<64xf32> to vector<64x1xf32>
    %cst_13 = arith.constant 3.200000e+01 : f32
    %18 = vector.broadcast %cst_13 : f32 to vector<64x1xf32>
    %19 = arith.divf %17, %18 : vector<64x1xf32>
    %20 = vector.broadcast %12 : vector<64x1xf32> to vector<64x32xf32>
    %21 = arith.subf %6, %20 : vector<64x32xf32>
    %cst_14 = arith.constant 9.99999997E-7 : f32
    %22 = vector.broadcast %cst_14 : f32 to vector<64x1xf32>
    %23 = arith.addf %19, %22 : vector<64x1xf32>
    %24 = math.rsqrt %23 : vector<64x1xf32>
    %25 = vector.broadcast %24 : vector<64x1xf32> to vector<64x32xf32>
    %26 = arith.mulf %21, %25 : vector<64x32xf32>
    %27 = vector.broadcast %7 : vector<1x32xf32> to vector<64x32xf32>
    %28 = arith.mulf %26, %27 : vector<64x32xf32>
    %29 = vector.broadcast %8 : vector<1x32xf32> to vector<64x32xf32>
    %30 = arith.addf %28, %29 : vector<64x32xf32>
    %c0_15 = arith.constant 0 : index
    %c0_16 = arith.constant 0 : index
    %31 = vector.load %arg18[%c0_15, %c0_16] : memref<4x64xf32, #tpu.memory_space<vmem>>, vector<4x64xf32>
    %cst_17 = arith.constant dense<0.000000e+00> : vector<4x32xf32>
    %32 = tpu.matmul %31, %30, %cst_17 {dimension_numbers = #tpu.dot_dimension_numbers<[1], [0], [0], [1], [0, 0, 1, 1], [], []>} : vector<4x64xf32>, vector<64x32xf32>, vector<4x32xf32> -> vector<4x32xf32>
    %c0_18 = arith.constant 0 : index
    %c0_19 = arith.constant 0 : index
    %c0_20 = arith.constant 0 : index
    %33 = vector.load %arg19[%c0_18, %c0_19, %c0_20] : memref<1x4x32xf32, #tpu.memory_space<vmem>>, vector<1x4x32xf32>
    %34 = vector.shape_cast %33 : vector<1x4x32xf32> to vector<4x32xf32>
    %35 = vector.shape_cast %32 : vector<4x32xf32> to vector<1x4x32xf32>
    tpu.vector_store %arg19[%c0_18, %c0_19, %c0_20], %35 {strides = array<i32>} : memref<1x4x32xf32, #tpu.memory_space<vmem>>, vector<1x4x32xf32>,
    return
  }
  func.func @transform_0(%arg0: i32) -> (i32, i32) {
    %c0_i32 = arith.constant 0 : i32
    %c0_i32_0 = arith.constant 0 : i32
    return %arg0, %c0_i32 : i32, i32
  }
  func.func @transform_1(%arg0: i32) -> (i32, i32) {
    %c0_i32 = arith.constant 0 : i32
    %c0_i32_0 = arith.constant 0 : i32
    %c0_i32_1 = arith.constant 0 : i32
    return %c0_i32, %c0_i32_0 : i32, i32
  }
  func.func @transform_2(%arg0: i32) -> (i32, i32) {
    %c0_i32 = arith.constant 0 : i32
    %c0_i32_0 = arith.constant 0 : i32
    %c0_i32_1 = arith.constant 0 : i32
    return %c0_i32, %c0_i32_0 : i32, i32
  }
  func.func @transform_3(%arg0: i32) -> (i32, i32, i32) {
    %c0_i32 = arith.constant 0 : i32
    %c0_i32_0 = arith.constant 0 : i32
    %c0_i32_1 = arith.constant 0 : i32
    %c0_i32_2 = arith.constant 0 : i32
    return %c0_i32, %c0_i32_0, %c0_i32_1 : i32, i32, i32
  }
  func.func @transform_4(%arg0: i32) -> (i32, i32, i32) {
    %c0_i32 = arith.constant 0 : i32
    %c0_i32_0 = arith.constant 0 : i32
    %c0_i32_1 = arith.constant 0 : i32
    %c0_i32_2 = arith.constant 0 : i32
    return %c0_i32, %c0_i32_0, %c0_i32_1 : i32, i32, i32
  }
  func.func @transform_5(%arg0: i32) -> (i32, i32, i32) {
    %c0_i32 = arith.constant 0 : i32
    %c0_i32_0 = arith.constant 0 : i32
    %c0_i32_1 = arith.constant 0 : i32
    %c0_i32_2 = arith.constant 0 : i32
    return %c0_i32, %c0_i32_0, %c0_i32_1 : i32, i32, i32
  }
  func.func @transform_6(%arg0: i32) -> (i32, i32, i32) {
    %c0_i32 = arith.constant 0 : i32
    %c0_i32_0 = arith.constant 0 : i32
    %c0_i32_1 = arith.constant 0 : i32
    %c0_i32_2 = arith.constant 0 : i32
    return %c0_i32, %c0_i32_0, %c0_i32_1 : i32, i32, i32
  }
  func.func @transform_7(%arg0: i32) -> (i32, i32, i32) {
    %c0_i32 = arith.constant 0 : i32
    %c0_i32_0 = arith.constant 0 : i32
    %c0_i32_1 = arith.constant 0 : i32
    %c0_i32_2 = arith.constant 0 : i32
    return %c0_i32, %c0_i32_0, %c0_i32_1 : i32, i32, i32
  }
  func.func @transform_8(%arg0: i32) -> (i32, i32, i32) {
    %c0_i32 = arith.constant 0 : i32
    %c0_i32_0 = arith.constant 0 : i32
    %c0_i32_1 = arith.constant 0 : i32
    %c0_i32_2 = arith.constant 0 : i32
    return %c0_i32, %c0_i32_0, %c0_i32_1 : i32, i32, i32
  }
  func.func @transform_9(%arg0: i32) -> (i32, i32, i32) {
    %c0_i32 = arith.constant 0 : i32
    %c0_i32_0 = arith.constant 0 : i32
    %c0_i32_1 = arith.constant 0 : i32
    %c0_i32_2 = arith.constant 0 : i32
    return %c0_i32, %c0_i32_0, %c0_i32_1 : i32, i32, i32
  }
  func.func @transform_10(%arg0: i32) -> (i32, i32, i32) {
    %c0_i32 = arith.constant 0 : i32
    %c0_i32_0 = arith.constant 0 : i32
    %c0_i32_1 = arith.constant 0 : i32
    %c0_i32_2 = arith.constant 0 : i32
    return %c0_i32, %c0_i32_0, %c0_i32_1 : i32, i32, i32
  }
  func.func @transform_11(%arg0: i32) -> (i32, i32, i32) {
    %c0_i32 = arith.constant 0 : i32
    %c0_i32_0 = arith.constant 0 : i32
    %c0_i32_1 = arith.constant 0 : i32
    %c0_i32_2 = arith.constant 0 : i32
    return %c0_i32, %c0_i32_0, %c0_i32_1 : i32, i32, i32
  }
  func.func @transform_12(%arg0: i32) -> (i32, i32, i32) {
    %c0_i32 = arith.constant 0 : i32
    %c0_i32_0 = arith.constant 0 : i32
    %c0_i32_1 = arith.constant 0 : i32
    %c0_i32_2 = arith.constant 0 : i32
    return %c0_i32, %c0_i32_0, %c0_i32_1 : i32, i32, i32
  }
  func.func @transform_13(%arg0: i32) -> (i32, i32, i32) {
    %c0_i32 = arith.constant 0 : i32
    %c0_i32_0 = arith.constant 0 : i32
    %c0_i32_1 = arith.constant 0 : i32
    %c0_i32_2 = arith.constant 0 : i32
    return %c0_i32, %c0_i32_0, %c0_i32_1 : i32, i32, i32
  }
  func.func @transform_14(%arg0: i32) -> (i32, i32, i32) {
    %c0_i32 = arith.constant 0 : i32
    %c0_i32_0 = arith.constant 0 : i32
    %c0_i32_1 = arith.constant 0 : i32
    %c0_i32_2 = arith.constant 0 : i32
    return %c0_i32, %c0_i32_0, %c0_i32_1 : i32, i32, i32
  }
  func.func @transform_15(%arg0: i32) -> (i32, i32) {
    %c0_i32 = arith.constant 0 : i32
    %c0_i32_0 = arith.constant 0 : i32
    %c0_i32_1 = arith.constant 0 : i32
    return %c0_i32, %c0_i32_0 : i32, i32
  }
  func.func @transform_16(%arg0: i32) -> (i32, i32) {
    %c0_i32 = arith.constant 0 : i32
    %c0_i32_0 = arith.constant 0 : i32
    %c0_i32_1 = arith.constant 0 : i32
    return %c0_i32, %c0_i32_0 : i32, i32
  }
  func.func @transform_17(%arg0: i32) -> (i32, i32) {
    %c0_i32 = arith.constant 0 : i32
    %c0_i32_0 = arith.constant 0 : i32
    %c0_i32_1 = arith.constant 0 : i32
    return %c0_i32, %c0_i32_0 : i32, i32
  }
  func.func @transform_18(%arg0: i32) -> (i32, i32, i32) {
    %c0_i32 = arith.constant 0 : i32
    %c0_i32_0 = arith.constant 0 : i32
    %c0_i32_1 = arith.constant 0 : i32
    return %arg0, %c0_i32, %c0_i32_0 : i32, i32, i32
  }
}

</mosaic_0001>

<bundles_post_ra>
// kernel: _lambda_.1
= control target key start
LH: loop header
LB: loop body
LE: loop exit
PB: predicated region body
PF: predicated region fallthrough
CT: control target
= control target key end

     0   :  { %s5437_s0 = inlined_call_operand.vmem [shape: f32[128,12], index: 0, kind: input, shape index: {}]   ;;  %s5438_s1 = inlined_call_operand.vmem [shape: f32[12,32], index: 1, kind: input, shape index: {}]   ;;  %s5439_s2 = inlined_call_operand.vmem [shape: f32[64,32], index: 2, kind: input, shape index: {}]   ;;  %s5440_s3 = inlined_call_operand.vmem [shape: f32[2,1,32], index: 3, kind: input, shape index: {}]   ;;  %s5441_s4 = inlined_call_operand.vmem [shape: f32[2,1,32], index: 4, kind: input, shape index: {}]   ;;  %s5442_s5 = inlined_call_operand.vmem [shape: f32[2,32,96], index: 5, kind: input, shape index: {}]   ;;  %s5443_s6 = inlined_call_operand.vmem [shape: f32[2,1,96], index: 6, kind: input, shape index: {}]   ;;  %s5444_s7 = inlined_call_operand.vmem [shape: f32[2,32,32], index: 7, kind: input, shape index: {}]   ;;  %s5445_s8 = inlined_call_operand.vmem [shape: f32[2,1,32], index: 8, kind: input, shape index: {}]   ;;  %s5446_s9 = inlined_call_operand.vmem [shape: f32[2,1,32], index: 9, kind: input, shape index: {}]   ;;  %s5447_s10 = inlined_call_operand.vmem [shape: f32[2,1,32], index: 10, kind: input, shape index: {}]   ;;  %s5448_s11 = inlined_call_operand.vmem [shape: f32[2,32,64], index: 11, kind: input, shape index: {}]   ;;  %s5449_s12 = inlined_call_operand.vmem [shape: f32[2,1,64], index: 12, kind: input, shape index: {}]   ;;  %s5450_s13 = inlined_call_operand.vmem [shape: f32[2,64,32], index: 13, kind: input, shape index: {}]   ;;  %s5451_s14 = inlined_call_operand.vmem [shape: f32[2,1,32], index: 14, kind: input, shape index: {}]   ;;  %s5452_s15 = inlined_call_operand.vmem [shape: f32[1,32], index: 15, kind: input, shape index: {}]   ;;  %s5453_s16 = inlined_call_operand.vmem [shape: f32[1,32], index: 16, kind: input, shape index: {}]   ;;  %s5454_s17 = inlined_call_operand.vmem [shape: f32[4,64], index: 17, kind: input, shape index: {}]   ;;  %s5455_s18 = inlined_call_operand.hbm [shape: f32[2,4,32], index: 18, kind: output, shape index: {}]  }
   0x1   :  { %5465 = sst [smem:[#allocation10_spill]] %s5437_s0 }
   0x2   :  { %5466 = sst [smem:[#allocation11_spill]] %s5438_s1 }
   0x3   :  { %5467 = sst [smem:[#allocation12_spill]] %s5439_s2 }
   0x4   :  { %5468 = sst [smem:[#allocation13_spill]] %s5440_s3 }
   0x5   :  { %5469 = sst [smem:[#allocation14_spill]] %s5441_s4 }
   0x6   :  { %5470 = sst [smem:[#allocation15_spill]] %s5442_s5 }
   0x7   :  { %23 = vsyncpa [#allocation4], 0 }
   0x8   :  { %25 = vsyncpa [#allocation4 + $0x1], 0  ;;  %s3933_s27 = smov 0   ;;  %s3935_s28 = smov 0  }
   0x9   :  { %s3937_s29 = smov 0   ;;  %s3939_s30 = smov 0  }
   0xa LB: > { %5471 = sst [smem:[#allocation6_spill]] %s3781_s29  ;;  %s3954_s0 = sadd.s32 4294967295, %s3785_s30   ;;  %s3785_s30 = sphi %s3939_s30, %s5508_s30   ;;  %s3781_s29 = sphi %s3937_s29, %s5510_s29   ;;  %s3777_s28 = sphi %s3935_s28, %s5512_s28   ;;  %s3773_s27 = sphi %s3933_s27, %s5511_s27  }
   0xb   : > { %s3116_s19 = sadd.s32 4294967294, %s3785_s30   ;;  %s3958_s1 = sadd.s32 1, %s3785_s30  }
   0xc   : > { %5472 = sst [smem:[#allocation7_spill]] %s3958_s1  ;;  %s421_s20 = sadd.s32 1, %s3781_s29 }
   0xd   : > { %s418_s21 = ssub.s32 %s3785_s30, %s3958_s1  ;;  %p431_p0 = scmp.ne.s32.totalorder %s3781_s29, %s3777_s28 }
   0xe   : > { %p419_p1 = scmp.eq.s32.totalorder %s418_s21, 0  ;;  %p432_p2 = scmp.eq.s32.totalorder %s3954_s0, 1 }
   0xf   : > { %p437_p3 = scmp.ne.s32.totalorder %s3777_s28, %s3773_s27  ;;  %p438_p4 = scmp.eq.s32.totalorder %s3116_s19, 1 }
  0x10   : > { %s3969_s22 = scalar_select %p419_p1, %s3781_s29, %s421_s20  }
  0x11   : > { %p3971_p5 = por %p432_p2, %p431_p0  ;;  %p3975_p6 = por %p438_p4, %p437_p3 }
  0x12   : > { %5473 = sst [smem:[#allocation8_spill]] %s3969_s22  ;;  %p3119_p7 = scmp.ge.s32.totalorder %s3785_s30, 1 }
  0x13   : > { %s5475_s23 = scalar_select %p3975_p6, 1, 0 }
  0x14   : > { %p516_p8 = scmp.lt.s32.totalorder %s3785_s30, 3 }
  0x15   : > { %5476 = sst [smem:[#allocation9_spill]] %s5475_s23 }
  0x16   : > { %p517_p9 = pnand %p3119_p7, %p516_p8 }
  0x17   : > { %s5477_s26 = sld [smem:[#allocation11_spill]] (!%p517_p9)  ;;  %s3121_s21 = sshll.u32 (!%p517_p9), %s3954_s0, 3 }
  0x18   : > { %520 = sbr.rel (%p517_p9) target bundleno = 3212 (0xc8c), region = 92  ;;  %p571_p10 = scmp.lt.s32.totalorder (!%p517_p9), %s3121_s21, 15 }
  0x19   : > { %s5460_s22 = sand.u32 (!%p517_p9), 1, %s3777_s28   ;;  %s5478_s20 = sld [smem:[#allocation10_spill]] (!%p517_p9) }
  0x1a   : > { %s3991_s29 = sshll.u32 (!%p517_p9), %s5460_s22, 2  ;;  %s5479_s25 = sld [smem:[#allocation12_spill]] (!%p517_p9) }
  0x1d   : > { %v585_v0 = vld [vmem:[%s5477_s26 + $0x8] sm:$0xf]  ;;  %vm619_vm0 = vcmask 1043456   ;;  %v584_v1 = vld [vmem:[%s5477_s26] sm:$0xff]  ;;  %s5514_s21 = smov (!%p571_p10, %s3121_s21), 15  ;;  %vm594_vm1 = vcmask 97280  }
  0x1e   : > { %3268 = vmatpush.msk.msra.mxu2 %vm619_vm0, %v585_v0  ;;  %3269 = vmatpush.msk.msra.mxu3 %vm619_vm0, %v585_v0  ;;  %s3122_s24 = sshll.u32 %s5514_s21, 3 }
  0x1f   : > { %3123 = vmatpush.msk.msra.mxu0 %vm619_vm0, %v585_v0  ;;  %3267 = vmatpush.msk.msra.mxu1 %vm619_vm0, %v585_v0  ;;  %s574_s26 = scalar_lea.vmem %s5478_s20, %s3122_s24  ;;  %s4045_s24 = smov 0  }
  0x20   : > { %3271 = vmatpush.msra.mxu2 %v584_v1  ;;  %3272 = vmatpush.msra.mxu3 %v584_v1  ;;  %v580_v2 = vld [vmem:[%s574_s26 + $0x20] sm:$0xff]  ;;  %v582_v3 = vld [vmem:[%s574_s26 + $0x30] sm:$0xff]  ;;  %v581_v6 = vld [vmem:[%s574_s26 + $0x28] sm:$0xff] }
  0x21   : > { %638 = vmatpush.msra.mxu0 %v584_v1  ;;  %3270 = vmatpush.msra.mxu1 %v584_v1  ;;  %v576_v4 = vld [vmem:[%s574_s26] sm:$0xff]  ;;  %v578_v5 = vld [vmem:[%s574_s26 + $0x10] sm:$0xff]  ;;  %v583_v7 = vld [vmem:[%s574_s26 + $0x38] sm:$0xff] }
  0x22   : > { %3128 = vmatmul.msk.f32.vlgmr.msra.gmra.mxu2 %vm594_vm1, %v580_v2  ;;  %3130 = vmatmul.msk.f32.vlgmr.msra.gmra.mxu3 %vm594_vm1, %v582_v3  ;;  %v577_v8 = vld [vmem:[%s574_s26 + $0x8] sm:$0xff]  ;;  %v579_v9 = vld [vmem:[%s574_s26 + $0x18] sm:$0xff]  ;;  %v586_v10 = vld [vmem:[%s5479_s25] sm:$0xff] }
  0x23   : > { %3124 = vmatmul.msk.f32.vlgmr.msra.gmra.mxu0 %vm594_vm1, %v576_v4  ;;  %3126 = vmatmul.msk.f32.vlgmr.msra.gmra.mxu1 %vm594_vm1, %v578_v5  ;;  %v588_v11 = vld [vmem:[%s5479_s25 + $0x10] sm:$0xff]  ;;  %v590_v16 = vld [vmem:[%s5479_s25 + $0x20] sm:$0xff]  ;;  %v587_v22 = vld [vmem:[%s5479_s25 + $0x8] sm:$0xff] }
  0x24   : > { %v592_v17 = vld [vmem:[%s5479_s25 + $0x30] sm:$0xff]  ;;  %v589_v23 = vld [vmem:[%s5479_s25 + $0x18] sm:$0xff]  ;;  %v591_v28 = vld [vmem:[%s5479_s25 + $0x28] sm:$0xff] }
  0x25   : > { %v593_v29 = vld [vmem:[%s5479_s25 + $0x38] sm:$0xff] }
  0x2a   : > { %3129 = vmatmul.msk.f32.gmra.mxu2 %vm594_vm1, %v581_v6  ;;  %3131 = vmatmul.msk.f32.gmra.mxu3 %vm594_vm1, %v583_v7 }
  0x2b   : > { %3125 = vmatmul.msk.f32.gmra.mxu0 %vm594_vm1, %v577_v8  ;;  %3127 = vmatmul.msk.f32.gmra.mxu1 %vm594_vm1, %v579_v9 }
  0xa0   : > { %v640_v12 = vpop.f32.mrf.mxu0  ;;  %v646_v13 = vpop.f32.mrf.mxu1 }
  0xa1   : > { %v641_v14 = vadd.f32 %v640_v12, %v586_v10   ;;  %v647_v15 = vadd.f32 %v646_v13, %v588_v11  }
  0xa5   : > { %v652_v18 = vpop.f32.mrf.mxu2  ;;  %v658_v19 = vpop.f32.mrf.mxu3 }
  0xa6   : > { %v653_v20 = vadd.f32 %v652_v18, %v590_v16   ;;  %v659_v21 = vadd.f32 %v658_v19, %v592_v17  }
  0xa8   : > { %v643_v24 = vpop.f32.mrf.mxu0  ;;  %v649_v25 = vpop.f32.mrf.mxu1 }
  0xa9   : > { %v644_v26 = vadd.f32 %v643_v24, %v587_v22   ;;  %v650_v27 = vadd.f32 %v649_v25, %v589_v23  }
  0xad   : > { %v655_v30 = vpop.f32.mrf.mxu2  ;;  %v661_v31 = vpop.f32.mrf.mxu3 }
  0xae   : > { %v656_v32 = vadd.f32 %v655_v30, %v591_v28   ;;  %v662_v33 = vadd.f32 %v661_v31, %v593_v29  }
  0xaf LB: >> { %vm720_vm2 = vcmask 261120   ;;  %v3823_v41 = vmov 32.0   ;;  %s5480_s3 = sld [smem:[#allocation13_spill]]  ;;  %s4150_s19 = sshll.u32 %s3821_s24, 5  ;;  %s3821_s24 = sphi %s4045_s24, %s669_s24   ;;  %v3817_v14 = vphi %v641_v14, %v5495_v14   ;;  %v3813_v26 = vphi %v644_v26, %v5494_v26   ;;  %v3809_v15 = vphi %v647_v15, %v5493_v15   ;;  %v3805_v27 = vphi %v650_v27, %v5492_v27   ;;  %v3801_v20 = vphi %v653_v20, %v5491_v20   ;;  %v3797_v32 = vphi %v656_v32, %v5490_v32   ;;  %v3793_v21 = vphi %v659_v21, %v5489_v21   ;;  %v3789_v33 = vphi %v662_v33, %v5488_v33  }
  0xb0   : >> { %v721_v34 = vsel %vm720_vm2, %v3817_v14, 0.0  ;;  %v727_v35 = vsel %vm720_vm2, %v3809_v15, 0.0  ;;  %v733_v36 = vsel %vm720_vm2, %v3801_v20, 0.0  ;;  %v724_v37 = vsel %vm720_vm2, %v3813_v26, 0.0  ;;  %s5481_s4 = sld [smem:[#allocation14_spill]]  ;;  %s688_s20 = scalar_lea.vmem %s5443_s6, %s3821_s24 }
  0xb1   : >> { %722 = vadd.xlane.f32.xlu0 %v721_v34  ;;  %728 = vadd.xlane.f32.xlu1 %v727_v35  ;;  %v730_v38 = vsel %vm720_vm2, %v3805_v27, 0.0  ;;  %v736_v39 = vsel %vm720_vm2, %v3797_v32, 0.0  ;;  %v739_v40 = vsel %vm720_vm2, %v3793_v21, 0.0  ;;  %3491 = vrcp.f32 %v3823_v41  ;;  %s5482_s5 = sld [smem:[#allocation15_spill]]  ;;  %s3824_s21 = smov 96  }
  0xb2   : >> { %734 = vadd.xlane.f32.xlu2 %v733_v36  ;;  %v742_v7 = vsel %vm720_vm2, %v3789_v33, 0.0  ;;  %s3827_s1 = smov 64   ;;  %s3831_s25 = smov 104  }
  0xb5   : >> { %s678_s22 = scalar_lea.vmem %s5480_s3, %s3821_s24 }
  0xb6   : >> { %s680_s26 = scalar_lea.vmem %s5481_s4, %s3821_s24 }
  0xb7   : >> { %v3492_v42 = vpop.eup %3491  ;;  %s683_s23 = scalar_lea.vmem %s5482_s5, %s4150_s19  ;;  %s3830_s5 = smov 112  }
  0xb8   : >> { %v746_v43 = vmul.f32 32.0, %v3492_v42  ;;  %vm750_vm3 = vweird.f32 %v3492_v42  ;;  %v687_v24 = vld [vmem:[%s683_s23 + $0x18] sm:$0xff]  ;;  %v686_v25 = vld [vmem:[%s683_s23 + $0x10] sm:$0xff]  ;;  %v685_v28 = vld [vmem:[%s683_s23 + $0x8] sm:$0xff] }
  0xb9   : >> { %725 = vadd.xlane.f32.xlu0 %v724_v37  ;;  %731 = vadd.xlane.f32.xlu1 %v730_v38  ;;  %v684_v29 = vld [vmem:[%s683_s23] sm:$0xff]  ;;  %s3828_s23 = smov 80  }
  0xba   : >> { %737 = vadd.xlane.f32.xlu2 %v736_v39  ;;  %v747_v44 = vsub.f32 1.0, %v746_v43  ;;  %965 = vmatpush.msra.mxu0 %v687_v24 }
  0xbc   : >> { %v748_v45 = vmul.f32 %v3492_v42, %v747_v44  ;;  %966 = vmatpush.msra.mxu0 %v686_v25 }
  0xbe   : >> { %v749_v46 = vadd.f32 %v3492_v42, %v748_v45  ;;  %967 = vmatpush.msra.mxu0 %v685_v28 }
  0xc0   : >> { %v4088_v47 = vsel %vm750_vm3, %v3492_v42, %v749_v46  ;;  %968 = vmatpush.msra.mxu0 %v684_v29 }
  0xc1   : >> { %740 = vadd.xlane.f32.xlu1 %v739_v40 }
 0x124   : >> { %v723_v48 = vpop.xlane.xlu0 %722  ;;  %v729_v49 = vpop.xlane.xlu1 %728 }
 0x125   : >> { %v752_v50 = vmul.f32 %v4088_v47, %v723_v48  ;;  %v754_v51 = vmul.f32 %v4088_v47, %v729_v49  ;;  %v735_v52 = vpop.xlane.xlu2 %734 }
 0x126   : >> { %v756_v61 = vmul.f32 %v4088_v47, %v735_v52 }
 0x127   : >> { %v4093_v53 = vsub.f32 %v3817_v14, %v752_v50  ;;  %v4096_v54 = vsub.f32 %v3809_v15, %v754_v51 }
 0x128   : >> { %v4115_v4 = vsub.f32 %v3801_v20, %v756_v61 }
 0x129   : >> { %v768_v55 = vmul.f32 %v4093_v53, %v4093_v53  ;;  %v770_v56 = vmul.f32 %v4096_v54, %v4096_v54 }
 0x12a   : >> { %v772_v16 = vmul.f32 %v4115_v4, %v4115_v4 }
 0x12b   : >> { %v776_v57 = vsel %vm720_vm2, %v768_v55, 0.0  ;;  %v782_v58 = vsel %vm720_vm2, %v770_v56, 0.0 }
 0x12c   : >> { %777 = vadd.xlane.f32.xlu0 %v776_v57  ;;  %v726_v59 = vpop.xlane.xlu0 %725  ;;  %783 = vadd.xlane.f32.xlu1 %v782_v58  ;;  %v732_v60 = vpop.xlane.xlu1 %731  ;;  %v788_v19 = vsel %vm720_vm2, %v772_v16, 0.0 }
 0x12d   : >> { %v753_v62 = vmul.f32 %v4088_v47, %v726_v59  ;;  %v738_v63 = vpop.xlane.xlu2 %737  ;;  %v755_v0 = vmul.f32 %v4088_v47, %v732_v60 }
 0x12e   : >> { %v757_v1 = vmul.f32 %v4088_v47, %v738_v63 }
 0x12f   : >> { %v4109_v2 = vsub.f32 %v3813_v26, %v753_v62  ;;  %v4118_v5 = vsub.f32 %v3805_v27, %v755_v0 }
 0x130   : >> { %v4112_v3 = vsub.f32 %v3797_v32, %v757_v1 }
 0x131   : >> { %v769_v6 = vmul.f32 %v4109_v2, %v4109_v2  ;;  %v771_v12 = vmul.f32 %v4118_v5, %v4118_v5 }
 0x132   : >> { %v773_v8 = vmul.f32 %v4112_v3, %v4112_v3 }
 0x133   : >> { %v779_v9 = vsel %vm720_vm2, %v769_v6, 0.0  ;;  %v785_v17 = vsel %vm720_vm2, %v771_v12, 0.0 }
 0x134   : >> { %780 = vadd.xlane.f32.xlu2 %v779_v9  ;;  %v791_v10 = vsel %vm720_vm2, %v773_v8, 0.0  ;;  %743 = vadd.xlane.f32.xlu0 %v742_v7  ;;  %v741_v11 = vpop.xlane.xlu1 %740 }
 0x135   : >> { %792 = vadd.xlane.f32.xlu1 %v791_v10  ;;  %v758_v13 = vmul.f32 %v4088_v47, %v741_v11  ;;  %v4185_v10 = vld [vmem:[%s678_s22] ss:$0 sm:$0xff]  ;;  %s3825_s22 = smov 88  }
 0x137   : >> { %v4143_v18 = vsub.f32 %v3793_v21, %v758_v13 }
 0x139   : >> { %v774_v22 = vmul.f32 %v4143_v18, %v4143_v18 }
 0x13b   : >> { %v794_v23 = vsel %vm720_vm2, %v774_v22, 0.0 }
 0x13c   : >> { %786 = vadd.xlane.f32.xlu2 %v785_v17  ;;  %789 = vadd.xlane.f32.xlu0 %v788_v19  ;;  %v4195_v17 = vld [vmem:[%s680_s26] ss:$0 sm:$0xff]  ;;  %s3826_s26 = smov 72  }
 0x144   : >> { %795 = vadd.xlane.f32.xlu2 %v794_v23 }
 0x19f   : >> { %v778_v30 = vpop.xlane.xlu0 %777  ;;  %v784_v31 = vpop.xlane.xlu1 %783 }
 0x1a0   : >> { %v800_v34 = vmul.f32 %v778_v30, %v4088_v47  ;;  %v802_v35 = vmul.f32 %v784_v31, %v4088_v47 }
 0x1a2   : >> { %v808_v36 = vadd.f32 1e-06, %v800_v34  ;;  %v4158_v37 = vadd.f32 1e-06, %v802_v35 }
 0x1a4   : >> { %3493 = vrsqrt.f32 %v808_v36  ;;  %vm822_vm5 = vweird.f32 %v808_v36  ;;  %vm842_vm9 = vweird.f32 %v4158_v37 }
 0x1a5   : >> { %3495 = vrsqrt.f32 %v4158_v37 }
 0x1a7   : >> { %v781_v38 = vpop.xlane.xlu2 %780  ;;  %v744_v39 = vpop.xlane.xlu0 %743 }
 0x1a8   : >> { %v801_v40 = vmul.f32 %v781_v38, %v4088_v47  ;;  %v759_v41 = vmul.f32 %v4088_v47, %v744_v39  ;;  %v793_v51 = vpop.xlane.xlu1 %792 }
 0x1a9   : >> { %v805_v63 = vmul.f32 %v793_v51, %v4088_v47 }
 0x1aa   : >> { %v3494_v42 = vpop.eup %3493  ;;  %v809_v43 = vadd.f32 1e-06, %v801_v40  ;;  %v4164_v44 = vsub.f32 %v3789_v33, %v759_v41 }
 0x1ab   : >> { %v4166_v45 = vpop.eup %3495  ;;  %v817_v46 = vmul.f32 %v3494_v42, %v808_v36  ;;  %vm823_vm4 = vweird.f32 %v3494_v42  ;;  %v4187_v11 = vadd.f32 1e-06, %v805_v63 }
 0x1ac   : >> { %v837_v48 = vmul.f32 %v4166_v45, %v4158_v37  ;;  %3497 = vrsqrt.f32 %v809_v43  ;;  %v775_v50 = vmul.f32 %v4164_v44, %v4164_v44  ;;  %vm824_vm6 = vmor %vm822_vm5, %vm823_vm4  ;;  %vm832_vm7 = vweird.f32 %v809_v43 }
 0x1ad   : >> { %v818_v49 = vmul.f32 %v3494_v42, %v817_v46  ;;  %vm843_vm10 = vweird.f32 %v4166_v45  ;;  %vm872_vm4 = vweird.f32 %v4187_v11 }
 0x1ae   : >> { %v797_v56 = vsel %vm720_vm2, %v775_v50, 0.0  ;;  %v838_v58 = vmul.f32 %v4166_v45, %v837_v48  ;;  %vm4209_vm12 = vmor %vm842_vm9, %vm843_vm10 }
 0x1af   : >> { %v819_v52 = vmul.f32 0.5, %v818_v49  ;;  %v787_v55 = vpop.xlane.xlu2 %786  ;;  %v790_v57 = vpop.xlane.xlu0 %789  ;;  %798 = vadd.xlane.f32.xlu0 %v797_v56 }
 0x1b0   : >> { %v803_v59 = vmul.f32 %v787_v55, %v4088_v47  ;;  %v804_v60 = vmul.f32 %v790_v57, %v4088_v47  ;;  %v839_v8 = vmul.f32 0.5, %v838_v58 }
 0x1b1   : >> { %v820_v61 = vsub.f32 1.5, %v819_v52 }
 0x1b2   : >> { %v3498_v62 = vpop.eup %3497  ;;  %v811_v0 = vadd.f32 1e-06, %v803_v59  ;;  %v4177_v1 = vadd.f32 1e-06, %v804_v60  ;;  %v840_v19 = vsub.f32 1.5, %v839_v8 }
 0x1b3   : >> { %v821_v6 = vmul.f32 %v3494_v42, %v820_v61  ;;  %v827_v7 = vmul.f32 %v3498_v62, %v809_v43  ;;  %vm833_vm8 = vweird.f32 %v3498_v62 }
 0x1b4   : >> { %3499 = vrsqrt.f32 %v811_v0  ;;  %vm834_vm11 = vmor %vm832_vm7, %vm833_vm8  ;;  %v841_v34 = vmul.f32 %v4166_v45, %v840_v19  ;;  %vm852_vm13 = vweird.f32 %v811_v0  ;;  %vm862_vm0 = vweird.f32 %v4177_v1 }
 0x1b5   : >> { %v828_v9 = vmul.f32 %v3498_v62, %v827_v7  ;;  %3501 = vrsqrt.f32 %v4177_v1  ;;  %v825_v12 = vsel %vm824_vm6, %v3494_v42, %v821_v6 }
 0x1b6   : >> { %v896_v16 = vmul.f32 %v825_v12, %v4093_v53  ;;  %3503 = vrsqrt.f32 %v4187_v11  ;;  %v845_v48 = vsel %vm4209_vm12, %v4166_v45, %v841_v34 }
 0x1b7   : >> { %v829_v13 = vmul.f32 0.5, %v828_v9  ;;  %v796_v22 = vpop.xlane.xlu2 %795  ;;  %v898_v51 = vmul.f32 %v845_v48, %v4096_v54 }
 0x1b8   : >> { %v907_v24 = vmul.f32 %v4185_v10, %v896_v16  ;;  %v806_v30 = vmul.f32 %v796_v22, %v4088_v47 }
 0x1b9   : >> { %v830_v23 = vsub.f32 1.5, %v829_v13  ;;  %v909_v56 = vmul.f32 %v4185_v10, %v898_v51  ;;  %v3485_v51 = vld [vmem:[%s688_s20] ss:$0 sm:$0xff]  ;;  %s3829_s20 = smov 120  }
 0x1ba   : >> { %v3500_v25 = vpop.eup %3499  ;;  %v918_v31 = vadd.f32 %v4195_v17, %v907_v24  ;;  %v814_v41 = vadd.f32 1e-06, %v806_v30 }
 0x1bb   : >> { %v3502_v53 = vpop.eup %3501  ;;  %v831_v28 = vmul.f32 %v3498_v62, %v830_v23  ;;  %v847_v29 = vmul.f32 %v3500_v25, %v811_v0  ;;  %vm853_vm14 = vweird.f32 %v3500_v25  ;;  %v920_v60 = vadd.f32 %v4195_v17, %v909_v56 }
 0x1bc   : >> { %v857_v35 = vmul.f32 %v3502_v53, %v4177_v1  ;;  %3134 = vmatmul.msk.f32.vlgmr.msra.gmra.mxu0 %vm720_vm2, %v918_v31  ;;  %v3504_v42 = vpop.eup %3503  ;;  %3505 = vrsqrt.f32 %v814_v41  ;;  %vm854_vm15 = vmor %vm852_vm13, %vm853_vm14  ;;  %vm863_vm1 = vweird.f32 %v3502_v53  ;;  %vm882_vm7 = vweird.f32 %v814_v41 }
 0x1bd   : >> { %v848_v37 = vmul.f32 %v3500_v25, %v847_v29  ;;  %v835_v38 = vsel %vm834_vm11, %v3498_v62, %v831_v28  ;;  %vm864_vm3 = vmor %vm862_vm0, %vm863_vm1  ;;  %vm873_vm5 = vweird.f32 %v3504_v42  ;;  %vm1018_vm13 = vcmask 64512  }
 0x1be   : >> { %v897_v39 = vmul.f32 %v835_v38, %v4109_v2  ;;  %v858_v43 = vmul.f32 %v3502_v53, %v857_v35  ;;  %v867_v2 = vmul.f32 %v3504_v42, %v4187_v11  ;;  %vm874_vm6 = vmor %vm872_vm4, %vm873_vm5  ;;  %vm1092_vm14 = vcmask 523264  }
 0x1bf   : >> { %v849_v40 = vmul.f32 0.5, %v848_v37  ;;  %vm1915_vm0 = vcmask 195712   ;;  %vm2238_vm1 = vcmask 261312  }
 0x1c0   : >> { %v908_v46 = vmul.f32 %v4185_v10, %v897_v39  ;;  %v859_v55 = vmul.f32 0.5, %v858_v43  ;;  %v868_v57 = vmul.f32 %v3504_v42, %v867_v2 }
 0x1c1   : >> { %v850_v49 = vsub.f32 1.5, %v849_v40 }
 0x1c2   : >> { %v919_v50 = vadd.f32 %v4195_v17, %v908_v46  ;;  %v860_v58 = vsub.f32 1.5, %v859_v55  ;;  %v3506_v59 = vpop.eup %3505  ;;  %v869_v61 = vmul.f32 0.5, %v868_v57 }
 0x1c3   : >> { %v851_v52 = vmul.f32 %v3500_v25, %v850_v49  ;;  %v877_v63 = vmul.f32 %v3506_v59, %v814_v41  ;;  %vm883_vm8 = vweird.f32 %v3506_v59 }
 0x1c4   : >> { %3135 = vmatmul.msk.f32.gmra.mxu0 %vm720_vm2, %v919_v50  ;;  %v861_v62 = vmul.f32 %v3502_v53, %v860_v58  ;;  %v870_v6 = vsub.f32 1.5, %v869_v61  ;;  %vm884_vm9 = vmor %vm882_vm7, %vm883_vm8 }
 0x1c5   : >> { %v855_v45 = vsel %vm854_vm15, %v3500_v25, %v851_v52  ;;  %v878_v7 = vmul.f32 %v3506_v59, %v877_v63  ;;  %vm1592_vm15 = vcmask 130112  }
 0x1c6   : >> { %v899_v54 = vmul.f32 %v855_v45, %v4118_v5  ;;  %v865_v8 = vsel %vm864_vm3, %v3502_v53, %v861_v62  ;;  %v871_v12 = vmul.f32 %v3504_v42, %v870_v6 }
 0x1c7   : >> { %v900_v9 = vmul.f32 %v865_v8, %v4115_v4  ;;  %v879_v5 = vmul.f32 0.5, %v878_v7 }
 0x1c8   : >> { %v910_v0 = vmul.f32 %v4185_v10, %v899_v54  ;;  %v875_v19 = vsel %vm874_vm6, %v3504_v42, %v871_v12 }
 0x1c9   : >> { %v911_v13 = vmul.f32 %v4185_v10, %v900_v9  ;;  %v880_v16 = vsub.f32 1.5, %v879_v5  ;;  %v901_v11 = vmul.f32 %v875_v19, %v4112_v3 }
 0x1ca   : >> { %v921_v1 = vadd.f32 %v4195_v17, %v910_v0 }
 0x1cb   : >> { %v922_v22 = vadd.f32 %v4195_v17, %v911_v13  ;;  %v881_v23 = vmul.f32 %v3506_v59, %v880_v16  ;;  %v912_v4 = vmul.f32 %v4185_v10, %v901_v11 }
 0x1cc   : >> { %3136 = vmatmul.msk.f32.gmra.mxu0 %vm720_vm2, %v920_v60 }
 0x1cd   : >> { %v885_v24 = vsel %vm884_vm9, %v3506_v59, %v881_v23  ;;  %v923_v25 = vadd.f32 %v4195_v17, %v912_v4 }
 0x1ce   : >> { %v902_v53 = vmul.f32 %v885_v24, %v4143_v18 }
 0x1d0   : >> { %v913_v28 = vmul.f32 %v4185_v10, %v902_v53 }
 0x1d2   : >> { %v924_v29 = vadd.f32 %v4195_v17, %v913_v28 }
 0x1d4   : >> { %3137 = vmatmul.msk.f32.gmra.mxu0 %vm720_vm2, %v921_v1 }
 0x1dc   : >> { %3138 = vmatmul.msk.f32.gmra.mxu0 %vm720_vm2, %v922_v22 }
 0x1e4   : >> { %3139 = vmatmul.msk.f32.gmra.mxu0 %vm720_vm2, %v923_v25 }
 0x1ec   : >> { %3140 = vmatmul.msk.f32.gmra.mxu0 %vm720_vm2, %v924_v29 }
 0x222   : >> { %v799_v3 = vpop.xlane.xlu0 %798 }
 0x223   : >> { %v807_v30 = vmul.f32 %v799_v3, %v4088_v47 }
 0x225   : >> { %v815_v31 = vadd.f32 1e-06, %v807_v30 }
 0x227   : >> { %3507 = vrsqrt.f32 %v815_v31  ;;  %vm892_vm11 = vweird.f32 %v815_v31 }
 0x22d   : >> { %v3508_v34 = vpop.eup %3507 }
 0x22e   : >> { %v887_v35 = vmul.f32 %v3508_v34, %v815_v31  ;;  %vm893_vm10 = vweird.f32 %v3508_v34 }
 0x22f   : >> { %vm894_vm12 = vmor %vm892_vm11, %vm893_vm10 }
 0x230   : >> { %v888_v36 = vmul.f32 %v3508_v34, %v887_v35 }
 0x232   : >> { %v889_v37 = vmul.f32 0.5, %v888_v36 }
 0x234   : >> { %v890_v38 = vsub.f32 1.5, %v889_v37 }
 0x236   : >> { %v891_v18 = vmul.f32 %v3508_v34, %v890_v38 }
 0x238   : >> { %v895_v39 = vsel %vm894_vm12, %v3508_v34, %v891_v18 }
 0x239   : >> { %v970_v40 = vpop.f32.mrf.mxu0  ;;  %v903_v41 = vmul.f32 %v895_v39, %v4164_v44 }
 0x23a   : >> { %v4304_v59 = vadd.f32 %v3485_v51, %v970_v40 }
 0x23b   : >> { %v914_v42 = vmul.f32 %v4185_v10, %v903_v41 }
 0x23d   : >> { %v925_v43 = vadd.f32 %v4195_v17, %v914_v42 }
 0x23f   : >> { %3141 = vmatmul.msk.f32.gmra.mxu0 %vm720_vm2, %v925_v43 }
 0x241   : >> { %v973_v46 = vpop.f32.mrf.mxu0 }
 0x242   : >> { %v4272_v56 = vadd.f32 %v3485_v51, %v973_v46 }
 0x244   : >> { %v4350_v61 = vpack.i.bf16 %v4304_v59, %v4272_v56 }
 0x249   : >> { %v976_v48 = vpop.f32.mrf.mxu0 }
 0x24a   : >> { %v4258_v10 = vadd.f32 %v3485_v51, %v976_v48 }
 0x251   : >> { %v979_v49 = vpop.f32.mrf.mxu0 }
 0x252   : >> { %v4294_v58 = vadd.f32 %v3485_v51, %v979_v49 }
 0x254   : >> { %v4298_v45 = vpack.i.bf16 %v4258_v10, %v4294_v58 }
 0x259   : >> { %v982_v50 = vpop.f32.mrf.mxu0 }
 0x25a   : >> { %v4266_v55 = vadd.f32 %v3485_v51, %v982_v50 }
 0x261   : >> { %v985_v2 = vpop.f32.mrf.mxu0 }
 0x262   : >> { %v4254_v52 = vadd.f32 %v3485_v51, %v985_v2 }
 0x264   : >> { %1012 = vrot.lane.b32.xlu0 %v4254_v52, %s3824_s21  ;;  %v4284_v57 = vpack.i.bf16 %v4266_v55, %v4254_v52 }
 0x269   : >> { %v988_v44 = vpop.f32.mrf.mxu0 }
 0x26a   : >> { %v4260_v17 = vadd.f32 %v3485_v51, %v988_v44 }
 0x26c   : >> { %1014 = vrot.lane.b32.xlu2 %v4260_v17, %s3824_s21  ;;  %1006 = vrot.lane.b32.xlu0 %v4258_v10, %s3824_s21 }
 0x274   : >> { %1306 = vrot.lane.b32.xlu0 %v4260_v17, %s3825_s22  ;;  %1010 = vrot.lane.b32.xlu2 %v4266_v55, %s3824_s21 }
 0x27c   : >> { %1302 = vrot.lane.b32.xlu0 %v4266_v55, %s3825_s22  ;;  %1004 = vrot.lane.b32.xlu2 %v4272_v56, %s3824_s21 }
 0x284   : >> { %1296 = vrot.lane.b32.xlu0 %v4272_v56, %s3825_s22  ;;  %1304 = vrot.lane.b32.xlu2 %v4254_v52, %s3825_s22 }
 0x28c   : >> { %1952 = vrot.lane.b32.xlu0 %v4260_v17, %s3826_s26  ;;  %3404 = vrot.lane.b32.xlu2 %v4284_v57, %s3827_s1 }
 0x294   : >> { %1627 = vrot.lane.b32.xlu0 %v4254_v52, %s3828_s23  ;;  %1298 = vrot.lane.b32.xlu2 %v4258_v10, %s3825_s22 }
 0x29c   : >> { %1625 = vrot.lane.b32.xlu0 %v4266_v55, %s3828_s23  ;;  %3409 = vrot.lane.b32.xlu2 %v4298_v45, %s3827_s1 }
 0x2a4   : >> { %1948 = vrot.lane.b32.xlu0 %v4266_v55, %s3826_s26  ;;  %1294 = vrot.lane.b32.xlu2 %v4304_v59, %s3825_s22 }
 0x2ac   : >> { %1623 = vrot.lane.b32.xlu0 %v4294_v58, %s3828_s23  ;;  %1280 = vrot.lane.b32.xlu2 %v4272_v56, %s3829_s20 }
 0x2b4   : >> { %1946 = vrot.lane.b32.xlu0 %v4294_v58, %s3826_s26  ;;  %1282 = vrot.lane.b32.xlu2 %v4258_v10, %s3829_s20 }
 0x2bc   : >> { %1621 = vrot.lane.b32.xlu0 %v4258_v10, %s3828_s23  ;;  %1284 = vrot.lane.b32.xlu2 %v4294_v58, %s3829_s20  ;;  %v991_v60 = vpop.f32.mrf.mxu0 }
 0x2bd   : >> { %v4322_v54 = vadd.f32 %v3485_v51, %v991_v60 }
 0x2bf   : >> { %1016 = vrot.lane.b32.xlu1 %v4322_v54, %s3824_s21  ;;  %v4390_v7 = vpack.i.bf16 %v4260_v17, %v4322_v54 }
 0x2c4   : >> { %1617 = vrot.lane.b32.xlu0 %v4304_v59, %s3828_s23  ;;  %1286 = vrot.lane.b32.xlu2 %v4266_v55, %s3829_s20 }
 0x2c6   : >> { %v1015_v8 = vpop.permute.xlu2 %1014 }
 0x2c7   : >> { %1008 = vrot.lane.b32.xlu1 %v4294_v58, %s3824_s21 }
 0x2cc   : >> { %1601 = vrot.lane.b32.xlu0 %v4304_v59, %s3830_s5  ;;  %1629 = vrot.lane.b32.xlu2 %v4260_v17, %s3828_s23 }
 0x2ce   : >> { %v1011_v9 = vpop.permute.xlu2 %1010 }
 0x2cf   : >> { %1002 = vrot.lane.b32.xlu1 %v4304_v59, %s3824_s21  ;;  %s3832_s21 = smov 56  }
 0x2d4   : >> { %1603 = vrot.lane.b32.xlu0 %v4272_v56, %s3830_s5  ;;  %1290 = vrot.lane.b32.xlu2 %v4260_v17, %s3829_s20 }
 0x2d6   : >> { %v1013_v62 = vpop.permute.xlu0 %1012  ;;  %v1005_v13 = vpop.permute.xlu2 %1004 }
 0x2d7   : >> { %1300 = vrot.lane.b32.xlu1 %v4294_v58, %s3825_s22 }
 0x2dc   : >> { %1928 = vrot.lane.b32.xlu0 %v4258_v10, %s3831_s25  ;;  %1944 = vrot.lane.b32.xlu2 %v4258_v10, %s3826_s26 }
 0x2de   : >> { %v1007_v63 = vpop.permute.xlu0 %1006  ;;  %v1305_v22 = vpop.permute.xlu2 %1304 }
 0x2df   : >> { %3414 = vrot.lane.b32.xlu1 %v4350_v61, %s3827_s1 }
 0x2e4   : >> { %1609 = vrot.lane.b32.xlu0 %v4266_v55, %s3830_s5  ;;  %1619 = vrot.lane.b32.xlu2 %v4272_v56, %s3828_s23 }
 0x2e6   : >> { %v1307_v0 = vpop.permute.xlu0 %1306  ;;  %v3405_v24 = vpop.permute.xlu2 %3404 }
 0x2e7   : >> { %1278 = vrot.lane.b32.xlu1 %v4304_v59, %s3829_s20 }
 0x2ec   : >> { %1940 = vrot.lane.b32.xlu2 %v4304_v59, %s3826_s26  ;;  %1954 = vrot.lane.b32.xlu0 %v4322_v54, %s3826_s26 }
 0x2ee   : >> { %v4386_v6 = vpop.permute.xlu0 %1302  ;;  %v1299_v28 = vpop.permute.xlu2 %1298 }
 0x2ef   : >> { %1288 = vrot.lane.b32.xlu1 %v4254_v52, %s3829_s20 }
 0x2f4   : >> { %1924 = vrot.lane.b32.xlu2 %v4304_v59, %s3831_s25  ;;  %1292 = vrot.lane.b32.xlu0 %v4322_v54, %s3829_s20  ;;  %s3837_s20 = smov 24  }
 0x2f6   : >> { %v4394_v1 = vpop.permute.xlu0 %1296  ;;  %v3410_v30 = vpop.permute.xlu2 %3409 }
 0x2f7   : >> { %1950 = vrot.lane.b32.xlu1 %v4254_v52, %s3826_s26 }
 0x2fc   : >> { %1926 = vrot.lane.b32.xlu2 %v4272_v56, %s3831_s25 }
 0x2fe   : >> { %v4398_v12 = vpop.permute.xlu0 %1952  ;;  %v1295_v35 = vpop.permute.xlu2 %1294 }
 0x2ff   : >> { %1942 = vrot.lane.b32.xlu1 %v4272_v56, %s3826_s26  ;;  %s3834_s26 = smov 40  }
 0x304   : >> { %1607 = vrot.lane.b32.xlu2 %v4294_v58, %s3830_s5 }
 0x306   : >> { %v4402_v16 = vpop.permute.xlu0 %1627  ;;  %v1281_v18 = vpop.permute.xlu2 %1280 }
 0x307   : >> { %1605 = vrot.lane.b32.xlu1 %v4258_v10, %s3830_s5 }
 0x30c   : >> { %1932 = vrot.lane.b32.xlu2 %v4266_v55, %s3831_s25 }
 0x30e   : >> { %v4406_v23 = vpop.permute.xlu0 %1625  ;;  %v1283_v41 = vpop.permute.xlu2 %1282 }
 0x30f   : >> { %1930 = vrot.lane.b32.xlu1 %v4294_v58, %s3831_s25 }
 0x316   : >> { %v4411_v25 = vpop.permute.xlu0 %1948  ;;  %v1285_v46 = vpop.permute.xlu2 %1284 }
 0x317   : >> { %1308 = vrot.lane.b32.xlu1 %v4322_v54, %s3825_s22  ;;  %s3833_s22 = smov 48  }
 0x31e   : >> { %v4416_v29 = vpop.permute.xlu0 %1623  ;;  %v1287_v50 = vpop.permute.xlu2 %1286 }
 0x31f   : >> { %3419 = vrot.lane.b32.xlu1 %v4390_v7, %s3827_s1  ;;  %s3835_s1 = smov 8  }
 0x326   : >> { %v4420_v31 = vpop.permute.xlu0 %1946 }
 0x327   : >> { %1631 = vrot.lane.b32.xlu1 %v4322_v54, %s3828_s23  ;;  %s3836_s23 = smov 16  }
 0x32e   : >> { %v1622_v37 = vpop.permute.xlu0 %1621 }
 0x331   : >> { %v1017_v5 = vpop.permute.xlu1 %1016 }
 0x332   : >> { %3142 = vmatpush.xpose.msk.msra.mxu1 %vm1018_vm13, %v1017_v5 }
 0x336   : >> { %3143 = vmatpush.xpose.msk.msra.mxu1 %vm1018_vm13, %v1015_v8  ;;  %v1618_v39 = vpop.permute.xlu0 %1617 }
 0x339   : >> { %v1009_v19 = vpop.permute.xlu1 %1008 }
 0x33a   : >> { %3144 = vmatpush.xpose.msk.msra.mxu1 %vm1018_vm13, %v1013_v62  ;;  %v3412_v62 = vunpack.i.h.bf16 %v3410_v30 }
 0x33e   : >> { %3145 = vmatpush.xpose.msk.msra.mxu1 %vm1018_vm13, %v1011_v9  ;;  %v4436_v42 = vpop.permute.xlu0 %1601 }
 0x341   : >> { %v1003_v11 = vpop.permute.xlu1 %1002 }
 0x342   : >> { %3146 = vmatpush.xpose.msk.msra.mxu1 %vm1018_vm13, %v1009_v19 }
 0x346   : >> { %3147 = vmatpush.xpose.msk.msra.mxu1 %vm1018_vm13, %v1007_v63  ;;  %v4442_v48 = vpop.permute.xlu0 %1603 }
 0x349   : >> { %v1301_v4 = vpop.permute.xlu1 %1300 }
 0x34a   : >> { %3148 = vmatpush.xpose.msk.msra.mxu1 %vm1018_vm13, %v1005_v13 }
 0x34e   : >> { %3149 = vmatpush.xpose.msk.msra.mxu1 %vm1018_vm13, %v1003_v11  ;;  %v4448_v2 = vpop.permute.xlu0 %1928 }
 0x351   : >> { %v3415_v53 = vpop.permute.xlu1 %3414  ;;  %3150 = vmatmul.msk.f32.vlgmr.msra.gmra.mxu1 %vm1018_vm13, %v4304_v59  ;;  %v3411_v59 = vunpack.i.l.bf16 %v3410_v30 }
 0x352   : >> { %v3416_v63 = vunpack.i.l.bf16 %v3415_v53 }
 0x356   : >> { %v4454_v60 = vpop.permute.xlu0 %1609 }
 0x359   : >> { %v1279_v3 = vpop.permute.xlu1 %1278  ;;  %3151 = vmatmul.msk.f32.gmra.mxu1 %vm1018_vm13, %v4272_v56  ;;  %v3407_v56 = vunpack.i.h.bf16 %v3405_v24 }
 0x35e   : >> { %v1955_v9 = vpop.permute.xlu0 %1954 }
 0x361   : >> { %v4422_v34 = vpop.permute.xlu1 %1288  ;;  %3152 = vmatmul.msk.f32.gmra.mxu1 %vm1018_vm13, %v4258_v10 }
 0x369   : >> { %v1951_v36 = vpop.permute.xlu1 %1950  ;;  %3153 = vmatmul.msk.f32.gmra.mxu1 %vm1018_vm13, %v4294_v58  ;;  %v1630_v58 = vpop.permute.xlu2 %1629 }
 0x371   : >> { %v4428_v38 = vpop.permute.xlu1 %1942  ;;  %3154 = vmatmul.msk.f32.gmra.mxu1 %vm1018_vm13, %v4266_v55  ;;  %v3406_v55 = vunpack.i.l.bf16 %v3405_v24 }
 0x379   : >> { %v4432_v40 = vpop.permute.xlu1 %1605  ;;  %3155 = vmatmul.msk.f32.gmra.mxu1 %vm1018_vm13, %v4254_v52 }
 0x381   : >> { %v4438_v43 = vpop.permute.xlu1 %1930  ;;  %3156 = vmatmul.msk.f32.gmra.mxu1 %vm1018_vm13, %v4260_v17 }
 0x389   : >> { %v1309_v49 = vpop.permute.xlu1 %1308  ;;  %3157 = vmatmul.msk.f32.gmra.mxu1 %vm1018_vm13, %v4322_v54 }
 0x38a   : >> { %3166 = vmatpush.xpose.msk.msra.mxu3 %vm1018_vm13, %v1309_v49 }
 0x38e   : >> { %3167 = vmatpush.xpose.msk.msra.mxu3 %vm1018_vm13, %v1307_v0  ;;  %v3417_v0 = vunpack.i.h.bf16 %v3415_v53 }
 0x391   : >> { %v3420_v51 = vpop.permute.xlu1 %3419 }
 0x392   : >> { %3168 = vmatpush.xpose.msk.msra.mxu3 %vm1018_vm13, %v1305_v22  ;;  %v3421_v44 = vunpack.i.l.bf16 %v3420_v51  ;;  %v3422_v10 = vunpack.i.h.bf16 %v3420_v51 }
 0x394   : >> { %1237 = vmatpush.msra.mxu2 %v3421_v44 }
 0x396   : >> { %1238 = vmatpush.msra.mxu2 %v3422_v10  ;;  %3169 = vmatpush.xpose.msk.msra.mxu3 %vm1018_vm13, %v4386_v6  ;;  %v1291_v6 = vpop.permute.xlu2 %1290 }
 0x398   : >> { %1239 = vmatpush.msra.mxu2 %v3406_v55 }
 0x399   : >> { %v1632_v8 = vpop.permute.xlu1 %1631 }
 0x39a   : >> { %1240 = vmatpush.msra.mxu2 %v3407_v56  ;;  %3170 = vmatpush.xpose.msk.msra.mxu3 %vm1018_vm13, %v1301_v4  ;;  %v1293_v4 = vpop.permute.xlu0 %1292 }
 0x39c   : >> { %1241 = vmatpush.msra.mxu2 %v3411_v59 }
 0x39e   : >> { %1242 = vmatpush.msra.mxu2 %v3412_v62  ;;  %3171 = vmatpush.xpose.msk.msra.mxu3 %vm1018_vm13, %v1299_v28  ;;  %v1945_v5 = vpop.permute.xlu2 %1944 }
 0x3a0   : >> { %1243 = vmatpush.msra.mxu2 %v3416_v63 }
 0x3a2   : >> { %1244 = vmatpush.msra.mxu2 %v3417_v0  ;;  %3172 = vmatpush.xpose.msk.msra.mxu3 %vm1018_vm13, %v4394_v1 }
 0x3a4   : >> { %3190 = vmatpush.xpose.msk.msrb.mxu2 %vm1018_vm13, %v1632_v8 }
 0x3a6   : >> { %3173 = vmatpush.xpose.msk.msra.mxu3 %vm1018_vm13, %v1295_v35  ;;  %v1620_v1 = vpop.permute.xlu2 %1619 }
 0x3a8   : >> { %3191 = vmatpush.xpose.msk.msrb.mxu2 %vm1018_vm13, %v1630_v58 }
 0x3a9   : >> { %3174 = vmatmul.msk.f32.vlgmr.msra.gmra.mxu3 %vm1018_vm13, %v1279_v3 }
 0x3aa   : >> { %3214 = vmatpush.xpose.msk.msrb.mxu3 %vm1018_vm13, %v1955_v9 }
 0x3ac   : >> { %3192 = vmatpush.xpose.msk.msrb.mxu2 %vm1018_vm13, %v4402_v16 }
 0x3ae   : >> { %3215 = vmatpush.xpose.msk.msrb.mxu3 %vm1018_vm13, %v4398_v12  ;;  %v1941_v12 = vpop.permute.xlu2 %1940 }
 0x3b0   : >> { %3193 = vmatpush.xpose.msk.msrb.mxu2 %vm1018_vm13, %v4406_v23 }
 0x3b1   : >> { %3175 = vmatmul.msk.f32.gmra.mxu3 %vm1018_vm13, %v1281_v18 }
 0x3b2   : >> { %3216 = vmatpush.xpose.msk.msrb.mxu3 %vm1018_vm13, %v1951_v36 }
 0x3b4   : >> { %3194 = vmatpush.xpose.msk.msrb.mxu2 %vm1018_vm13, %v4416_v29 }
 0x3b6   : >> { %3217 = vmatpush.xpose.msk.msrb.mxu3 %vm1018_vm13, %v4411_v25  ;;  %v1925_v24 = vpop.permute.xlu2 %1924 }
 0x3b8   : >> { %3195 = vmatpush.xpose.msk.msrb.mxu2 %vm1018_vm13, %v1622_v37 }
 0x3b9   : >> { %3176 = vmatmul.msk.f32.gmra.mxu3 %vm1018_vm13, %v1283_v41 }
 0x3ba   : >> { %3218 = vmatpush.xpose.msk.msrb.mxu3 %vm1018_vm13, %v4420_v31 }
 0x3bc   : >> { %3196 = vmatpush.xpose.msk.msrb.mxu2 %vm1018_vm13, %v1620_v1 }
 0x3be   : >> { %3219 = vmatpush.xpose.msk.msrb.mxu3 %vm1018_vm13, %v1945_v5  ;;  %v1927_v29 = vpop.permute.xlu2 %1926 }
 0x3c0   : >> { %3197 = vmatpush.xpose.msk.msrb.mxu2 %vm1018_vm13, %v1618_v39 }
 0x3c1   : >> { %3177 = vmatmul.msk.f32.gmra.mxu3 %vm1018_vm13, %v1285_v46 }
 0x3c2   : >> { %3220 = vmatpush.xpose.msk.msrb.mxu3 %vm1018_vm13, %v4428_v38 }
 0x3c6   : >> { %3221 = vmatpush.xpose.msk.msrb.mxu3 %vm1018_vm13, %v1941_v12  ;;  %v4508_v31 = vpop.permute.xlu2 %1607 }
 0x3c9   : >> { %3178 = vmatmul.msk.f32.gmra.mxu3 %vm1018_vm13, %v1287_v50 }
 0x3ce   : >> { %v1068_v13 = vpop.f32.mrf.mxu1  ;;  %v1933_v37 = vpop.permute.xlu2 %1932 }
 0x3cf   : >> { %v1093_v16 = vsel %vm1092_vm14, %v1068_v13, -inf }
 0x3d0   : >> { %1094 = vmax.xlane.f32.xlu0 %v1093_v16 }
 0x3d1   : >> { %3179 = vmatmul.msk.f32.gmra.mxu3 %vm1018_vm13, %v4422_v34 }
 0x3d6   : >> { %v1071_v19 = vpop.f32.mrf.mxu1 }
 0x3d7   : >> { %v1096_v22 = vsel %vm1092_vm14, %v1071_v19, -inf }
 0x3d8   : >> { %1097 = vmax.xlane.f32.xlu2 %v1096_v22 }
 0x3d9   : >> { %3180 = vmatmul.msk.f32.gmra.mxu3 %vm1018_vm13, %v1291_v6 }
 0x3de   : >> { %v1074_v11 = vpop.f32.mrf.mxu1 }
 0x3df   : >> { %v1099_v23 = vsel %vm1092_vm14, %v1074_v11, -inf }
 0x3e0   : >> { %1100 = vmax.xlane.f32.xlu1 %v1099_v23 }
 0x3e1   : >> { %3181 = vmatmul.msk.f32.gmra.mxu3 %vm1018_vm13, %v1293_v4 }
 0x3e4   : >> { %1934 = vrot.lane.b32.xlu0 %v4254_v52, %s3831_s25 }
 0x3e6   : >> { %v1077_v25 = vpop.f32.mrf.mxu1 }
 0x3e7   : >> { %v1102_v38 = vsel %vm1092_vm14, %v1077_v25, -inf }
 0x3e9   : >> { %3222 = vmatmul.msk.f32.vlgmr.msrb.gmra.mxu3 %vm1018_vm13, %v1925_v24 }
 0x3ee   : >> { %v1080_v53 = vpop.f32.mrf.mxu1 }
 0x3ef   : >> { %v1105_v28 = vsel %vm1092_vm14, %v1080_v53, -inf }
 0x3f0   : >> { %1106 = vmax.xlane.f32.xlu2 %v1105_v28 }
 0x3f1   : >> { %3223 = vmatmul.msk.f32.gmra.mxu3 %vm1018_vm13, %v1927_v29 }
 0x3f6   : >> { %v4500_v3 = vpop.f32.mrf.mxu1 }
 0x3f7   : >> { %v1108_v30 = vsel %vm1092_vm14, %v4500_v3, -inf }
 0x3f8   : >> { %1109 = vmax.xlane.f32.xlu2 %v1108_v30 }
 0x3f9   : >> { %1611 = vrot.lane.b32.xlu1 %v4254_v52, %s3830_s5  ;;  %3224 = vmatmul.msk.f32.gmra.mxu3 %vm1018_vm13, %v4448_v2 }
 0x3fe   : >> { %v1086_v34 = vpop.f32.mrf.mxu1 }
 0x3ff   : >> { %v1111_v52 = vsel %vm1092_vm14, %v1086_v34, -inf }
 0x401   : >> { %3225 = vmatmul.msk.f32.gmra.mxu3 %vm1018_vm13, %v4438_v43 }
 0x406   : >> { %v1089_v35 = vpop.f32.mrf.mxu1 }
 0x407   : >> { %v1114_v36 = vsel %vm1092_vm14, %v1089_v35, -inf }
 0x408   : >> { %1115 = vmax.xlane.f32.xlu2 %v1114_v36 }
 0x409   : >> { %3226 = vmatmul.msk.f32.gmra.mxu3 %vm1018_vm13, %v1933_v37 }
 0x40e   : >> { %1103 = vmax.xlane.f32.xlu0 %v1102_v38 }
 0x416   : >> { %1112 = vmax.xlane.f32.xlu0 %v1111_v52 }
 0x420   : >> { %1613 = vrot.lane.b32.xlu2 %v4260_v17, %s3830_s5 }
 0x42c   : >> { %v4554_v37 = vpop.f32.mrf.mxu3 }
 0x434   : >> { %v4560_v38 = vpop.f32.mrf.mxu3 }
 0x443   : >> { %v1095_v18 = vpop.xlane.xlu0 %1094 }
 0x444   : >> { %v1117_v39 = vsub.f32 %v1068_v13, %v1095_v18  ;;  %v4564_v18 = vpop.f32.mrf.mxu3 }
 0x446   : >> { %v1125_v41 = vmul.f32 1.442695, %v1117_v39 }
 0x448   : >> { %3509 = vpow2.f32 %v1125_v41 }
 0x44b   : >> { %v1098_v43 = vpop.xlane.xlu2 %1097 }
 0x44c   : >> { %v1118_v46 = vsub.f32 %v1071_v19, %v1098_v43  ;;  %v4566_v41 = vpop.f32.mrf.mxu3 }
 0x44e   : >> { %v4518_v49 = vpop.eup %3509  ;;  %v1127_v50 = vmul.f32 1.442695, %v1118_v46 }
 0x44f   : >> { %v1141_v51 = vsel %vm1092_vm14, %v4518_v49, 0.0 }
 0x450   : >> { %3511 = vpow2.f32 %v1127_v50  ;;  %1142 = vadd.xlane.f32.xlu1 %v1141_v51 }
 0x453   : >> { %v1101_v2 = vpop.xlane.xlu1 %1100 }
 0x454   : >> { %v1119_v44 = vsub.f32 %v1074_v11, %v1101_v2  ;;  %v1392_v2 = vsel %vm1092_vm14, %v4566_v41, -inf }
 0x456   : >> { %v4522_v10 = vpop.eup %3511  ;;  %v1129_v55 = vmul.f32 1.442695, %v1119_v44  ;;  %v1935_v56 = vpop.permute.xlu0 %1934 }
 0x457   : >> { %3227 = vmatmul.msk.f32.gmra.mxu3 %vm1018_vm13, %v1935_v56  ;;  %v1144_v58 = vsel %vm1092_vm14, %v4522_v10, 0.0  ;;  %v1389_v56 = vsel %vm1092_vm14, %v4564_v18, -inf }
 0x458   : >> { %3513 = vpow2.f32 %v1129_v55  ;;  %1145 = vadd.xlane.f32.xlu0 %v1144_v58 }
 0x45e   : >> { %v4527_v59 = vpop.eup %3513 }
 0x45f   : >> { %v1147_v62 = vsel %vm1092_vm14, %v4527_v59, 0.0 }
 0x460   : >> { %1148 = vadd.xlane.f32.xlu1 %v1147_v62  ;;  %v1386_v62 = vsel %vm1092_vm14, %v4560_v38, -inf }
 0x463   : >> { %v1107_v63 = vpop.xlane.xlu2 %1106 }
 0x464   : >> { %v1121_v12 = vsub.f32 %v1080_v53, %v1107_v63 }
 0x466   : >> { %v1133_v22 = vmul.f32 1.442695, %v1121_v12 }
 0x46b   : >> { %v1110_v0 = vpop.xlane.xlu2 %1109  ;;  %v4562_v52 = vpop.permute.xlu1 %1611 }
 0x46c   : >> { %v1122_v24 = vsub.f32 %v4500_v3, %v1110_v0 }
 0x46e   : >> { %v1135_v53 = vmul.f32 1.442695, %v1122_v24 }
 0x47b   : >> { %v1116_v8 = vpop.xlane.xlu2 %1115 }
 0x47c   : >> { %v1124_v6 = vsub.f32 %v1089_v35, %v1116_v8 }
 0x47e   : >> { %v1139_v9 = vmul.f32 1.442695, %v1124_v6 }
 0x480   : >> { %3515 = vpow2.f32 %v1139_v9 }
 0x481   : >> { %v1104_v5 = vpop.xlane.xlu0 %1103 }
 0x482   : >> { %v1120_v1 = vsub.f32 %v1077_v25, %v1104_v5 }
 0x483   : >> { %v4602_v5 = vpop.permute.xlu2 %1613 }
 0x484   : >> { %v1131_v13 = vmul.f32 1.442695, %v1120_v1 }
 0x486   : >> { %v4531_v16 = vpop.eup %3515  ;;  %3517 = vpow2.f32 %v1131_v13 }
 0x487   : >> { %v1162_v19 = vsel %vm1092_vm14, %v4531_v16, 0.0  ;;  %3519 = vpow2.f32 %v1133_v22 }
 0x488   : >> { %1163 = vadd.xlane.f32.xlu1 %v1162_v19 }
 0x489   : >> { %v1113_v11 = vpop.xlane.xlu0 %1112 }
 0x48a   : >> { %v1123_v23 = vsub.f32 %v1086_v34, %v1113_v11 }
 0x48c   : >> { %v4535_v4 = vpop.eup %3517  ;;  %v1137_v28 = vmul.f32 1.442695, %v1123_v23 }
 0x48d   : >> { %v1150_v25 = vsel %vm1092_vm14, %v4535_v4, 0.0  ;;  %v4540_v29 = vpop.eup %3519 }
 0x48e   : >> { %3521 = vpow2.f32 %v1137_v28  ;;  %1151 = vadd.xlane.f32.xlu0 %v1150_v25  ;;  %v1153_v34 = vsel %vm1092_vm14, %v4540_v29, 0.0 }
 0x48f   : >> { %3523 = vpow2.f32 %v1135_v53 }
 0x494   : >> { %v4542_v30 = vpop.eup %3521 }
 0x495   : >> { %v1159_v35 = vsel %vm1092_vm14, %v4542_v30, 0.0  ;;  %v4548_v3 = vpop.eup %3523 }
 0x496   : >> { %1154 = vadd.xlane.f32.xlu0 %v1153_v34  ;;  %1160 = vadd.xlane.f32.xlu2 %v1159_v35  ;;  %v1156_v36 = vsel %vm1092_vm14, %v4548_v3, 0.0 }
 0x49e   : >> { %1157 = vadd.xlane.f32.xlu0 %v1156_v36 }
 0x4a1   : >> { %1936 = vrot.lane.b32.xlu1 %v4260_v17, %s3831_s25  ;;  %v1383_v17 = vsel %vm1092_vm14, %v4554_v37, -inf }
 0x4ae   : >> { %1938 = vrot.lane.b32.xlu2 %v4322_v54, %s3831_s25 }
 0x4b2   : >> { %1615 = vrot.lane.b32.xlu0 %v4322_v54, %s3830_s5  ;;  %v4572_v54 = vpop.f32.mrf.mxu3  ;;  %s701_s5 = scalar_lea.vmem %s5448_s11, %s4150_s19 }
 0x4b3   : >> { %v1395_v0 = vsel %vm1092_vm14, %v4572_v54, -inf }
 0x4ba   : >> { %v4580_v58 = vpop.f32.mrf.mxu3 }
 0x4c2   : >> { %v4590_v8 = vpop.f32.mrf.mxu3 }
 0x4c3   : >> { %v1143_v39 = vpop.xlane.xlu1 %1142  ;;  %v1401_v6 = vsel %vm1092_vm14, %v4590_v8, -inf }
 0x4c4   : >> { %3525 = vrcp.f32 %v1143_v39 }
 0x4ca   : >> { %v3526_v43 = vpop.eup %3525  ;;  %v4608_v19 = vpop.f32.mrf.mxu3 }
 0x4cb   : >> { %1384 = vmax.xlane.f32.xlu1 %v1383_v17  ;;  %v1146_v46 = vpop.xlane.xlu0 %1145  ;;  %v1173_v50 = vmul.f32 %v3526_v43, %v4518_v49 }
 0x4cc   : >> { %3527 = vrcp.f32 %v1146_v46 }
 0x4cd   : >> { %3158 = vmatmul.msk.f32.vlgmr.msra.gmra.mxu2 %vm1092_vm14, %v1173_v50 }
 0x4d2   : >> { %v3528_v51 = vpop.eup %3527  ;;  %v4616_v34 = vpop.f32.mrf.mxu3 }
 0x4d3   : >> { %1393 = vmax.xlane.f32.xlu1 %v1392_v2  ;;  %v1149_v44 = vpop.xlane.xlu1 %1148  ;;  %v1174_v55 = vmul.f32 %v3528_v51, %v4522_v10  ;;  %v1398_v10 = vsel %vm1092_vm14, %v4580_v58, -inf }
 0x4d4   : >> { %3529 = vrcp.f32 %v1149_v44 }
 0x4d5   : >> { %3159 = vmatmul.msk.f32.gmra.mxu2 %vm1092_vm14, %v1174_v55 }
 0x4d7   : >> { %1390 = vmax.xlane.f32.xlu2 %v1389_v56 }
 0x4da   : >> { %v3530_v49 = vpop.eup %3529 }
 0x4db   : >> { %v1175_v63 = vmul.f32 %v3530_v49, %v4527_v59 }
 0x4dc   : >> { %1387 = vmax.xlane.f32.xlu0 %v1386_v62 }
 0x4dd   : >> { %3160 = vmatmul.msk.f32.gmra.mxu2 %vm1092_vm14, %v1175_v63 }
 0x4df   : >> { %1399 = vmax.xlane.f32.xlu2 %v1398_v10 }
 0x4e4   : >> { %1396 = vmax.xlane.f32.xlu0 %v1395_v0 }
 0x4ec   : >> { %3424 = vrot.lane.b32.xlu1 %v4390_v7, %s3832_s21  ;;  %1402 = vmax.xlane.f32.xlu0 %v1401_v6 }
 0x4f7   : >> { %3429 = vrot.lane.b32.xlu2 %v4284_v57, %s3832_s21 }
 0x4fb   : >> { %v1164_v13 = vpop.xlane.xlu1 %1163 }
 0x4ff   : >> { %3439 = vrot.lane.b32.xlu2 %v4350_v61, %s3832_s21 }
 0x501   : >> { %v1152_v59 = vpop.xlane.xlu0 %1151 }
 0x502   : >> { %3531 = vrcp.f32 %v1152_v59 }
 0x507   : >> { %3444 = vrot.lane.b32.xlu2 %v4390_v7, %s3833_s22 }
 0x508   : >> { %v3532_v9 = vpop.eup %3531 }
 0x509   : >> { %v1155_v1 = vpop.xlane.xlu0 %1154  ;;  %v1176_v12 = vmul.f32 %v3532_v9, %v4535_v4  ;;  %v1161_v11 = vpop.xlane.xlu2 %1160  ;;  %v1404_v4 = vsel %vm1092_vm14, %v4608_v19, -inf }
 0x50a   : >> { %3533 = vrcp.f32 %v1155_v1 }
 0x50b   : >> { %3161 = vmatmul.msk.f32.gmra.mxu2 %vm1092_vm14, %v1176_v12 }
 0x50f   : >> { %3469 = vrot.lane.b32.xlu2 %v4298_v45, %s3834_s26 }
 0x510   : >> { %v3534_v22 = vpop.eup %3533 }
 0x511   : >> { %v1158_v23 = vpop.xlane.xlu0 %1157  ;;  %v1177_v24 = vmul.f32 %v3534_v22, %v4540_v29  ;;  %v1939_v35 = vpop.permute.xlu2 %1938  ;;  %v2029_v29 = vsel %vm1092_vm14, %v4616_v34, -inf }
 0x512   : >> { %3535 = vrcp.f32 %v1158_v23 }
 0x513   : >> { %v1937_v28 = vpop.permute.xlu1 %1936  ;;  %3162 = vmatmul.msk.f32.gmra.mxu2 %vm1092_vm14, %v1177_v24  ;;  %3537 = vrcp.f32 %v1161_v11 }
 0x514   : >> { %3228 = vmatmul.msk.f32.gmra.mxu3 %vm1018_vm13, %v1937_v28  ;;  %3539 = vrcp.f32 %v1164_v13 }
 0x516   : >> { %1405 = vmax.xlane.f32.xlu1 %v1404_v4 }
 0x518   : >> { %v3536_v25 = vpop.eup %3535 }
 0x519   : >> { %v1178_v53 = vmul.f32 %v3536_v25, %v4548_v3  ;;  %v3538_v36 = vpop.eup %3537 }
 0x51a   : >> { %v1179_v39 = vmul.f32 %v3538_v36, %v4542_v30  ;;  %v3540_v43 = vpop.eup %3539 }
 0x51b   : >> { %3163 = vmatmul.msk.f32.gmra.mxu2 %vm1092_vm14, %v1178_v53  ;;  %v1180_v3 = vmul.f32 %v3540_v43, %v4531_v16 }
 0x51c   : >> { %3229 = vmatmul.msk.f32.gmra.mxu3 %vm1018_vm13, %v1939_v35 }
 0x51e   : >> { %2030 = vmax.xlane.f32.xlu1 %v2029_v29 }
 0x523   : >> { %3164 = vmatmul.msk.f32.gmra.mxu2 %vm1092_vm14, %v1179_v39 }
 0x524   : >> { %v1616_v30 = vpop.permute.xlu0 %1615 }
 0x52b   : >> { %3165 = vmatmul.msk.f32.gmra.mxu2 %vm1092_vm14, %v1180_v3 }
 0x533   : >> { %3198 = vmatmul.msk.f32.vlgmr.msrb.gmra.mxu2 %vm1018_vm13, %v4436_v42 }
 0x53b   : >> { %3199 = vmatmul.msk.f32.gmra.mxu2 %vm1018_vm13, %v4442_v48 }
 0x53e   : >> { %v1385_v17 = vpop.xlane.xlu1 %1384 }
 0x53f   : >> { %v1407_v46 = vsub.f32 %v4554_v37, %v1385_v17  ;;  %v4681_v17 = vpop.f32.mrf.mxu3 }
 0x541   : >> { %v1415_v50 = vmul.f32 1.442695, %v1407_v46 }
 0x543   : >> { %3541 = vpow2.f32 %v1415_v50  ;;  %3200 = vmatmul.msk.f32.gmra.mxu2 %vm1018_vm13, %v4432_v40 }
 0x546   : >> { %v1394_v16 = vpop.xlane.xlu1 %1393 }
 0x547   : >> { %v1410_v48 = vsub.f32 %v4566_v41, %v1394_v16 }
 0x549   : >> { %v4633_v51 = vpop.eup %3541  ;;  %v1421_v56 = vmul.f32 1.442695, %v1410_v48 }
 0x54a   : >> { %v1391_v2 = vpop.xlane.xlu2 %1390  ;;  %v1431_v44 = vsel %vm1092_vm14, %v4633_v51, 0.0 }
 0x54b   : >> { %v1409_v42 = vsub.f32 %v4564_v18, %v1391_v2  ;;  %1432 = vadd.xlane.f32.xlu0 %v1431_v44  ;;  %3201 = vmatmul.msk.f32.gmra.mxu2 %vm1018_vm13, %v4508_v31 }
 0x54d   : >> { %v1419_v37 = vmul.f32 1.442695, %v1409_v42 }
 0x54f   : >> { %3543 = vpow2.f32 %v1419_v37  ;;  %v1388_v55 = vpop.xlane.xlu0 %1387 }
 0x550   : >> { %v1246_v40 = vpop.f32.mrf.mxu2  ;;  %3545 = vpow2.f32 %v1421_v56  ;;  %v1408_v39 = vsub.f32 %v4560_v38, %v1388_v55  ;;  %v2032_v38 = vsel %vm1092_vm14, %v4681_v17, -inf }
 0x551   : >> { %1270 = vst.msk [vmem:[#allocation2] sm:$0xff] %vm1018_vm13, %v1246_v40 }
 0x552   : >> { %v1400_v49 = vpop.xlane.xlu2 %1399  ;;  %v1417_v43 = vmul.f32 1.442695, %v1408_v39 }
 0x553   : >> { %3202 = vmatmul.msk.f32.gmra.mxu2 %vm1018_vm13, %v4454_v60  ;;  %v1412_v60 = vsub.f32 %v4580_v58, %v1400_v49 }
 0x555   : >> { %v4644_v62 = vpop.eup %3543  ;;  %v1425_v12 = vmul.f32 1.442695, %v1412_v60 }
 0x556   : >> { %v1437_v18 = vsel %vm1092_vm14, %v4644_v62, 0.0  ;;  %v4650_v6 = vpop.eup %3545 }
 0x557   : >> { %1438 = vadd.xlane.f32.xlu1 %v1437_v18  ;;  %v1397_v31 = vpop.xlane.xlu0 %1396  ;;  %v1440_v9 = vsel %vm1092_vm14, %v4650_v6, 0.0 }
 0x558   : >> { %v1411_v41 = vsub.f32 %v4572_v54, %v1397_v31  ;;  %v1249_v63 = vpop.f32.mrf.mxu2 }
 0x559   : >> { %1271 = vst.msk [vmem:[#allocation2 + $0x8] sm:$0xff] %vm1018_vm13, %v1249_v63 }
 0x55a   : >> { %v1423_v10 = vmul.f32 1.442695, %v1411_v41  ;;  %v3430_v0 = vpop.permute.xlu2 %3429 }
 0x55b   : >> { %3203 = vmatmul.msk.f32.gmra.mxu2 %vm1018_vm13, %v4562_v52  ;;  %v3431_v11 = vunpack.i.l.bf16 %v3430_v0  ;;  %v3432_v24 = vunpack.i.h.bf16 %v3430_v0 }
 0x55c   : >> { %3547 = vpow2.f32 %v1423_v10 }
 0x55d   : >> { %3549 = vpow2.f32 %v1425_v12 }
 0x55e   : >> { %v3425_v59 = vpop.permute.xlu1 %3424 }
 0x55f   : >> { %3434 = vrot.lane.b32.xlu0 %v4298_v45, %s3832_s21  ;;  %1441 = vadd.xlane.f32.xlu1 %v1440_v9  ;;  %v3426_v54 = vunpack.i.l.bf16 %v3425_v59  ;;  %v3427_v13 = vunpack.i.h.bf16 %v3425_v59  ;;  %v1403_v22 = vpop.xlane.xlu0 %1402  ;;  %s690_s21 = scalar_lea.vmem %s5444_s7, %s4150_s19 }
 0x560   : >> { %v1252_v1 = vpop.f32.mrf.mxu2  ;;  %v1413_v23 = vsub.f32 %v4590_v8, %v1403_v22 }
 0x561   : >> { %1272 = vst.msk [vmem:[#allocation2 + $0x10] sm:$0xff] %vm1018_vm13, %v1252_v1  ;;  %1527 = vmatpush.msrb.mxu0 %v3426_v54 }
 0x562   : >> { %v4660_v52 = vpop.permute.xlu2 %3439  ;;  %v4662_v58 = vpop.eup %3547  ;;  %v1427_v4 = vmul.f32 1.442695, %v1413_v23 }
 0x563   : >> { %1528 = vmatpush.msrb.mxu0 %v3427_v13  ;;  %3204 = vmatmul.msk.f32.gmra.mxu2 %vm1018_vm13, %v4602_v5  ;;  %v1443_v28 = vsel %vm1092_vm14, %v4662_v58, 0.0  ;;  %v4669_v53 = vpop.eup %3549 }
 0x564   : >> { %3551 = vpow2.f32 %v1427_v4  ;;  %v1446_v8 = vsel %vm1092_vm14, %v4669_v53, 0.0 }
 0x565   : >> { %1529 = vmatpush.msrb.mxu0 %v3431_v11  ;;  %3553 = vpow2.f32 %v1417_v43 }
 0x567   : >> { %1530 = vmatpush.msrb.mxu0 %v3432_v24  ;;  %1444 = vadd.xlane.f32.xlu1 %v1443_v28 }
 0x56a   : >> { %v3445_v25 = vpop.permute.xlu2 %3444  ;;  %v4674_v29 = vpop.eup %3551 }
 0x56b   : >> { %v3446_v35 = vunpack.i.l.bf16 %v3445_v25  ;;  %3205 = vmatmul.msk.f32.gmra.mxu2 %vm1018_vm13, %v1616_v30  ;;  %v3447_v5 = vunpack.i.h.bf16 %v3445_v25  ;;  %v1449_v36 = vsel %vm1092_vm14, %v4674_v29, 0.0  ;;  %v4679_v3 = vpop.eup %3553  ;;  %v4690_v30 = vpop.f32.mrf.mxu3 }
 0x56c   : >> { %v1434_v46 = vsel %vm1092_vm14, %v4679_v3, 0.0  ;;  %v2035_v2 = vsel %vm1092_vm14, %v4690_v30, -inf }
 0x56d   : >> { %1850 = vmatpush.msrb.mxu1 %v3446_v35  ;;  %v3441_v35 = vunpack.i.l.bf16 %v4660_v52 }
 0x56f   : >> { %1851 = vmatpush.msrb.mxu1 %v3447_v5  ;;  %1447 = vadd.xlane.f32.xlu1 %v1446_v8  ;;  %v3442_v8 = vunpack.i.h.bf16 %v4660_v52 }
 0x573   : >> { %v4697_v44 = vpop.f32.mrf.mxu3 }
 0x577   : >> { %1450 = vadd.xlane.f32.xlu1 %v1449_v36 }
 0x57b   : >> { %v4704_v48 = vpop.f32.mrf.mxu3 }
 0x57c   : >> { %v2041_v55 = vsel %vm1092_vm14, %v4704_v48, -inf }
 0x583   : >> { %v4709_v40 = vpop.f32.mrf.mxu3 }
 0x589   : >> { %1435 = vadd.xlane.f32.xlu0 %v1434_v46  ;;  %v1406_v49 = vpop.xlane.xlu1 %1405 }
 0x58a   : >> { %v1414_v41 = vsub.f32 %v4608_v19, %v1406_v49 }
 0x58c   : >> { %v1429_v0 = vmul.f32 1.442695, %v1414_v41 }
 0x58e   : >> { %v1255_v50 = vpop.f32.mrf.mxu2  ;;  %3555 = vpow2.f32 %v1429_v0 }
 0x58f   : >> { %1273 = vst.msk [vmem:[#allocation2 + $0x18] sm:$0xff] %vm1018_vm13, %v1255_v50 }
 0x590   : >> { %3449 = vrot.lane.b32.xlu1 %v4390_v7, %s3834_s26  ;;  %v2038_v7 = vsel %vm1092_vm14, %v4697_v44, -inf }
 0x591   : >> { %2033 = vmax.xlane.f32.xlu0 %v2032_v38  ;;  %v2031_v13 = vpop.xlane.xlu1 %2030 }
 0x594   : >> { %v4727_v9 = vpop.eup %3555 }
 0x595   : >> { %v1452_v12 = vsel %vm1092_vm14, %v4727_v9, 0.0 }
 0x596   : >> { %v1258_v16 = vpop.f32.mrf.mxu2 }
 0x597   : >> { %1274 = vst.msk [vmem:[#allocation2 + $0x20] sm:$0xff] %vm1018_vm13, %v1258_v16  ;;  %v4714_v18 = vpop.f32.mrf.mxu3  ;;  %v2053_v16 = vsub.f32 %v4616_v34, %v2031_v13 }
 0x598   : >> { %3459 = vrot.lane.b32.xlu1 %v4284_v57, %s3834_s26  ;;  %v2047_v10 = vsel %vm1092_vm14, %v4714_v18, -inf }
 0x599   : >> { %2036 = vmax.xlane.f32.xlu0 %v2035_v2 }
 0x59e   : >> { %v1261_v42 = vpop.f32.mrf.mxu2 }
 0x59f   : >> { %1275 = vst.msk [vmem:[#allocation2 + $0x28] sm:$0xff] %vm1018_vm13, %v1261_v42  ;;  %v2061_v42 = vmul.f32 1.442695, %v2053_v16 }
 0x5a0   : >> { %3464 = vrot.lane.b32.xlu1 %v4298_v45, %s3833_s22  ;;  %v2044_v45 = vsel %vm1092_vm14, %v4709_v40, -inf }
 0x5a1   : >> { %2039 = vmax.xlane.f32.xlu0 %v2038_v7  ;;  %v4760_v7 = vpop.f32.mrf.mxu3 }
 0x5a6   : >> { %v1264_v37 = vpop.f32.mrf.mxu2 }
 0x5a7   : >> { %1276 = vst.msk [vmem:[#allocation2 + $0x30] sm:$0xff] %vm1018_vm13, %v1264_v37  ;;  %v2050_v37 = vsel %vm1092_vm14, %v4760_v7, -inf }
 0x5a9   : >> { %2042 = vmax.xlane.f32.xlu0 %v2041_v55 }
 0x5ae   : >> { %v1267_v56 = vpop.f32.mrf.mxu2 }
 0x5af   : >> { %1277 = vst.msk [vmem:[#allocation2 + $0x38] sm:$0xff] %vm1018_vm13, %v1267_v56 }
 0x5b1   : >> { %2045 = vmax.xlane.f32.xlu0 %v2044_v45 }
 0x5b6   : >> { %v4716_v31 = vpop.f32.mrf.mxu2 }
 0x5b7   : >> { %v1706_v63 = vsel %vm1092_vm14, %v4716_v31, -inf }
 0x5b8   : >> { %1707 = vmax.xlane.f32.xlu2 %v1706_v63 }
 0x5b9   : >> { %2048 = vmax.xlane.f32.xlu0 %v2047_v10 }
 0x5be   : >> { %v4723_v60 = vpop.f32.mrf.mxu2  ;;  %v1433_v1 = vpop.xlane.xlu0 %1432 }
 0x5bf   : >> { %v1709_v59 = vsel %vm1092_vm14, %v4723_v60, -inf  ;;  %3557 = vrcp.f32 %v1433_v1 }
 0x5c0   : >> { %1710 = vmax.xlane.f32.xlu2 %v1709_v59  ;;  %3559 = vpow2.f32 %v2061_v42 }
 0x5c5   : >> { %v3558_v25 = vpop.eup %3557 }
 0x5c6   : >> { %v4729_v54 = vpop.f32.mrf.mxu2  ;;  %v1463_v36 = vmul.f32 %v3558_v25, %v4633_v51  ;;  %v4764_v56 = vpop.eup %3559 }
 0x5c7   : >> { %v1712_v19 = vsel %vm1092_vm14, %v4729_v54, -inf  ;;  %v2077_v34 = vsel %vm1092_vm14, %v4764_v56, 0.0 }
 0x5c8   : >> { %1713 = vmax.xlane.f32.xlu2 %v1712_v19 }
 0x5ca   : >> { %1453 = vadd.xlane.f32.xlu1 %v1452_v12  ;;  %v1439_v24 = vpop.xlane.xlu1 %1438 }
 0x5cd   : >> { %3454 = vrot.lane.b32.xlu0 %v4284_v57, %s3833_s22 }
 0x5ce   : >> { %v4737_v22 = vpop.f32.mrf.mxu2 }
 0x5cf   : >> { %v1715_v11 = vsel %vm1092_vm14, %v4737_v22, -inf }
 0x5d0   : >> { %1716 = vmax.xlane.f32.xlu2 %v1715_v11 }
 0x5d1   : >> { %v3435_v23 = vpop.permute.xlu0 %3434 }
 0x5d2   : >> { %v3436_v28 = vunpack.i.l.bf16 %v3435_v23  ;;  %v3437_v4 = vunpack.i.h.bf16 %v3435_v23  ;;  %v1442_v39 = vpop.xlane.xlu1 %1441 }
 0x5d4   : >> { %1531 = vmatpush.msrb.mxu0 %v3436_v28 }
 0x5d6   : >> { %1532 = vmatpush.msrb.mxu0 %v3437_v4  ;;  %v4742_v5 = vpop.f32.mrf.mxu2 }
 0x5d7   : >> { %v1718_v57 = vsel %vm1092_vm14, %v4742_v5, -inf }
 0x5d8   : >> { %1533 = vmatpush.msrb.mxu0 %v3441_v35  ;;  %1719 = vmax.xlane.f32.xlu2 %v1718_v57 }
 0x5da   : >> { %1534 = vmatpush.msrb.mxu0 %v3442_v8  ;;  %v1445_v50 = vpop.xlane.xlu1 %1444 }
 0x5db   : >> { %3182 = vmatmul.msk.f32.vlgmr.msrb.gmra.mxu0 %vm1092_vm14, %v1463_v36 }
 0x5de   : >> { %v4749_v43 = vpop.f32.mrf.mxu2 }
 0x5df   : >> { %v1721_v46 = vsel %vm1092_vm14, %v4749_v43, -inf }
 0x5e0   : >> { %1722 = vmax.xlane.f32.xlu2 %v1721_v46 }
 0x5e2   : >> { %v1448_v52 = vpop.xlane.xlu1 %1447 }
 0x5e6   : >> { %v4753_v38 = vpop.f32.mrf.mxu2 }
 0x5e7   : >> { %v1724_v1 = vsel %vm1092_vm14, %v4753_v38, -inf }
 0x5ea   : >> { %v1451_v55 = vpop.xlane.xlu1 %1450 }
 0x5ee   : >> { %v4756_v2 = vpop.f32.mrf.mxu2 }
 0x5ef   : >> { %v1727_v51 = vsel %vm1092_vm14, %v4756_v2, -inf }
 0x5f0   : >> { %1728 = vmax.xlane.f32.xlu1 %v1727_v51 }
 0x5f7   : >> { %2051 = vmax.xlane.f32.xlu0 %v2050_v37 }
 0x5fc   : >> { %v1436_v45 = vpop.xlane.xlu0 %1435 }
 0x5fd   : >> { %3561 = vrcp.f32 %v1436_v45 }
 0x5fe   : >> { %3563 = vrcp.f32 %v1439_v24  ;;  %v3470_v24 = vpop.permute.xlu2 %3469 }
 0x5ff   : >> { %2078 = vadd.xlane.f32.xlu0 %v2077_v34  ;;  %v3471_v4 = vunpack.i.l.bf16 %v3470_v24  ;;  %v3472_v8 = vunpack.i.h.bf16 %v3470_v24 }
 0x602   : >> { %v3450_v49 = vpop.permute.xlu1 %3449 }
 0x603   : >> { %v3562_v41 = vpop.eup %3561  ;;  %v3451_v63 = vunpack.i.l.bf16 %v3450_v49  ;;  %v3452_v59 = vunpack.i.h.bf16 %v3450_v49 }
 0x604   : >> { %v2034_v10 = vpop.xlane.xlu0 %2033  ;;  %v1464_v0 = vmul.f32 %v3562_v41, %v4679_v3  ;;  %v3564_v13 = vpop.eup %3563 }
 0x605   : >> { %v2054_v19 = vsub.f32 %v4681_v17, %v2034_v10  ;;  %2173 = vmatpush.msra.mxu0 %v3451_v63  ;;  %v1465_v3 = vmul.f32 %v3564_v13, %v4644_v62 }
 0x606   : >> { %3183 = vmatmul.msk.f32.gmra.mxu0 %vm1092_vm14, %v1464_v0 }
 0x607   : >> { %v2063_v12 = vmul.f32 1.442695, %v2054_v19  ;;  %1725 = vmax.xlane.f32.xlu0 %v1724_v1  ;;  %2174 = vmatpush.msra.mxu0 %v3452_v59 }
 0x609   : >> { %3565 = vpow2.f32 %v2063_v12 }
 0x60a   : >> { %v3460_v11 = vpop.permute.xlu1 %3459  ;;  %3567 = vrcp.f32 %v1442_v39 }
 0x60b   : >> { %v3461_v23 = vunpack.i.l.bf16 %v3460_v11  ;;  %v3462_v28 = vunpack.i.h.bf16 %v3460_v11  ;;  %3569 = vrcp.f32 %v1445_v50 }
 0x60c   : >> { %v2037_v25 = vpop.xlane.xlu0 %2036  ;;  %3571 = vrcp.f32 %v1448_v52 }
 0x60d   : >> { %2175 = vmatpush.msra.mxu0 %v3461_v23  ;;  %3573 = vrcp.f32 %v1451_v55 }
 0x60e   : >> { %3184 = vmatmul.msk.f32.gmra.mxu0 %vm1092_vm14, %v1465_v3 }
 0x60f   : >> { %v4775_v17 = vpop.eup %3565  ;;  %2176 = vmatpush.msra.mxu0 %v3462_v28 }
 0x610   : >> { %v2080_v35 = vsel %vm1092_vm14, %v4775_v17, 0.0  ;;  %v3568_v57 = vpop.eup %3567 }
 0x611   : >> { %2081 = vadd.xlane.f32.xlu1 %v2080_v35  ;;  %2177 = vmatpush.msra.mxu0 %v3471_v4  ;;  %v1466_v62 = vmul.f32 %v3568_v57, %v4650_v6  ;;  %v3570_v36 = vpop.eup %3569 }
 0x612   : >> { %v1467_v46 = vmul.f32 %v3570_v36, %v4662_v58  ;;  %v3572_v16 = vpop.eup %3571  ;;  %v3465_v49 = vpop.permute.xlu1 %3464 }
 0x613   : >> { %2178 = vmatpush.msra.mxu0 %v3472_v8  ;;  %v1468_v50 = vmul.f32 %v3572_v16, %v4669_v53  ;;  %v3574_v6 = vpop.eup %3573  ;;  %v2055_v53 = vsub.f32 %v4690_v30, %v2037_v25  ;;  %v3466_v3 = vunpack.i.l.bf16 %v3465_v49 }
 0x614   : >> { %v2040_v39 = vpop.xlane.xlu0 %2039  ;;  %v1469_v37 = vmul.f32 %v3574_v6, %v4674_v29 }
 0x615   : >> { %v2056_v1 = vsub.f32 %v4697_v44, %v2040_v39  ;;  %v3467_v44 = vunpack.i.h.bf16 %v3465_v49 }
 0x616   : >> { %3185 = vmatmul.msk.f32.gmra.mxu0 %vm1092_vm14, %v1466_v62 }
 0x617   : >> { %v2067_v23 = vmul.f32 1.442695, %v2056_v1 }
 0x61b   : >> { %3474 = vrot.lane.b32.xlu0 %v4350_v61, %s3833_s22 }
 0x61c   : >> { %v2043_v51 = vpop.xlane.xlu0 %2042 }
 0x61d   : >> { %v2057_v57 = vsub.f32 %v4704_v48, %v2043_v51 }
 0x61e   : >> { %3186 = vmatmul.msk.f32.gmra.mxu0 %vm1092_vm14, %v1467_v46 }
 0x61f   : >> { %v2069_v62 = vmul.f32 1.442695, %v2057_v57 }
 0x624   : >> { %v4788_v45 = vpop.xlane.xlu0 %2045 }
 0x626   : >> { %3187 = vmatmul.msk.f32.gmra.mxu0 %vm1092_vm14, %v1468_v50 }
 0x62b   : >> { %v1708_v42 = vpop.xlane.xlu2 %1707 }
 0x62c   : >> { %v1730_v52 = vsub.f32 %v4716_v31, %v1708_v42  ;;  %v4796_v63 = vpop.xlane.xlu0 %2048  ;;  %v2065_v31 = vmul.f32 1.442695, %v2055_v53 }
 0x62e   : >> { %3188 = vmatmul.msk.f32.gmra.mxu0 %vm1092_vm14, %v1469_v37  ;;  %v1738_v58 = vmul.f32 1.442695, %v1730_v52 }
 0x630   : >> { %3575 = vpow2.f32 %v1738_v58 }
 0x633   : >> { %v1711_v34 = vpop.xlane.xlu2 %1710 }
 0x634   : >> { %v1731_v55 = vsub.f32 %v4723_v60, %v1711_v34 }
 0x636   : >> { %v4793_v41 = vpop.eup %3575  ;;  %v1740_v10 = vmul.f32 1.442695, %v1731_v55 }
 0x637   : >> { %v1754_v29 = vsel %vm1092_vm14, %v4793_v41, 0.0 }
 0x638   : >> { %3577 = vpow2.f32 %v1740_v10  ;;  %1755 = vadd.xlane.f32.xlu2 %v1754_v29 }
 0x63b   : >> { %v1714_v0 = vpop.xlane.xlu2 %1713 }
 0x63d   : >> { %v1454_v59 = vpop.xlane.xlu1 %1453 }
 0x63e   : >> { %3579 = vrcp.f32 %v1454_v59  ;;  %v4800_v19 = vpop.eup %3577 }
 0x63f   : >> { %3581 = vpow2.f32 %v2065_v31  ;;  %v3455_v60 = vpop.permute.xlu0 %3454  ;;  %v1757_v30 = vsel %vm1092_vm14, %v4800_v19, 0.0  ;;  %v2058_v31 = vsub.f32 %v4709_v40, %v4788_v45 }
 0x640   : >> { %v3456_v12 = vunpack.i.l.bf16 %v3455_v60  ;;  %1758 = vadd.xlane.f32.xlu1 %v1757_v30  ;;  %v3457_v13 = vunpack.i.h.bf16 %v3455_v60  ;;  %3583 = vpow2.f32 %v2067_v23 }
 0x641   : >> { %v2071_v60 = vmul.f32 1.442695, %v2058_v31 }
 0x642   : >> { %1852 = vmatpush.msrb.mxu1 %v3456_v12 }
 0x643   : >> { %v1717_v24 = vpop.xlane.xlu2 %1716 }
 0x644   : >> { %v3580_v11 = vpop.eup %3579  ;;  %1853 = vmatpush.msrb.mxu1 %v3457_v13  ;;  %v1733_v4 = vsub.f32 %v4737_v22, %v1717_v24 }
 0x645   : >> { %v4805_v28 = vpop.eup %3581  ;;  %v1470_v25 = vmul.f32 %v3580_v11, %v4727_v9 }
 0x646   : >> { %1854 = vmatpush.msrb.mxu1 %v3466_v3  ;;  %v1744_v35 = vmul.f32 1.442695, %v1733_v4  ;;  %v2083_v8 = vsel %vm1092_vm14, %v4805_v28, 0.0  ;;  %v4813_v39 = vpop.eup %3583 }
 0x647   : >> { %3189 = vmatmul.msk.f32.gmra.mxu0 %vm1092_vm14, %v1470_v25  ;;  %v2086_v48 = vsel %vm1092_vm14, %v4813_v39, 0.0 }
 0x648   : >> { %1855 = vmatpush.msrb.mxu1 %v3467_v44  ;;  %3585 = vpow2.f32 %v1744_v35  ;;  %2084 = vadd.xlane.f32.xlu1 %v2083_v8 }
 0x649   : >> { %3587 = vpow2.f32 %v2069_v62 }
 0x64b   : >> { %v1720_v36 = vpop.xlane.xlu2 %1719 }
 0x64c   : >> { %v1734_v9 = vsub.f32 %v4742_v5, %v1720_v36 }
 0x64e   : >> { %v4815_v22 = vpop.eup %3585  ;;  %v1746_v16 = vmul.f32 1.442695, %v1734_v9 }
 0x64f   : >> { %v1763_v46 = vsel %vm1092_vm14, %v4815_v22, 0.0  ;;  %v4824_v50 = vpop.eup %3587 }
 0x650   : >> { %3479 = vrot.lane.b32.xlu2 %v4350_v61, %s3834_s26  ;;  %1764 = vadd.xlane.f32.xlu0 %v1763_v46  ;;  %3589 = vpow2.f32 %v1746_v16  ;;  %v2089_v5 = vsel %vm1092_vm14, %v4824_v50, 0.0 }
 0x651   : >> { %2087 = vadd.xlane.f32.xlu1 %v2086_v48 }
 0x653   : >> { %v1723_v51 = vpop.xlane.xlu2 %1722 }
 0x654   : >> { %v1735_v6 = vsub.f32 %v4749_v43, %v1723_v51  ;;  %v1732_v43 = vsub.f32 %v4729_v54, %v1714_v0  ;;  %v2059_v0 = vsub.f32 %v4714_v18, %v4796_v63 }
 0x656   : >> { %v1748_v42 = vmul.f32 1.442695, %v1735_v6  ;;  %v4829_v37 = vpop.eup %3589  ;;  %v1742_v10 = vmul.f32 1.442695, %v1732_v43  ;;  %v2073_v45 = vmul.f32 1.442695, %v2059_v0 }
 0x657   : >> { %v1766_v61 = vsel %vm1092_vm14, %v4829_v37, 0.0 }
 0x658   : >> { %3591 = vpow2.f32 %v1748_v42  ;;  %v1536_v57 = vpop.f32.mrf.mxu0 }
 0x659   : >> { %2090 = vadd.xlane.f32.xlu1 %v2089_v5 }
 0x65e   : >> { %v4834_v34 = vpop.eup %3591 }
 0x65f   : >> { %v1769_v55 = vsel %vm1092_vm14, %v4834_v34, 0.0 }
 0x661   : >> { %1767 = vadd.xlane.f32.xlu1 %v1766_v61 }
 0x663   : >> { %v1729_v52 = vpop.xlane.xlu1 %1728 }
 0x664   : >> { %v1737_v58 = vsub.f32 %v4756_v2, %v1729_v52 }
 0x666   : >> { %v1752_v49 = vmul.f32 1.442695, %v1737_v58 }
 0x668   : >> { %3593 = vpow2.f32 %v1752_v49 }
 0x669   : >> { %1770 = vadd.xlane.f32.xlu1 %v1769_v55  ;;  %3595 = vpow2.f32 %v1742_v10 }
 0x66a   : >> { %v2052_v53 = vpop.xlane.xlu0 %2051  ;;  %3597 = vpow2.f32 %v2071_v60 }
 0x66b   : >> { %v2060_v12 = vsub.f32 %v4760_v7, %v2052_v53 }
 0x66d   : >> { %v2075_v23 = vmul.f32 1.442695, %v2060_v12 }
 0x66e   : >> { %v4839_v29 = vpop.eup %3593 }
 0x66f   : >> { %v1775_v2 = vsel %vm1092_vm14, %v4839_v29, 0.0  ;;  %v4845_v54 = vpop.eup %3595 }
 0x670   : >> { %1776 = vadd.xlane.f32.xlu0 %v1775_v2  ;;  %v1760_v1 = vsel %vm1092_vm14, %v4845_v54, 0.0  ;;  %v4853_v11 = vpop.eup %3597 }
 0x671   : >> { %v2092_v24 = vsel %vm1092_vm14, %v4853_v11, 0.0 }
 0x672   : >> { %v2079_v59 = vpop.xlane.xlu0 %2078 }
 0x679   : >> { %1761 = vadd.xlane.f32.xlu2 %v1760_v1 }
 0x67a   : >> { %v1726_v30 = vpop.xlane.xlu0 %1725 }
 0x67b   : >> { %v1736_v40 = vsub.f32 %v4753_v38, %v1726_v30 }
 0x67d   : >> { %v1750_v13 = vmul.f32 1.442695, %v1736_v40 }
 0x67f   : >> { %3599 = vpow2.f32 %v1750_v13 }
 0x680   : >> { %3601 = vpow2.f32 %v2073_v45 }
 0x681   : >> { %2093 = vadd.xlane.f32.xlu2 %v2092_v24  ;;  %3603 = vpow2.f32 %v2075_v23 }
 0x683   : >> { %v1539_v0 = vpop.f32.mrf.mxu0 }
 0x684   : >> { %v2082_v8 = vpop.xlane.xlu1 %2081 }
 0x685   : >> { %v4857_v18 = vpop.eup %3599 }
 0x686   : >> { %v4859_v63 = vpop.eup %3601  ;;  %v1772_v38 = vsel %vm1092_vm14, %v4857_v18, 0.0 }
 0x687   : >> { %1773 = vadd.xlane.f32.xlu1 %v1772_v38  ;;  %v2095_v7 = vsel %vm1092_vm14, %v4859_v63, 0.0  ;;  %v4865_v3 = vpop.eup %3603 }
 0x688   : >> { %v2098_v25 = vsel %vm1092_vm14, %v4865_v3, 0.0 }
 0x689   : >> { %2096 = vadd.xlane.f32.xlu2 %v2095_v7 }
 0x68b   : >> { %v1542_v23 = vpop.f32.mrf.mxu0 }
 0x68d   : >> { %v3475_v4 = vpop.permute.xlu0 %3474 }
 0x68e   : >> { %v3476_v44 = vunpack.i.l.bf16 %v3475_v4  ;;  %v3477_v35 = vunpack.i.h.bf16 %v3475_v4 }
 0x68f   : >> { %2099 = vadd.xlane.f32.xlu1 %v2098_v25 }
 0x690   : >> { %1856 = vmatpush.msrb.mxu1 %v3476_v44 }
 0x692   : >> { %1857 = vmatpush.msrb.mxu1 %v3477_v35 }
 0x6a1   : >> { %1568 = vrot.lane.b32.xlu2 %v1536_v57, %s3835_s1 }
 0x6ab   : >> { %v1756_v62 = vpop.xlane.xlu2 %1755 }
 0x6ac   : >> { %3605 = vrcp.f32 %v1756_v62 }
 0x6ad   : >> { %3607 = vrcp.f32 %v2079_v59 }
 0x6b2   : >> { %v3606_v36 = vpop.eup %3605 }
 0x6b3   : >> { %v3480_v9 = vpop.permute.xlu2 %3479  ;;  %v1759_v46 = vpop.xlane.xlu1 %1758  ;;  %v1786_v48 = vmul.f32 %v3606_v36, %v4793_v41 }
 0x6b4   : >> { %v3608_v16 = vpop.eup %3607  ;;  %v3481_v51 = vunpack.i.l.bf16 %v3480_v9  ;;  %3609 = vrcp.f32 %v1759_v46  ;;  %v3482_v6 = vunpack.i.h.bf16 %v3480_v9 }
 0x6b5   : >> { %3206 = vmatmul.msk.f32.vlgmr.msrb.gmra.mxu1 %vm1092_vm14, %v1786_v48  ;;  %3611 = vrcp.f32 %v2082_v8  ;;  %v2109_v5 = vmul.f32 %v3608_v16, %v4764_v56 }
 0x6b6   : >> { %2179 = vmatpush.msra.mxu0 %v3481_v51 }
 0x6b8   : >> { %2180 = vmatpush.msra.mxu0 %v3482_v6 }
 0x6b9   : >> { %3230 = vmatmul.msk.f32.vlgmr.msra.gmra.mxu0 %vm1092_vm14, %v2109_v5 }
 0x6ba   : >> { %v3610_v42 = vpop.eup %3609 }
 0x6bb   : >> { %v2085_v61 = vpop.xlane.xlu1 %2084  ;;  %v1787_v52 = vmul.f32 %v3610_v42, %v4800_v19  ;;  %v3612_v58 = vpop.eup %3611  ;;  %v694_v42 = vld [vmem:[%s690_s21 + $0x18] sm:$0xff] }
 0x6bc   : >> { %3613 = vrcp.f32 %v2085_v61  ;;  %v2110_v41 = vmul.f32 %v3612_v58, %v4775_v17  ;;  %2291 = vmatpush.msra.mxu2 %v694_v42  ;;  %v693_v61 = vld [vmem:[%s690_s21 + $0x10] sm:$0xff] }
 0x6bd   : >> { %3207 = vmatmul.msk.f32.gmra.mxu1 %vm1092_vm14, %v1787_v52 }
 0x6be   : >> { %2292 = vmatpush.msra.mxu2 %v693_v61 }
 0x6c1   : >> { %3231 = vmatmul.msk.f32.gmra.mxu0 %vm1092_vm14, %v2110_v41 }
 0x6c2   : >> { %v3614_v49 = vpop.eup %3613 }
 0x6c3   : >> { %v2111_v56 = vmul.f32 %v3614_v49, %v4805_v28  ;;  %v1765_v59 = vpop.xlane.xlu0 %1764  ;;  %v692_v49 = vld [vmem:[%s690_s21 + $0x8] sm:$0xff] }
 0x6c4   : >> { %v2088_v43 = vpop.xlane.xlu1 %2087  ;;  %2293 = vmatpush.msra.mxu2 %v692_v49 }
 0x6c5   : >> { %3615 = vrcp.f32 %v2088_v43 }
 0x6c9   : >> { %3232 = vmatmul.msk.f32.gmra.mxu0 %vm1092_vm14, %v2111_v56 }
 0x6cb   : >> { %v3616_v55 = vpop.eup %3615 }
 0x6cc   : >> { %v2091_v53 = vpop.xlane.xlu1 %2090  ;;  %v2112_v19 = vmul.f32 %v3616_v55, %v4813_v39 }
 0x6cd   : >> { %3617 = vrcp.f32 %v2091_v53 }
 0x6d1   : >> { %3233 = vmatmul.msk.f32.gmra.mxu0 %vm1092_vm14, %v2112_v19  ;;  %v691_v19 = vld [vmem:[%s690_s21] sm:$0xff]  ;;  %s697_s21 = scalar_lea.vmem %s5446_s9, %s3821_s24 }
 0x6d2   : >> { %2294 = vmatpush.msra.mxu2 %v691_v19 }
 0x6d3   : >> { %v3618_v10 = vpop.eup %3617 }
 0x6d4   : >> { %v2113_v31 = vmul.f32 %v3618_v10, %v4824_v50  ;;  %v1768_v17 = vpop.xlane.xlu1 %1767 }
 0x6d9   : >> { %3234 = vmatmul.msk.f32.gmra.mxu0 %vm1092_vm14, %v2113_v31 }
 0x6dc   : >> { %v1771_v60 = vpop.xlane.xlu1 %1770 }
 0x6ec   : >> { %v1762_v2 = vpop.xlane.xlu2 %1761 }
 0x6ed   : >> { %3619 = vrcp.f32 %v1762_v2 }
 0x6ee   : >> { %3621 = vrcp.f32 %v1765_v59 }
 0x6f3   : >> { %v3620_v28 = vpop.eup %3619 }
 0x6f4   : >> { %v2094_v1 = vpop.xlane.xlu2 %2093  ;;  %v1788_v30 = vmul.f32 %v3620_v28, %v4845_v54  ;;  %v3622_v39 = vpop.eup %3621 }
 0x6f5   : >> { %3623 = vrcp.f32 %v2094_v1  ;;  %v1789_v12 = vmul.f32 %v3622_v39, %v4815_v22 }
 0x6f6   : >> { %3208 = vmatmul.msk.f32.gmra.mxu1 %vm1092_vm14, %v1788_v30  ;;  %3625 = vrcp.f32 %v1768_v17 }
 0x6fa   : >> { %v1774_v40 = vpop.xlane.xlu1 %1773 }
 0x6fb   : >> { %v3624_v45 = vpop.eup %3623 }
 0x6fc   : >> { %v2097_v50 = vpop.xlane.xlu2 %2096  ;;  %v2114_v13 = vmul.f32 %v3624_v45, %v4853_v11  ;;  %v3626_v24 = vpop.eup %3625 }
 0x6fd   : >> { %3627 = vrcp.f32 %v2097_v50  ;;  %v1790_v4 = vmul.f32 %v3626_v24, %v4829_v37  ;;  %v1545_v11 = vpop.f32.mrf.mxu0  ;;  %v1777_v37 = vpop.xlane.xlu0 %1776 }
 0x6fe   : >> { %3209 = vmatmul.msk.f32.gmra.mxu1 %vm1092_vm14, %v1789_v12  ;;  %3235 = vmatmul.msk.f32.gmra.mxu0 %vm1092_vm14, %v2114_v13  ;;  %3629 = vrcp.f32 %v1771_v60 }
 0x702   : >> { %v2100_v54 = vpop.xlane.xlu1 %2099 }
 0x703   : >> { %v3628_v38 = vpop.eup %3627  ;;  %3631 = vrcp.f32 %v2100_v54 }
 0x704   : >> { %v1569_v7 = vpop.permute.xlu2 %1568  ;;  %v2115_v25 = vmul.f32 %v3628_v38, %v4859_v63  ;;  %v3630_v22 = vpop.eup %3629  ;;  %3633 = vrcp.f32 %v1774_v40 }
 0x705   : >> { %1593 = vst.msk [vmem:[#allocation2] sm:$0xff] %vm1592_vm15, %v1569_v7  ;;  %v1791_v35 = vmul.f32 %v3630_v22, %v4834_v34  ;;  %v1548_v8 = vpop.f32.mrf.mxu0  ;;  %3635 = vrcp.f32 %v1777_v37 }
 0x706   : >> { %3210 = vmatmul.msk.f32.gmra.mxu1 %vm1092_vm14, %v1790_v4  ;;  %3236 = vmatmul.msk.f32.gmra.mxu0 %vm1092_vm14, %v2115_v25 }
 0x709   : >> { %v3632_v44 = vpop.eup %3631 }
 0x70a   : >> { %v2116_v57 = vmul.f32 %v3632_v44, %v4865_v3  ;;  %v3634_v63 = vpop.eup %3633 }
 0x70b   : >> { %v1792_v62 = vmul.f32 %v3634_v63, %v4857_v18  ;;  %v3636_v36 = vpop.eup %3635 }
 0x70c   : >> { %v1793_v46 = vmul.f32 %v3636_v36, %v4839_v29 }
 0x70d   : >> { %v1551_v9 = vpop.f32.mrf.mxu0 }
 0x70e   : >> { %3211 = vmatmul.msk.f32.gmra.mxu1 %vm1092_vm14, %v1791_v35  ;;  %3237 = vmatmul.msk.f32.gmra.mxu0 %vm1092_vm14, %v2116_v57 }
 0x715   : >> { %v1554_v34 = vpop.f32.mrf.mxu0 }
 0x716   : >> { %3212 = vmatmul.msk.f32.gmra.mxu1 %vm1092_vm14, %v1792_v62 }
 0x71d   : >> { %v1557_v3 = vpop.f32.mrf.mxu0 }
 0x71e   : >> { %3213 = vmatmul.msk.f32.gmra.mxu1 %vm1092_vm14, %v1793_v46 }
 0x732   : >> { %v1859_v48 = vpop.f32.mrf.mxu1 }
 0x733   : >> { %1891 = vrot.lane.b32.xlu0 %v1859_v48, %s3836_s23 }
 0x736   : >> { %v2182_v16 = vpop.f32.mrf.mxu0 }
 0x737   : >> { %2214 = vrot.lane.b32.xlu1 %v2182_v16, %s3837_s20 }
 0x73a   : >> { %v1862_v18 = vpop.f32.mrf.mxu1 }
 0x73b   : >> { %1893 = vrot.lane.b32.xlu2 %v1862_v18, %s3836_s23  ;;  %1570 = vrot.lane.b32.xlu0 %v1539_v0, %s3835_s1 }
 0x73e   : >> { %v2185_v51 = vpop.f32.mrf.mxu0 }
 0x73f   : >> { %1572 = vrot.lane.b32.xlu1 %v1542_v23, %s3835_s1 }
 0x743   : >> { %2216 = vrot.lane.b32.xlu0 %v2185_v51, %s3837_s20 }
 0x746   : >> { %v2188_v29 = vpop.f32.mrf.mxu0 }
 0x747   : >> { %1574 = vrot.lane.b32.xlu1 %v1545_v11, %s3835_s1 }
 0x74b   : >> { %2218 = vrot.lane.b32.xlu0 %v2188_v29, %s3837_s20 }
 0x74e   : >> { %v2191_v6 = vpop.f32.mrf.mxu0 }
 0x74f   : >> { %1576 = vrot.lane.b32.xlu1 %v1548_v8, %s3835_s1 }
 0x753   : >> { %2220 = vrot.lane.b32.xlu0 %v2191_v6, %s3837_s20 }
 0x756   : >> { %v2194_v5 = vpop.f32.mrf.mxu0 }
 0x757   : >> { %1578 = vrot.lane.b32.xlu1 %v1551_v9, %s3835_s1 }
 0x75b   : >> { %2222 = vrot.lane.b32.xlu0 %v2194_v5, %s3837_s20 }
 0x75f   : >> { %1580 = vrot.lane.b32.xlu1 %v1554_v34, %s3835_s1 }
 0x767   : >> { %1582 = vrot.lane.b32.xlu1 %v1557_v3, %s3835_s1  ;;  %s695_s1 = scalar_lea.vmem %s5445_s8, %s3821_s24 }
 0x768   : >> { %v3486_v9 = vld [vmem:[%s695_s1] ss:$0 sm:$0xff]  ;;  %s699_s1 = scalar_lea.vmem %s5447_s10, %s3821_s24 }
 0x773   : >> { %v1865_v52 = vpop.f32.mrf.mxu1 }
 0x774   : >> { %1895 = vrot.lane.b32.xlu2 %v1865_v52, %s3836_s23 }
 0x77b   : >> { %v1868_v58 = vpop.f32.mrf.mxu1  ;;  %v2197_v41 = vpop.f32.mrf.mxu0 }
 0x77c   : >> { %1897 = vrot.lane.b32.xlu2 %v1868_v58, %s3836_s23  ;;  %2224 = vrot.lane.b32.xlu0 %v2197_v41, %s3837_s20 }
 0x783   : >> { %v1871_v43 = vpop.f32.mrf.mxu1  ;;  %v2200_v56 = vpop.f32.mrf.mxu0 }
 0x784   : >> { %1899 = vrot.lane.b32.xlu2 %v1871_v43, %s3836_s23  ;;  %2226 = vrot.lane.b32.xlu0 %v2200_v56, %s3837_s20 }
 0x78b   : >> { %v1874_v55 = vpop.f32.mrf.mxu1  ;;  %v2203_v53 = vpop.f32.mrf.mxu0 }
 0x78c   : >> { %1901 = vrot.lane.b32.xlu2 %v1874_v55, %s3836_s23  ;;  %2228 = vrot.lane.b32.xlu0 %v2203_v53, %s3837_s20 }
 0x793   : >> { %v1877_v10 = vpop.f32.mrf.mxu1 }
 0x794   : >> { %1903 = vrot.lane.b32.xlu2 %v1877_v10, %s3836_s23 }
 0x795   : >> { %v1894_v60 = vpop.permute.xlu2 %1893 }
 0x79b   : >> { %v1880_v31 = vpop.f32.mrf.mxu1 }
 0x79c   : >> { %1905 = vrot.lane.b32.xlu2 %v1880_v31, %s3836_s23 }
 0x7a5   : >> { %v1892_v17 = vpop.permute.xlu0 %1891 }
 0x7a6   : >> { %1916 = vst.msk [vmem:[#allocation2] sm:$0xff] %vm1915_vm0, %v1892_v17 }
 0x7a9   : >> { %v2215_v2 = vpop.permute.xlu1 %2214 }
 0x7aa   : >> { %2239 = vst.msk [vmem:[#allocation2] sm:$0xff] %vm2238_vm1, %v2215_v2 }
 0x7ad   : >> { %v1571_v59 = vpop.permute.xlu0 %1570 }
 0x7ae   : >> { %1594 = vst.msk [vmem:[#allocation2 + $0x8] sm:$0xff] %vm1592_vm15, %v1571_v59 }
 0x7af   : >> { %1917 = vst.msk [vmem:[#allocation2 + $0x8] sm:$0xff] %vm1915_vm0, %v1894_v60 }
 0x7b1   : >> { %v1573_v28 = vpop.permute.xlu1 %1572  ;;  %v2247_v0 = vld [vmem:[#allocation2] sm:$0xff] }
 0x7b2   : >> { %1595 = vst.msk [vmem:[#allocation2 + $0x10] sm:$0xff] %vm1592_vm15, %v1573_v28  ;;  %3238 = vmatmul.msk.f32.vlgmr.msra.gmra.mxu2 %vm720_vm2, %v2247_v0 }
 0x7b5   : >> { %v2217_v1 = vpop.permute.xlu0 %2216 }
 0x7b6   : >> { %2240 = vst.msk [vmem:[#allocation2 + $0x8] sm:$0xff] %vm2238_vm1, %v2217_v1 }
 0x7b9   : >> { %v1575_v30 = vpop.permute.xlu1 %1574 }
 0x7ba   : >> { %1596 = vst.msk [vmem:[#allocation2 + $0x18] sm:$0xff] %vm1592_vm15, %v1575_v30 }
 0x7bd   : >> { %v2248_v39 = vld [vmem:[#allocation2 + $0x8] sm:$0xff]  ;;  %v2219_v50 = vpop.permute.xlu0 %2218 }
 0x7be   : >> { %3239 = vmatmul.msk.f32.gmra.mxu2 %vm720_vm2, %v2248_v39 }
 0x7c1   : >> { %v1577_v40 = vpop.permute.xlu1 %1576 }
 0x7c2   : >> { %1597 = vst.msk [vmem:[#allocation2 + $0x20] sm:$0xff] %vm1592_vm15, %v1577_v40 }
 0x7c5   : >> { %v2221_v23 = vpop.permute.xlu0 %2220 }
 0x7c9   : >> { %v1579_v45 = vpop.permute.xlu1 %1578 }
 0x7ca   : >> { %1598 = vst.msk [vmem:[#allocation2 + $0x28] sm:$0xff] %vm1592_vm15, %v1579_v45 }
 0x7cd   : >> { %v2223_v4 = vpop.permute.xlu0 %2222 }
 0x7ce   : >> { %v1896_v12 = vpop.permute.xlu2 %1895 }
 0x7cf   : >> { %1918 = vst.msk [vmem:[#allocation2 + $0x10] sm:$0xff] %vm1915_vm0, %v1896_v12 }
 0x7d0   : >> { %2241 = vst.msk [vmem:[#allocation2 + $0x10] sm:$0xff] %vm2238_vm1, %v2219_v50 }
 0x7d1   : >> { %v1581_v13 = vpop.permute.xlu1 %1580 }
 0x7d2   : >> { %1599 = vst.msk [vmem:[#allocation2 + $0x30] sm:$0xff] %vm1592_vm15, %v1581_v13 }
 0x7d6   : >> { %v1898_v24 = vpop.permute.xlu2 %1897 }
 0x7d7   : >> { %1919 = vst.msk [vmem:[#allocation2 + $0x18] sm:$0xff] %vm1915_vm0, %v1898_v24  ;;  %v2249_v54 = vld [vmem:[#allocation2 + $0x10] sm:$0xff] }
 0x7d8   : >> { %2242 = vst.msk [vmem:[#allocation2 + $0x18] sm:$0xff] %vm2238_vm1, %v2221_v23  ;;  %3240 = vmatmul.msk.f32.gmra.mxu2 %vm720_vm2, %v2249_v54 }
 0x7d9   : >> { %v1583_v38 = vpop.permute.xlu1 %1582 }
 0x7da   : >> { %1600 = vst.msk [vmem:[#allocation2 + $0x38] sm:$0xff] %vm1592_vm15, %v1583_v38 }
 0x7de   : >> { %v1900_v7 = vpop.permute.xlu2 %1899 }
 0x7df   : >> { %1920 = vst.msk [vmem:[#allocation2 + $0x20] sm:$0xff] %vm1915_vm0, %v1900_v7  ;;  %v2250_v25 = vld [vmem:[#allocation2 + $0x18] sm:$0xff] }
 0x7e0   : >> { %2243 = vst.msk [vmem:[#allocation2 + $0x20] sm:$0xff] %vm2238_vm1, %v2223_v4  ;;  %3241 = vmatmul.msk.f32.gmra.mxu2 %vm720_vm2, %v2250_v25 }
 0x7e6   : >> { %v1902_v22 = vpop.permute.xlu2 %1901 }
 0x7e7   : >> { %1921 = vst.msk [vmem:[#allocation2 + $0x28] sm:$0xff] %vm1915_vm0, %v1902_v22  ;;  %v2251_v11 = vld [vmem:[#allocation2 + $0x20] sm:$0xff] }
 0x7e8   : >> { %3242 = vmatmul.msk.f32.gmra.mxu2 %vm720_vm2, %v2251_v11 }
 0x7ee   : >> { %v1904_v44 = vpop.permute.xlu2 %1903  ;;  %v2225_v35 = vpop.permute.xlu0 %2224 }
 0x7ef   : >> { %1922 = vst.msk [vmem:[#allocation2 + $0x30] sm:$0xff] %vm1915_vm0, %v1904_v44 }
 0x7f0   : >> { %2244 = vst.msk [vmem:[#allocation2 + $0x28] sm:$0xff] %vm2238_vm1, %v2225_v35 }
 0x7f6   : >> { %v1906_v57 = vpop.permute.xlu2 %1905  ;;  %v2227_v37 = vpop.permute.xlu0 %2226 }
 0x7f7   : >> { %1923 = vst.msk [vmem:[#allocation2 + $0x38] sm:$0xff] %vm1915_vm0, %v1906_v57  ;;  %v2252_v63 = vld [vmem:[#allocation2 + $0x28] sm:$0xff] }
 0x7f8   : >> { %2245 = vst.msk [vmem:[#allocation2 + $0x30] sm:$0xff] %vm2238_vm1, %v2227_v37  ;;  %3243 = vmatmul.msk.f32.gmra.mxu2 %vm720_vm2, %v2252_v63 }
 0x7fe   : >> { %v2229_v8 = vpop.permute.xlu0 %2228 }
 0x7ff   : >> { %2246 = vst.msk [vmem:[#allocation2 + $0x38] sm:$0xff] %vm2238_vm1, %v2229_v8  ;;  %v2253_v62 = vld [vmem:[#allocation2 + $0x30] sm:$0xff] }
 0x800   : >> { %3244 = vmatmul.msk.f32.gmra.mxu2 %vm720_vm2, %v2253_v62 }
 0x806   : >> { %v2254_v36 = vld [vmem:[#allocation2 + $0x38] sm:$0xff] }
 0x808   : >> { %3245 = vmatmul.msk.f32.gmra.mxu2 %vm720_vm2, %v2254_v36 }
 0x835   : >> { %v2296_v46 = vpop.f32.mrf.mxu2 }
 0x836   : >> { %v2320_v34 = vadd.f32 %v3817_v14, %v2296_v46 }
 0x838   : >> { %v4971_v3 = vadd.f32 %v3486_v9, %v2320_v34 }
 0x83a   : >> { %v2339_v48 = vsel %vm720_vm2, %v4971_v3, 0.0 }
 0x83b   : >> { %2340 = vadd.xlane.f32.xlu1 %v2339_v48 }
 0x841   : >> { %v2299_v16 = vpop.f32.mrf.mxu2 }
 0x842   : >> { %v2321_v18 = vadd.f32 %v3813_v26, %v2299_v16 }
 0x844   : >> { %v4976_v51 = vadd.f32 %v3486_v9, %v2321_v18  ;;  %v705_v18 = vld [vmem:[%s701_s5 + $0x18] sm:$0xff] }
 0x845   : >> { %2576 = vmatpush.msrb.mxu0 %v705_v18  ;;  %3273 = vmatpush.msra.mxu1 %v705_v18 }
 0x846   : >> { %v2342_v29 = vsel %vm720_vm2, %v4976_v51, 0.0 }
 0x847   : >> { %2343 = vadd.xlane.f32.xlu2 %v2342_v29  ;;  %v704_v29 = vld [vmem:[%s701_s5 + $0x10] sm:$0xff] }
 0x848   : >> { %2577 = vmatpush.msrb.mxu0 %v704_v29  ;;  %3274 = vmatpush.msra.mxu1 %v704_v29 }
 0x85b   : >> { %v2302_v6 = vpop.f32.mrf.mxu2 }
 0x85c   : >> { %v2322_v5 = vadd.f32 %v3809_v15, %v2302_v6  ;;  %v703_v6 = vld [vmem:[%s701_s5 + $0x8] sm:$0xff] }
 0x85d   : >> { %2578 = vmatpush.msrb.mxu0 %v703_v6  ;;  %3275 = vmatpush.msra.mxu1 %v703_v6 }
 0x85e   : >> { %v4981_v42 = vadd.f32 %v3486_v9, %v2322_v5  ;;  %v702_v5 = vld [vmem:[%s701_s5] sm:$0xff]  ;;  %s706_s5 = scalar_lea.vmem %s5449_s12, %s3821_s24 }
 0x85f   : >> { %2579 = vmatpush.msrb.mxu0 %v702_v5  ;;  %3276 = vmatpush.msra.mxu1 %v702_v5 }
 0x860   : >> { %v2345_v14 = vsel %vm720_vm2, %v4981_v42, 0.0 }
 0x861   : >> { %2346 = vadd.xlane.f32.xlu0 %v2345_v14 }
 0x863   : >> { %v2305_v61 = vpop.f32.mrf.mxu2 }
 0x864   : >> { %v2323_v52 = vadd.f32 %v3805_v27, %v2305_v61 }
 0x866   : >> { %v4986_v26 = vadd.f32 %v3486_v9, %v2323_v52 }
 0x868   : >> { %v2348_v58 = vsel %vm720_vm2, %v4986_v26, 0.0 }
 0x869   : >> { %2349 = vadd.xlane.f32.xlu1 %v2348_v58 }
 0x86b   : >> { %v2308_v41 = vpop.f32.mrf.mxu2 }
 0x86c   : >> { %v2324_v15 = vadd.f32 %v3801_v20, %v2308_v41 }
 0x86e   : >> { %v4991_v49 = vadd.f32 %v3486_v9, %v2324_v15 }
 0x870   : >> { %v2351_v43 = vsel %vm720_vm2, %v4991_v49, 0.0 }
 0x871   : >> { %2352 = vadd.xlane.f32.xlu2 %v2351_v43 }
 0x87b   : >> { %v2311_v56 = vpop.f32.mrf.mxu2 }
 0x87c   : >> { %v2325_v27 = vadd.f32 %v3797_v32, %v2311_v56 }
 0x87e   : >> { %v4996_v55 = vadd.f32 %v3486_v9, %v2325_v27 }
 0x880   : >> { %v2354_v53 = vsel %vm720_vm2, %v4996_v55, 0.0 }
 0x881   : >> { %2355 = vadd.xlane.f32.xlu0 %v2354_v53 }
 0x883   : >> { %v2314_v19 = vpop.f32.mrf.mxu2 }
 0x884   : >> { %v2326_v10 = vadd.f32 %v3793_v21, %v2314_v19 }
 0x886   : >> { %v5009_v20 = vadd.f32 %v3486_v9, %v2326_v10 }
 0x888   : >> { %v2357_v32 = vsel %vm720_vm2, %v5009_v20, 0.0 }
 0x889   : >> { %2358 = vadd.xlane.f32.xlu2 %v2357_v32 }
 0x88b   : >> { %v2317_v21 = vpop.f32.mrf.mxu2 }
 0x88c   : >> { %v2327_v60 = vadd.f32 %v3789_v33, %v2317_v21 }
 0x88e   : >> { %v5021_v0 = vadd.f32 %v3486_v9, %v2327_v60  ;;  %v5085_v60 = vld [vmem:[%s697_s21] ss:$0 sm:$0xff]  ;;  %s3133_s21 = sshll.u32 %s3821_s24, 6 }
 0x88f   : >> { %s709_s25 = scalar_lea.vmem %s5450_s13, %s3133_s21 }
 0x890   : >> { %v2360_v40 = vsel %vm720_vm2, %v5021_v0, 0.0 }
 0x8ae   : >> { %v2341_v31 = vpop.xlane.xlu1 %2340 }
 0x8af   : >> { %v2363_v17 = vmul.f32 %v2341_v31, %v4088_v47 }
 0x8b1   : >> { %v5015_v2 = vsub.f32 %v4971_v3, %v2363_v17 }
 0x8b3   : >> { %v2379_v59 = vmul.f32 %v5015_v2, %v5015_v2 }
 0x8b5   : >> { %v2387_v28 = vsel %vm720_vm2, %v2379_v59, 0.0 }
 0x8b6   : >> { %2388 = vadd.xlane.f32.xlu1 %v2387_v28 }
 0x8ba   : >> { %v2344_v1 = vpop.xlane.xlu2 %2343 }
 0x8bb   : >> { %v2364_v30 = vmul.f32 %v2344_v1, %v4088_v47 }
 0x8bd   : >> { %v5025_v39 = vsub.f32 %v4976_v51, %v2364_v30  ;;  %v5092_v30 = vld [vmem:[%s699_s1] ss:$0 sm:$0xff] }
 0x8be   : >> { %2361 = vadd.xlane.f32.xlu1 %v2360_v40 }
 0x8bf   : >> { %v2380_v45 = vmul.f32 %v5025_v39, %v5025_v39 }
 0x8c1   : >> { %v2390_v33 = vsel %vm720_vm2, %v2380_v45, 0.0 }
 0x8c2   : >> { %2391 = vadd.xlane.f32.xlu0 %v2390_v33 }
 0x8d4   : >> { %v2347_v50 = vpop.xlane.xlu0 %2346 }
 0x8d5   : >> { %v2365_v12 = vmul.f32 %v2347_v50, %v4088_v47 }
 0x8d7   : >> { %v5034_v13 = vsub.f32 %v4981_v42, %v2365_v12 }
 0x8d9   : >> { %v2381_v23 = vmul.f32 %v5034_v13, %v5034_v13 }
 0x8db   : >> { %v2393_v24 = vsel %vm720_vm2, %v2381_v23, 0.0 }
 0x8dc   : >> { %v2350_v54 = vpop.xlane.xlu1 %2349  ;;  %2394 = vadd.xlane.f32.xlu2 %v2393_v24 }
 0x8dd   : >> { %v2366_v38 = vmul.f32 %v2350_v54, %v4088_v47 }
 0x8df   : >> { %v5041_v7 = vsub.f32 %v4986_v26, %v2366_v38 }
 0x8e1   : >> { %v2382_v4 = vmul.f32 %v5041_v7, %v5041_v7 }
 0x8e3   : >> { %v2396_v25 = vsel %vm720_vm2, %v2382_v4, 0.0 }
 0x8e4   : >> { %v2353_v22 = vpop.xlane.xlu2 %2352  ;;  %2397 = vadd.xlane.f32.xlu0 %v2396_v25 }
 0x8e5   : >> { %v2367_v11 = vmul.f32 %v2353_v22, %v4088_v47 }
 0x8e7   : >> { %v5048_v44 = vsub.f32 %v4991_v49, %v2367_v11 }
 0x8e9   : >> { %v2383_v35 = vmul.f32 %v5048_v44, %v5048_v44 }
 0x8eb   : >> { %v2399_v57 = vsel %vm720_vm2, %v2383_v35, 0.0 }
 0x8ec   : >> { %2400 = vadd.xlane.f32.xlu1 %v2399_v57 }
 0x8f4   : >> { %v2356_v37 = vpop.xlane.xlu0 %2355 }
 0x8f5   : >> { %v2368_v63 = vmul.f32 %v2356_v37, %v4088_v47 }
 0x8f7   : >> { %v5055_v8 = vsub.f32 %v4996_v55, %v2368_v63 }
 0x8f9   : >> { %v2384_v62 = vmul.f32 %v5055_v8, %v5055_v8 }
 0x8fb   : >> { %v2402_v36 = vsel %vm720_vm2, %v2384_v62, 0.0 }
 0x8fc   : >> { %v2359_v9 = vpop.xlane.xlu2 %2358  ;;  %2403 = vadd.xlane.f32.xlu2 %v2402_v36 }
 0x8fd   : >> { %v2369_v46 = vmul.f32 %v2359_v9, %v4088_v47 }
 0x8ff   : >> { %v5062_v34 = vsub.f32 %v5009_v20, %v2369_v46 }
 0x901   : >> { %v2385_v48 = vmul.f32 %v5062_v34, %v5062_v34 }
 0x903   : >> { %v2405_v16 = vsel %vm720_vm2, %v2385_v48, 0.0 }
 0x904   : >> { %2406 = vadd.xlane.f32.xlu0 %v2405_v16 }
 0x929   : >> { %v2389_v14 = vpop.xlane.xlu1 %2388 }
 0x92a   : >> { %v2411_v61 = vmul.f32 %v2389_v14, %v4088_v47 }
 0x92c   : >> { %v2419_v52 = vadd.f32 1e-06, %v2411_v61 }
 0x92e   : >> { %3637 = vrsqrt.f32 %v2419_v52  ;;  %vm2433_vm4 = vweird.f32 %v2419_v52 }
 0x931   : >> { %v2362_v58 = vpop.xlane.xlu1 %2361 }
 0x932   : >> { %v2370_v41 = vmul.f32 %v2362_v58, %v4088_v47 }
 0x934   : >> { %v3638_v15 = vpop.eup %3637  ;;  %v5074_v43 = vsub.f32 %v5021_v0, %v2370_v41 }
 0x935   : >> { %v2428_v56 = vmul.f32 %v3638_v15, %v2419_v52  ;;  %v2392_v27 = vpop.xlane.xlu0 %2391  ;;  %vm2434_vm3 = vweird.f32 %v3638_v15 }
 0x936   : >> { %v2412_v53 = vmul.f32 %v2392_v27, %v4088_v47  ;;  %v2386_v19 = vmul.f32 %v5074_v43, %v5074_v43  ;;  %vm2435_vm5 = vmor %vm2433_vm4, %vm2434_vm3 }
 0x937   : >> { %v2429_v10 = vmul.f32 %v3638_v15, %v2428_v56 }
 0x938   : >> { %v2420_v32 = vadd.f32 1e-06, %v2412_v53  ;;  %v2408_v31 = vsel %vm720_vm2, %v2386_v19, 0.0 }
 0x939   : >> { %v2430_v17 = vmul.f32 0.5, %v2429_v10  ;;  %2409 = vadd.xlane.f32.xlu1 %v2408_v31 }
 0x93a   : >> { %3639 = vrsqrt.f32 %v2420_v32  ;;  %vm2443_vm7 = vweird.f32 %v2420_v32 }
 0x93b   : >> { %v2431_v21 = vsub.f32 1.5, %v2430_v17 }
 0x93d   : >> { %v2432_v59 = vmul.f32 %v3638_v15, %v2431_v21 }
 0x93f   : >> { %v2436_v28 = vsel %vm2435_vm5, %v3638_v15, %v2432_v59 }
 0x940   : >> { %v3640_v1 = vpop.eup %3639  ;;  %v2507_v40 = vmul.f32 %v2436_v28, %v5015_v2 }
 0x941   : >> { %v2438_v45 = vmul.f32 %v3640_v1, %v2420_v32  ;;  %vm2444_vm6 = vweird.f32 %v3640_v1 }
 0x942   : >> { %v2518_v33 = vmul.f32 %v5085_v60, %v2507_v40  ;;  %vm2445_vm8 = vmor %vm2443_vm7, %vm2444_vm6 }
 0x943   : >> { %v2439_v50 = vmul.f32 %v3640_v1, %v2438_v45 }
 0x944   : >> { %v2529_v12 = vadd.f32 %v5092_v30, %v2518_v33 }
 0x945   : >> { %v2440_v23 = vmul.f32 0.5, %v2439_v50 }
 0x946   : >> { %3246 = vmatmul.msk.f32.vlgmr.msrb.gmra.mxu0 %vm720_vm2, %v2529_v12 }
 0x947   : >> { %v2441_v24 = vsub.f32 1.5, %v2440_v23 }
 0x949   : >> { %v2442_v54 = vmul.f32 %v3640_v1, %v2441_v24 }
 0x94b   : >> { %v2446_v38 = vsel %vm2445_vm8, %v3640_v1, %v2442_v54 }
 0x94c   : >> { %v2508_v2 = vmul.f32 %v2446_v38, %v5025_v39 }
 0x94e   : >> { %v2519_v4 = vmul.f32 %v5085_v60, %v2508_v2 }
 0x94f   : >> { %v2395_v25 = vpop.xlane.xlu2 %2394 }
 0x950   : >> { %v2413_v22 = vmul.f32 %v2395_v25, %v4088_v47  ;;  %v2530_v11 = vadd.f32 %v5092_v30, %v2519_v4 }
 0x952   : >> { %v2421_v35 = vadd.f32 1e-06, %v2413_v22  ;;  %3247 = vmatmul.msk.f32.vlgmr.msra.gmra.mxu1 %vm720_vm2, %v2530_v11 }
 0x954   : >> { %3641 = vrsqrt.f32 %v2421_v35  ;;  %vm2453_vm10 = vweird.f32 %v2421_v35 }
 0x957   : >> { %v2398_v57 = vpop.xlane.xlu0 %2397 }
 0x958   : >> { %v2414_v37 = vmul.f32 %v2398_v57, %v4088_v47 }
 0x95a   : >> { %v3642_v63 = vpop.eup %3641  ;;  %v2422_v62 = vadd.f32 1e-06, %v2414_v37 }
 0x95b   : >> { %v2448_v36 = vmul.f32 %v3642_v63, %v2421_v35  ;;  %vm2454_vm9 = vweird.f32 %v3642_v63 }
 0x95c   : >> { %3643 = vrsqrt.f32 %v2422_v62  ;;  %vm2455_vm11 = vmor %vm2453_vm10, %vm2454_vm9  ;;  %vm2463_vm13 = vweird.f32 %v2422_v62 }
 0x95d   : >> { %v2449_v9 = vmul.f32 %v3642_v63, %v2448_v36 }
 0x95f   : >> { %v2450_v39 = vmul.f32 0.5, %v2449_v9  ;;  %v2401_v46 = vpop.xlane.xlu1 %2400 }
 0x960   : >> { %v2415_v48 = vmul.f32 %v2401_v46, %v4088_v47 }
 0x961   : >> { %v2451_v16 = vsub.f32 1.5, %v2450_v39 }
 0x962   : >> { %v3644_v18 = vpop.eup %3643  ;;  %v2423_v29 = vadd.f32 1e-06, %v2415_v48 }
 0x963   : >> { %v2452_v6 = vmul.f32 %v3642_v63, %v2451_v16  ;;  %v2458_v5 = vmul.f32 %v3644_v18, %v2422_v62  ;;  %vm2464_vm12 = vweird.f32 %v3644_v18 }
 0x964   : >> { %3645 = vrsqrt.f32 %v2423_v29  ;;  %vm2465_vm15 = vmor %vm2463_vm13, %vm2464_vm12  ;;  %vm2473_vm1 = vweird.f32 %v2423_v29 }
 0x965   : >> { %v2456_v14 = vsel %vm2455_vm11, %v3642_v63, %v2452_v6  ;;  %v2459_v61 = vmul.f32 %v3644_v18, %v2458_v5  ;;  %v717_v6 = vld [vmem:[%s709_s25 + $0x38] sm:$0xff] }
 0x966   : >> { %v2509_v52 = vmul.f32 %v2456_v14, %v5034_v13  ;;  %2709 = vmatpush.msra.mxu3 %v717_v6  ;;  %v716_v14 = vld [vmem:[%s709_s25 + $0x30] sm:$0xff] }
 0x967   : >> { %v2460_v58 = vmul.f32 0.5, %v2459_v61 }
 0x968   : >> { %v2520_v41 = vmul.f32 %v5085_v60, %v2509_v52  ;;  %2710 = vmatpush.msra.mxu3 %v716_v14  ;;  %v714_v52 = vld [vmem:[%s709_s25 + $0x20] sm:$0xff] }
 0x969   : >> { %v2461_v15 = vsub.f32 1.5, %v2460_v58  ;;  %v713_v58 = vld [vmem:[%s709_s25 + $0x18] sm:$0xff] }
 0x96a   : >> { %v3646_v56 = vpop.eup %3645  ;;  %v2531_v27 = vadd.f32 %v5092_v30, %v2520_v41  ;;  %v712_v41 = vld [vmem:[%s709_s25 + $0x10] sm:$0xff] }
 0x96b   : >> { %v2462_v53 = vmul.f32 %v3644_v18, %v2461_v15  ;;  %v2468_v19 = vmul.f32 %v3646_v56, %v2423_v29  ;;  %vm2474_vm0 = vweird.f32 %v3646_v56 }
 0x96c   : >> { %3248 = vmatmul.msk.f32.gmra.mxu1 %vm720_vm2, %v2531_v27  ;;  %vm2475_vm3 = vmor %vm2473_vm1, %vm2474_vm0  ;;  %v711_v27 = vld [vmem:[%s709_s25 + $0x8] sm:$0xff] }
 0x96d   : >> { %v2466_v10 = vsel %vm2465_vm15, %v3644_v18, %v2462_v53  ;;  %v2469_v32 = vmul.f32 %v3646_v56, %v2468_v19  ;;  %v710_v53 = vld [vmem:[%s709_s25] sm:$0xff] }
 0x96e   : >> { %v2510_v31 = vmul.f32 %v2466_v10, %v5041_v7 }
 0x96f   : >> { %v2470_v17 = vmul.f32 0.5, %v2469_v32  ;;  %v2404_v13 = vpop.xlane.xlu2 %2403 }
 0x970   : >> { %v2416_v21 = vmul.f32 %v2404_v13, %v4088_v47  ;;  %v2521_v59 = vmul.f32 %v5085_v60, %v2510_v31 }
 0x971   : >> { %v2471_v28 = vsub.f32 1.5, %v2470_v17  ;;  %v5141_v17 = vld [vmem:[%s706_s5] ss:$0 sm:$0xff]  ;;  %s718_s5 = scalar_lea.vmem %s5451_s14, %s3821_s24  ;;  %s669_s24 = sadd.s32 1, %s3821_s24  }
 0x972   : >> { %v2424_v1 = vadd.f32 1e-06, %v2416_v21  ;;  %v2532_v40 = vadd.f32 %v5092_v30, %v2521_v59  ;;  %p666_p11 = scmp.ge.s32.totalorder %s669_s24, 2  }
 0x973   : >> { %v2472_v45 = vmul.f32 %v3646_v56, %v2471_v28  ;;  %s3264_s20 = sshll.u32 (%p666_p11), %s3954_s0, 2  ;;  %s5504_s24 = scalar_lea.vmem (%p666_p11), [#allocation3], %s3991_s29 }
 0x974   : >> { %3647 = vrsqrt.f32 %v2424_v1  ;;  %3249 = vmatmul.msk.f32.gmra.mxu1 %vm720_vm2, %v2532_v40  ;;  %vm2483_vm5 = vweird.f32 %v2424_v1  ;;  %s3007_s1 = scalar_lea.hbm (%p666_p11), %s5455_s18, %s3264_s20  ;;  %s3009_s19 = sshll.u32 (%p666_p11), %s5504_s24, 4  ;;  %s3010_s19 = int_to_ptr.vmem [resolvable:$true] %s3009_s19 }
 0x975   : >> { %v2476_v33 = vsel %vm2475_vm3, %v3646_v56, %v2472_v45  ;;  %s5505_s22 = smov (%p666_p11), %s5504_s24  ;;  %s5506_s26 = sand.u32 (%p666_p11), 1, %s3777_s28  }
 0x976   : >> { %v2511_v7 = vmul.f32 %v2476_v33, %v5048_v44  ;;  %s2997_s23 = scalar_lea.sflag (%p666_p11), [#allocation4], %s5506_s26 }
 0x977   : >> { %v2407_v50 = vpop.xlane.xlu0 %2406 }
 0x978   : >> { %v2417_v12 = vmul.f32 %v2407_v50, %v4088_v47  ;;  %v2522_v23 = vmul.f32 %v5085_v60, %v2511_v7 }
 0x97a   : >> { %v3648_v24 = vpop.eup %3647  ;;  %v2425_v54 = vadd.f32 1e-06, %v2417_v12  ;;  %v2533_v38 = vadd.f32 %v5092_v30, %v2522_v23 }
 0x97b   : >> { %v2478_v2 = vmul.f32 %v3648_v24, %v2424_v1  ;;  %vm2484_vm4 = vweird.f32 %v3648_v24 }
 0x97c   : >> { %3649 = vrsqrt.f32 %v2425_v54  ;;  %3250 = vmatmul.msk.f32.gmra.mxu1 %vm720_vm2, %v2533_v38  ;;  %vm2485_vm6 = vmor %vm2483_vm5, %vm2484_vm4  ;;  %vm2493_vm8 = vweird.f32 %v2425_v54 }
 0x97d   : >> { %v2479_v4 = vmul.f32 %v3648_v24, %v2478_v2 }
 0x97f   : >> { %v2480_v25 = vmul.f32 0.5, %v2479_v4 }
 0x981   : >> { %v2481_v22 = vsub.f32 1.5, %v2480_v25 }
 0x982   : >> { %v3650_v11 = vpop.eup %3649 }
 0x983   : >> { %v2482_v35 = vmul.f32 %v3648_v24, %v2481_v22  ;;  %v2488_v44 = vmul.f32 %v3650_v11, %v2425_v54  ;;  %vm2494_vm7 = vweird.f32 %v3650_v11 }
 0x984   : >> { %vm2495_vm9 = vmor %vm2493_vm8, %vm2494_vm7 }
 0x985   : >> { %v2486_v57 = vsel %vm2485_vm6, %v3648_v24, %v2482_v35  ;;  %v2489_v37 = vmul.f32 %v3650_v11, %v2488_v44 }
 0x986   : >> { %v2512_v63 = vmul.f32 %v2486_v57, %v5055_v8 }
 0x987   : >> { %v2490_v62 = vmul.f32 0.5, %v2489_v37 }
 0x988   : >> { %v2523_v36 = vmul.f32 %v5085_v60, %v2512_v63 }
 0x989   : >> { %v2491_v9 = vsub.f32 1.5, %v2490_v62 }
 0x98a   : >> { %v2534_v39 = vadd.f32 %v5092_v30, %v2523_v36 }
 0x98b   : >> { %v2492_v46 = vmul.f32 %v3650_v11, %v2491_v9 }
 0x98c   : >> { %3251 = vmatmul.msk.f32.gmra.mxu1 %vm720_vm2, %v2534_v39 }
 0x98d   : >> { %v2496_v48 = vsel %vm2495_vm9, %v3650_v11, %v2492_v46 }
 0x98e   : >> { %v2513_v16 = vmul.f32 %v2496_v48, %v5062_v34  ;;  %v715_v34 = vld [vmem:[%s709_s25 + $0x28] sm:$0xff]  ;;  %s3011_s25 = sshll.u32 (%p666_p11), %s3007_s1, 4  ;;  %s3012_s25 = int_to_ptr.hbm [resolvable:$true] %s3011_s25 }
 0x98f   : >> { %2711 = vmatpush.msra.mxu3 %v715_v34  ;;  %s3701_s3 = sshra.s32 (%p666_p11), %s3012_s25, 4  ;;  %s3702_s3 = int_to_ptr.hbm [resolvable:$true] %s3701_s3 }
 0x990   : >> { %v2524_v18 = vmul.f32 %v5085_v60, %v2513_v16  ;;  %s3703_s4 = scalar_lea.hbm (%p666_p11), %s3702_s3, 4  ;;  %p3708_p1 = scmp.lt.s32.totalorder (%p666_p11), %s3702_s3, %s5455_s18 }
 0x991   : >> { %2712 = vmatpush.msra.mxu3 %v714_v52  ;;  %p3704_p12 = scmp.ne.s32.totalorder (%p666_p11), %s3702_s3, %s3703_s4 }
 0x992   : >> { %v2535_v29 = vadd.f32 %v5092_v30, %v2524_v18 }
 0x993   : >> { %2713 = vmatpush.msra.mxu3 %v713_v58  ;;  %p3705_p13 = pnand (%p666_p11), %p3704_p12, %p3971_p5 }
 0x994   : >> { %3252 = vmatmul.msk.f32.gmra.mxu1 %vm720_vm2, %v2535_v29 }
 0x995   : >> { %2714 = vmatpush.msra.mxu3 %v712_v41  ;;  %p3706_p0 = pneg (%p666_p11), %p3705_p13 }
 0x997   : >> { %2715 = vmatpush.msra.mxu3 %v711_v27 }
 0x999   : >> { %2716 = vmatpush.msra.mxu3 %v710_v53 }
 0x9ac   : >> { %v2410_v8 = vpop.xlane.xlu1 %2409 }
 0x9ad   : >> { %v2418_v5 = vmul.f32 %v2410_v8, %v4088_v47 }
 0x9af   : >> { %v2426_v61 = vadd.f32 1e-06, %v2418_v5 }
 0x9b1   : >> { %3651 = vrsqrt.f32 %v2426_v61  ;;  %vm2503_vm11 = vweird.f32 %v2426_v61 }
 0x9b7   : >> { %v3652_v15 = vpop.eup %3651 }
 0x9b8   : >> { %v2498_v56 = vmul.f32 %v3652_v15, %v2426_v61  ;;  %vm2504_vm10 = vweird.f32 %v3652_v15 }
 0x9b9   : >> { %vm2505_vm12 = vmor %vm2503_vm11, %vm2504_vm10 }
 0x9ba   : >> { %v2499_v19 = vmul.f32 %v3652_v15, %v2498_v56 }
 0x9bc   : >> { %v2500_v10 = vmul.f32 0.5, %v2499_v19 }
 0x9be   : >> { %v2501_v32 = vsub.f32 1.5, %v2500_v10 }
 0x9c0   : >> { %v2502_v31 = vmul.f32 %v3652_v15, %v2501_v32 }
 0x9c2   : >> { %v2506_v13 = vsel %vm2505_vm12, %v3652_v15, %v2502_v31 }
 0x9c3   : >> { %v2581_v21 = vpop.f32.mrf.mxu0  ;;  %v2514_v59 = vmul.f32 %v2506_v13, %v5074_v43 }
 0x9c4   : >> { %v2582_v28 = vadd.f32 %v5141_v17, %v2581_v21 }
 0x9c5   : >> { %v2525_v1 = vmul.f32 %v5085_v60, %v2514_v59 }
 0x9c6   : >> { %v2613_v40 = vmul.f32 %v2582_v28, %v2582_v28  ;;  %v2605_v2 = vmul.f32 0.5, %v2582_v28 }
 0x9c7   : >> { %v2536_v45 = vadd.f32 %v5092_v30, %v2525_v1 }
 0x9c8   : >> { %v2621_v33 = vmul.f32 %v2613_v40, %v2582_v28 }
 0x9c9   : >> { %3253 = vmatmul.msk.f32.gmra.mxu1 %vm720_vm2, %v2536_v45 }
 0x9ca   : >> { %v2629_v7 = vmul.f32 0.044715, %v2621_v33 }
 0x9cc   : >> { %v2637_v50 = vadd.f32 %v2629_v7, %v2582_v28 }
 0x9ce   : >> { %v2645_v12 = vmul.f32 0.7978846, %v2637_v50 }
 0x9cf   : >> { %v2584_v23 = vpop.f32.mrf.mxu1 }
 0x9d0   : >> { %3653 = vtanh.f32 %v2645_v12  ;;  %v2585_v43 = vadd.f32 %v5141_v17, %v2584_v23 }
 0x9d2   : >> { %v2614_v24 = vmul.f32 %v2585_v43, %v2585_v43  ;;  %v2606_v35 = vmul.f32 0.5, %v2585_v43 }
 0x9d4   : >> { %v2622_v54 = vmul.f32 %v2614_v24, %v2585_v43 }
 0x9d6   : >> { %v3654_v60 = vpop.eup %3653  ;;  %v2630_v38 = vmul.f32 0.044715, %v2622_v54 }
 0x9d7   : >> { %v2661_v30 = vadd.f32 1.0, %v3654_v60 }
 0x9d8   : >> { %v2638_v4 = vadd.f32 %v2630_v38, %v2585_v43 }
 0x9d9   : >> { %v2669_v25 = vmul.f32 %v2661_v30, %v2605_v2 }
 0x9da   : >> { %v2646_v22 = vmul.f32 0.7978846, %v2638_v4 }
 0x9db   : >> { %3254 = vmatmul.msk.f32.vlgmr.msra.gmra.mxu3 %vm1092_vm14, %v2669_v25 }
 0x9dc   : >> { %3655 = vtanh.f32 %v2646_v22 }
 0x9e2   : >> { %v3656_v11 = vpop.eup %3655 }
 0x9e3   : >> { %v2662_v44 = vadd.f32 1.0, %v3656_v11 }
 0x9e5   : >> { %v2670_v57 = vmul.f32 %v2662_v44, %v2606_v35 }
 0x9e7   : >> { %3255 = vmatmul.msk.f32.gmra.mxu3 %vm1092_vm14, %v2670_v57 }
 0x9e9   : >> { %v2587_v37 = vpop.f32.mrf.mxu1 }
 0x9ea   : >> { %v2588_v63 = vadd.f32 %v5141_v17, %v2587_v37 }
 0x9ec   : >> { %v2615_v62 = vmul.f32 %v2588_v63, %v2588_v63  ;;  %v2607_v58 = vmul.f32 0.5, %v2588_v63 }
 0x9ee   : >> { %v2623_v36 = vmul.f32 %v2615_v62, %v2588_v63 }
 0x9f0   : >> { %v2631_v9 = vmul.f32 0.044715, %v2623_v36 }
 0x9f1   : >> { %v2590_v39 = vpop.f32.mrf.mxu1 }
 0x9f2   : >> { %v2639_v46 = vadd.f32 %v2631_v9, %v2588_v63  ;;  %v2591_v48 = vadd.f32 %v5141_v17, %v2590_v39 }
 0x9f4   : >> { %v2616_v16 = vmul.f32 %v2591_v48, %v2591_v48  ;;  %v2647_v18 = vmul.f32 0.7978846, %v2639_v46  ;;  %v2608_v32 = vmul.f32 0.5, %v2591_v48 }
 0x9f6   : >> { %v2624_v29 = vmul.f32 %v2616_v16, %v2591_v48  ;;  %3657 = vtanh.f32 %v2647_v18 }
 0x9f8   : >> { %v2632_v8 = vmul.f32 0.044715, %v2624_v29 }
 0x9f9   : >> { %v2593_v6 = vpop.f32.mrf.mxu1 }
 0x9fa   : >> { %v2640_v5 = vadd.f32 %v2632_v8, %v2591_v48  ;;  %v2594_v14 = vadd.f32 %v5141_v17, %v2593_v6  ;;  %v3490_v6 = vld [vmem:[%s718_s5] ss:$0 sm:$0xff]  ;;  %s3707_s5 = scalar_lea.hbm (%p666_p11), %s5455_s18, 8 }
 0x9fb   : > { %p3709_p2 = scmp.lt.s32.totalorder (%p666_p11), %s3707_s5, %s3703_s4 }
 0x9fc   : >> { %v3658_v61 = vpop.eup %3657  ;;  %v2617_v34 = vmul.f32 %v2594_v14, %v2594_v14  ;;  %v2648_v52 = vmul.f32 0.7978846, %v2640_v5  ;;  %v2609_v40 = vmul.f32 0.5, %v2594_v14 }
 0x9fd   : >> { %v2663_v41 = vadd.f32 1.0, %v3658_v61  ;;  %p3710_p3 = por (%p666_p11), %p3709_p2, %p3708_p1 }
 0x9fe   : >> { %v2625_v15 = vmul.f32 %v2617_v34, %v2594_v14  ;;  %3659 = vtanh.f32 %v2648_v52 }
 0x9ff   : >> { %v2671_v56 = vmul.f32 %v2663_v41, %v2607_v58  ;;  %p3711_p4 = pnand (%p666_p11), %p3710_p3, %p3706_p0 }
 0xa00   : >> { %v2633_v27 = vmul.f32 0.044715, %v2625_v15 }
 0xa01   : >> { %3256 = vmatmul.msk.f32.gmra.mxu3 %vm1092_vm14, %v2671_v56 }
 0xa02   : >> { %v2641_v53 = vadd.f32 %v2633_v27, %v2594_v14 }
 0xa04   : >> { %v3660_v19 = vpop.eup %3659  ;;  %v2649_v10 = vmul.f32 0.7978846, %v2641_v53 }
 0xa05   : >> { %v2664_v31 = vadd.f32 1.0, %v3660_v19 }
 0xa06   : >> { %3661 = vtanh.f32 %v2649_v10 }
 0xa07   : >> { %v2672_v13 = vmul.f32 %v2664_v31, %v2608_v32 }
 0xa09   : >> { %v2596_v21 = vpop.f32.mrf.mxu1  ;;  %3257 = vmatmul.msk.f32.gmra.mxu3 %vm1092_vm14, %v2672_v13 }
 0xa0a   : >> { %v2597_v59 = vadd.f32 %v5141_v17, %v2596_v21 }
 0xa0c   : >> { %v3662_v28 = vpop.eup %3661  ;;  %v2618_v1 = vmul.f32 %v2597_v59, %v2597_v59  ;;  %v2610_v25 = vmul.f32 0.5, %v2597_v59 }
 0xa0d   : >> { %v2665_v45 = vadd.f32 1.0, %v3662_v28 }
 0xa0e   : >> { %v2626_v33 = vmul.f32 %v2618_v1, %v2597_v59 }
 0xa0f   : >> { %v2673_v7 = vmul.f32 %v2665_v45, %v2609_v40 }
 0xa10   : >> { %v2634_v50 = vmul.f32 0.044715, %v2626_v33 }
 0xa11   : >> { %v2599_v12 = vpop.f32.mrf.mxu1  ;;  %3258 = vmatmul.msk.f32.gmra.mxu3 %vm1092_vm14, %v2673_v7 }
 0xa12   : >> { %v2642_v23 = vadd.f32 %v2634_v50, %v2597_v59  ;;  %v2600_v43 = vadd.f32 %v5141_v17, %v2599_v12 }
 0xa14   : >> { %v2619_v24 = vmul.f32 %v2600_v43, %v2600_v43  ;;  %v2650_v54 = vmul.f32 0.7978846, %v2642_v23  ;;  %v2611_v44 = vmul.f32 0.5, %v2600_v43 }
 0xa16   : >> { %v2627_v60 = vmul.f32 %v2619_v24, %v2600_v43  ;;  %3663 = vtanh.f32 %v2650_v54 }
 0xa18   : >> { %v2635_v38 = vmul.f32 0.044715, %v2627_v60 }
 0xa1a   : >> { %v2643_v2 = vadd.f32 %v2635_v38, %v2600_v43 }
 0xa1c   : >> { %v3664_v30 = vpop.eup %3663  ;;  %v2651_v4 = vmul.f32 0.7978846, %v2643_v2 }
 0xa1d   : >> { %v2666_v22 = vadd.f32 1.0, %v3664_v30 }
 0xa1e   : >> { %3665 = vtanh.f32 %v2651_v4 }
 0xa1f   : >> { %v2674_v11 = vmul.f32 %v2666_v22, %v2610_v25 }
 0xa21   : >> { %3259 = vmatmul.msk.f32.gmra.mxu3 %vm1092_vm14, %v2674_v11 }
 0xa24   : >> { %v3666_v35 = vpop.eup %3665 }
 0xa25   : >> { %v2667_v57 = vadd.f32 1.0, %v3666_v35 }
 0xa27   : >> { %v2675_v37 = vmul.f32 %v2667_v57, %v2611_v44 }
 0xa29   : >> { %3260 = vmatmul.msk.f32.gmra.mxu3 %vm1092_vm14, %v2675_v37 }
 0xa46   : >> { %v2602_v63 = vpop.f32.mrf.mxu1 }
 0xa47   : >> { %v2603_v62 = vadd.f32 %v5141_v17, %v2602_v63 }
 0xa49   : >> { %v2620_v36 = vmul.f32 %v2603_v62, %v2603_v62  ;;  %v2612_v18 = vmul.f32 0.5, %v2603_v62 }
 0xa4b   : >> { %v2628_v9 = vmul.f32 %v2620_v36, %v2603_v62 }
 0xa4d   : >> { %v2636_v39 = vmul.f32 0.044715, %v2628_v9 }
 0xa4f   : >> { %v2644_v46 = vadd.f32 %v2636_v39, %v2603_v62 }
 0xa51   : >> { %v2652_v48 = vmul.f32 0.7978846, %v2644_v46 }
 0xa53   : >> { %3667 = vtanh.f32 %v2652_v48 }
 0xa59   : >> { %v3668_v16 = vpop.eup %3667 }
 0xa5a   : >> { %v2668_v29 = vadd.f32 1.0, %v3668_v16 }
 0xa5c   : >> { %v2676_v8 = vmul.f32 %v2668_v29, %v2612_v18 }
 0xa5e   : >> { %v2718_v5 = vpop.f32.mrf.mxu3  ;;  %3261 = vmatmul.msk.f32.gmra.mxu3 %vm1092_vm14, %v2676_v8 }
 0xa5f   : >> { %v2742_v17 = vadd.f32 %v2718_v5, %v4971_v3 }
 0xa61   : >> { %v5173_v14 = vadd.f32 %v3490_v6, %v2742_v17  }
 0xa63   : >> { %v5485_v61 = vmov %v5173_v14 }
 0xa6a   : >> { %v2721_v34 = vpop.f32.mrf.mxu3 }
 0xa6b   : >> { %v2743_v52 = vadd.f32 %v2721_v34, %v4976_v51 }
 0xa6d   : >> { %v5176_v58 = vadd.f32 %v3490_v6, %v2743_v52  }
 0xa84   : >> { %v2724_v41 = vpop.f32.mrf.mxu3 }
 0xa85   : >> { %v2744_v15 = vadd.f32 %v2724_v41, %v4981_v42 }
 0xa87   : >> { %v5179_v15 = vadd.f32 %v3490_v6, %v2744_v15  }
 0xa89   : >> { %v5486_v56 = vmov %v5179_v15 }
 0xa8a   : >> { %v5493_v15 = vmov %v5486_v56  ;;  %v2770_v7 = vsel (%p666_p11), %vm720_vm2, %v5486_v56, 0.0 }
 0xa8c   : >> { %v2727_v27 = vpop.f32.mrf.mxu3 }
 0xa8d   : >> { %v2745_v53 = vadd.f32 %v2727_v27, %v4986_v26  ;;  %v5494_v26 = vmov %v5176_v58 }
 0xa8e   : > { %v2767_v26 = vsel (%p666_p11), %vm720_vm2, %v5176_v58, 0.0 }
 0xa8f   : >> { %v5182_v27 = vadd.f32 %v3490_v6, %v2745_v53  }
 0xa91   : >> { %v5487_v19 = vmov %v5182_v27 }
 0xa92   : >> { %v5492_v27 = vmov %v5487_v19 }
 0xa94   : >> { %v2730_v10 = vpop.f32.mrf.mxu3 }
 0xa95   : >> { %v2746_v3 = vadd.f32 %v2730_v10, %v4991_v49 }
 0xa97   : >> { %v2757_v31 = vadd.f32 %v3490_v6, %v2746_v3  }
 0xa99   : > { %v2776_v45 = vsel (%p666_p11), %vm720_vm2, %v2757_v31, 0.0 }
 0xaa4   : >> { %v2733_v14 = vpop.f32.mrf.mxu3 }
 0xaa5   : >> { %v2747_v32 = vadd.f32 %v2733_v14, %v4996_v55  ;;  %v5495_v14 = vmov %v5485_v61 }
 0xaa7   : >> { %v2758_v51 = vadd.f32 %v3490_v6, %v2747_v32  }
 0xaa9   : >> { %v5490_v32 = vmov %v2758_v51  ;;  %v2779_v55 = vsel (%p666_p11), %vm720_vm2, %v2758_v51, 0.0 }
 0xaaa   : > { %2780 = vadd.xlane.f32.xlu1 (%p666_p11), %v2779_v55 }
 0xaac   : >> { %v2736_v13 = vpop.f32.mrf.mxu3 }
 0xaad   : >> { %v2748_v21 = vadd.f32 %v2736_v13, %v5009_v20  ;;  %v5491_v20 = vmov %v2757_v31 }
 0xaae   : > { %v2764_v20 = vsel (%p666_p11), %vm720_vm2, %v5485_v61, 0.0 }
 0xaaf   : >> { %v2759_v59 = vadd.f32 %v3490_v6, %v2748_v21  }
 0xab1   : >> { %v5489_v21 = vmov %v2759_v59  ;;  %v2782_v40 = vsel (%p666_p11), %vm720_vm2, %v2759_v59, 0.0 }
 0xab2   : > { %2777 = vadd.xlane.f32.xlu1 (%p666_p11), %v2776_v45 }
 0xaba   : > { %2765 = vadd.xlane.f32.xlu1 (%p666_p11), %v2764_v20 }
 0xae1   : >> { %v2739_v42 = vpop.f32.mrf.mxu3 }
 0xae2   : >> { %v2749_v28 = vadd.f32 %v2739_v42, %v5021_v0  ;;  %668 = sbr.rel (!%p666_p11) target bundleno = 175 (0xaf), region = 146  ;;  %v2773_v0 = vsel (%p666_p11), %vm720_vm2, %v5487_v19, 0.0 }
 0xae3   : > { %2774 = vadd.xlane.f32.xlu2 (%p666_p11), %v2773_v0 }
 0xae4   : >> { %v2760_v1 = vadd.f32 %v3490_v6, %v2749_v28  }
 0xae6   : >> { %v5488_v33 = vmov %v2760_v1  ;;  %v2785_v49 = vsel (%p666_p11), %vm720_vm2, %v2760_v1, 0.0 }
 0xae7   : > { %2786 = vadd.xlane.f32.xlu0 %v2785_v49 }
 0xaeb   : > { %2771 = vadd.xlane.f32.xlu2 %v2770_v7 }
 0xaef   : > { %2783 = vadd.xlane.f32.xlu0 %v2782_v40 }
 0xaf7   : > { %2768 = vadd.xlane.f32.xlu0 %v2767_v26 }
 0xb1d   : > { %v2781_v50 = vpop.xlane.xlu1 %2780 }
 0xb1e   : > { %v2800_v23 = vmul.f32 %v2781_v50, %v4088_v47 }
 0xb20   : > { %v5227_v54 = vsub.f32 %v2758_v51, %v2800_v23 }
 0xb22   : > { %v2816_v38 = vmul.f32 %v5227_v54, %v5227_v54 }
 0xb24   : > { %v2834_v30 = vsel %vm720_vm2, %v2816_v38, 0.0 }
 0xb25   : > { %v2778_v25 = vpop.xlane.xlu1 %2777  ;;  %2835 = vadd.xlane.f32.xlu1 %v2834_v30 }
 0xb26   : > { %v2799_v11 = vmul.f32 %v2778_v25, %v4088_v47 }
 0xb28   : > { %v5241_v63 = vsub.f32 %v2757_v31, %v2799_v11 }
 0xb2a   : > { %v2815_v36 = vmul.f32 %v5241_v63, %v5241_v63 }
 0xb2c   : > { %v2831_v48 = vsel %vm720_vm2, %v2815_v36, 0.0  ;;  %v5314_v36 = vld [vmem:[%s5452_s15] ss:$0 sm:$0xff] }
 0xb2d   : > { %v2766_v8 = vpop.xlane.xlu1 %2765 }
 0xb2e   : > { %v2795_v5 = vmul.f32 %v2766_v8, %v4088_v47 }
 0xb30   : > { %v5268_v41 = vsub.f32 %v5485_v61, %v2795_v5 }
 0xb32   : > { %v2811_v27 = vmul.f32 %v5268_v41, %v5268_v41 }
 0xb56   : > { %v2775_v43 = vpop.xlane.xlu2 %2774 }
 0xb57   : > { %v2798_v57 = vmul.f32 %v2775_v43, %v4088_v47 }
 0xb59   : > { %v5253_v46 = vsub.f32 %v5487_v19, %v2798_v57 }
 0xb5a   : > { %v2787_v33 = vpop.xlane.xlu0 %2786 }
 0xb5b   : > { %v2802_v12 = vmul.f32 %v2787_v33, %v4088_v47  ;;  %v2814_v34 = vmul.f32 %v5253_v46, %v5253_v46 }
 0xb5d   : > { %v5225_v24 = vsub.f32 %v2760_v1, %v2802_v12  ;;  %v2828_v15 = vsel %vm720_vm2, %v2814_v34, 0.0  ;;  %v5325_v34 = vld [vmem:[%s5453_s16] ss:$0 sm:$0xff] }
 0xb5e   : > { %v2772_v35 = vpop.xlane.xlu2 %2771 }
 0xb5f   : > { %v2818_v60 = vmul.f32 %v5225_v24, %v5225_v24  ;;  %v2797_v44 = vmul.f32 %v2772_v35, %v4088_v47 }
 0xb61   : > { %v2840_v2 = vsel %vm720_vm2, %v2818_v60, 0.0  ;;  %v5244_v62 = vsub.f32 %v5486_v56, %v2797_v44 }
 0xb62   : > { %v2784_v4 = vpop.xlane.xlu0 %2783  ;;  %2841 = vadd.xlane.f32.xlu2 %v2840_v2 }
 0xb63   : > { %v2801_v22 = vmul.f32 %v2784_v4, %v4088_v47  ;;  %v2813_v39 = vmul.f32 %v5244_v62, %v5244_v62 }
 0xb65   : > { %v5239_v37 = vsub.f32 %v2759_v59, %v2801_v22  ;;  %v2825_v29 = vsel %vm720_vm2, %v2813_v39, 0.0 }
 0xb66   : > { %2826 = vadd.xlane.f32.xlu1 %v2825_v29 }
 0xb67   : > { %v2817_v9 = vmul.f32 %v5239_v37, %v5239_v37 }
 0xb69   : > { %v2837_v16 = vsel %vm720_vm2, %v2817_v9, 0.0 }
 0xb6a   : > { %2832 = vadd.xlane.f32.xlu2 %v2831_v48  ;;  %2838 = vadd.xlane.f32.xlu0 %v2837_v16  ;;  %v2769_v18 = vpop.xlane.xlu0 %2768 }
 0xb6b   : > { %v2796_v6 = vmul.f32 %v2769_v18, %v4088_v47 }
 0xb6d   : > { %v5261_v17 = vsub.f32 %v5176_v58, %v2796_v6  ;;  %v2819_v58 = vsel %vm720_vm2, %v2811_v27, 0.0 }
 0xb6f   : > { %v2812_v52 = vmul.f32 %v5261_v17, %v5261_v17 }
 0xb71   : > { %v2822_v56 = vsel %vm720_vm2, %v2812_v52, 0.0 }
 0xb72   : > { %2829 = vadd.xlane.f32.xlu0 %v2828_v15  ;;  %2823 = vadd.xlane.f32.xlu2 %v2822_v56 }
 0xb7a   : > { %2820 = vadd.xlane.f32.xlu0 %v2819_v58 }
 0xb98   : > { %v2836_v19 = vpop.xlane.xlu1 %2835 }
 0xb99   : > { %v2848_v3 = vmul.f32 %v2836_v19, %v4088_v47 }
 0xb9b   : > { %v5277_v31 = vadd.f32 1e-06, %v2848_v3 }
 0xb9d   : > { %vm2915_vm0 = vweird.f32 %v5277_v31 }
 0xbd5   : > { %v2842_v53 = vpop.xlane.xlu2 %2841 }
 0xbd6   : > { %v2850_v10 = vmul.f32 %v2842_v53, %v4088_v47 }
 0xbd8   : > { %v2858_v61 = vadd.f32 1e-06, %v2850_v10 }
 0xbd9   : > { %v2827_v21 = vpop.xlane.xlu1 %2826 }
 0xbda   : > { %3671 = vrsqrt.f32 %v2858_v61  ;;  %v2845_v59 = vmul.f32 %v2827_v21, %v4088_v47  ;;  %vm2935_vm13 = vweird.f32 %v2858_v61 }
 0xbdb   : > { %3673 = vrsqrt.f32 %v5277_v31 }
 0xbdc   : > { %v5287_v0 = vadd.f32 1e-06, %v2845_v59 }
 0xbdd   : > { %v2833_v14 = vpop.xlane.xlu2 %2832  ;;  %v2839_v32 = vpop.xlane.xlu0 %2838 }
 0xbde   : > { %v2847_v51 = vmul.f32 %v2833_v14, %v4088_v47  ;;  %v2849_v13 = vmul.f32 %v2839_v32, %v4088_v47  ;;  %vm2885_vm10 = vweird.f32 %v5287_v0 }
 0xbe0   : > { %v3672_v42 = vpop.eup %3671  ;;  %v2855_v28 = vadd.f32 1e-06, %v2847_v51  ;;  %v5283_v1 = vadd.f32 1e-06, %v2849_v13 }
 0xbe1   : > { %v5285_v49 = vpop.eup %3673  ;;  %v2930_v55 = vmul.f32 %v3672_v42, %v2858_v61  ;;  %vm2936_vm2 = vweird.f32 %v3672_v42 }
 0xbe2   : > { %v2910_v40 = vmul.f32 %v5285_v49, %v5277_v31  ;;  %3675 = vrsqrt.f32 %v2855_v28  ;;  %vm2937_vm15 = vmor %vm2935_vm13, %vm2936_vm2  ;;  %vm2916_vm1 = vweird.f32 %v5285_v49  ;;  %vm2905_vm3 = vweird.f32 %v2855_v28 }
 0xbe3   : > { %v2931_v45 = vmul.f32 %v3672_v42, %v2930_v55  ;;  %3677 = vrsqrt.f32 %v5283_v1  ;;  %vm5333_vm5 = vmor %vm2915_vm0, %vm2916_vm1  ;;  %vm2925_vm8 = vweird.f32 %v5283_v1 }
 0xbe4   : > { %v2911_v7 = vmul.f32 %v5285_v49, %v2910_v40  ;;  %3679 = vrsqrt.f32 %v5287_v0 }
 0xbe5   : > { %v2932_v26 = vmul.f32 0.5, %v2931_v45  ;;  %v2824_v20 = vpop.xlane.xlu2 %2823  ;;  %v2830_v33 = vpop.xlane.xlu0 %2829 }
 0xbe6   : > { %v2912_v50 = vmul.f32 0.5, %v2911_v7  ;;  %v2844_v12 = vmul.f32 %v2824_v20, %v4088_v47  ;;  %v2846_v23 = vmul.f32 %v2830_v33, %v4088_v47 }
 0xbe7   : > { %v2933_v43 = vsub.f32 1.5, %v2932_v26 }
 0xbe8   : > { %v5296_v60 = vpop.eup %3675  ;;  %v5298_v38 = vadd.f32 1e-06, %v2844_v12  ;;  %v5300_v2 = vadd.f32 1e-06, %v2846_v23  ;;  %v2913_v4 = vsub.f32 1.5, %v2912_v50 }
 0xbe9   : > { %v3678_v30 = vpop.eup %3677  ;;  %v2900_v25 = vmul.f32 %v5296_v60, %v2855_v28  ;;  %v2934_v22 = vmul.f32 %v3672_v42, %v2933_v43  ;;  %vm2906_vm4 = vweird.f32 %v5296_v60 }
 0xbea   : > { %v5303_v11 = vpop.eup %3679  ;;  %v2920_v35 = vmul.f32 %v3678_v30, %v5283_v1  ;;  %3681 = vrsqrt.f32 %v5298_v38  ;;  %v2914_v48 = vmul.f32 %v5285_v49, %v2913_v4  ;;  %vm2926_vm6 = vweird.f32 %v3678_v30  ;;  %vm5343_vm7 = vmor %vm2905_vm3, %vm2906_vm4 }
 0xbeb   : > { %v2901_v44 = vmul.f32 %v5296_v60, %v2900_v25  ;;  %v2880_v57 = vmul.f32 %v5303_v11, %v5287_v0  ;;  %3683 = vrsqrt.f32 %v5300_v2  ;;  %v2938_v39 = vsel %vm2937_vm15, %v3672_v42, %v2934_v22  ;;  %vm2927_vm9 = vmor %vm2925_vm8, %vm2926_vm6 }
 0xbec   : > { %v2921_v9 = vmul.f32 %v3678_v30, %v2920_v35  ;;  %v2946_v8 = vmul.f32 %v2938_v39, %v5225_v24  ;;  %v2918_v3 = vsel %vm5333_vm5, %v5285_v49, %v2914_v48  ;;  %vm2886_vm11 = vweird.f32 %v5303_v11 }
 0xbed   : > { %v2902_v16 = vmul.f32 0.5, %v2901_v44  ;;  %v2881_v18 = vmul.f32 %v5303_v11, %v2880_v57  ;;  %v2821_v29 = vpop.xlane.xlu0 %2820  ;;  %v2944_v59 = vmul.f32 %v2918_v3, %v5227_v54  ;;  %vm2875_vm12 = vweird.f32 %v5298_v38  ;;  %vm5365_vm13 = vmor %vm2885_vm10, %vm2886_vm11 }
 0xbee   : > { %v2922_v6 = vmul.f32 0.5, %v2921_v9  ;;  %v2843_v5 = vmul.f32 %v2821_v29, %v4088_v47  ;;  %v2957_v56 = vmul.f32 %v5314_v36, %v2946_v8  ;;  %vm2895_vm1 = vweird.f32 %v5300_v2 }
 0xbef   : > { %v2903_v52 = vsub.f32 1.5, %v2902_v16  ;;  %v2882_v15 = vmul.f32 0.5, %v2881_v18 }
 0xbf0   : > { %v3682_v27 = vpop.eup %3681  ;;  %v2923_v47 = vsub.f32 1.5, %v2922_v6  ;;  %v2851_v58 = vadd.f32 1e-06, %v2843_v5  ;;  %v2968_v32 = vadd.f32 %v5325_v34, %v2957_v56  ;;  %v2969_v5 = vld [vmem:[%s5454_s17] sm:$0xf] }
 0xbf1   : > { %v2904_v53 = vmul.f32 %v5296_v60, %v2903_v52  ;;  %v2883_v19 = vsub.f32 1.5, %v2882_v15  ;;  %v2870_v10 = vmul.f32 %v3682_v27, %v5298_v38  ;;  %v3684_v61 = vpop.eup %3683  ;;  %vm2876_vm2 = vweird.f32 %v3682_v27 }
 0xbf2   : > { %v2924_v14 = vmul.f32 %v3678_v30, %v2923_v47  ;;  %3685 = vrsqrt.f32 %v2851_v58  ;;  %v2890_v13 = vmul.f32 %v3684_v61, %v5300_v2  ;;  %2982 = vmatpush.msra.mxu0 %v2968_v32  ;;  %vm2896_vm15 = vweird.f32 %v3684_v61  ;;  %vm5373_vm0 = vmor %vm2875_vm12, %vm2876_vm2 }
 0xbf3   : > { %v2871_v51 = vmul.f32 %v3682_v27, %v2870_v10  ;;  %v2908_v42 = vsel %vm5343_vm7, %v5296_v60, %v2904_v53  ;;  %v2884_v28 = vmul.f32 %v5303_v11, %v2883_v19  ;;  %vm2897_vm3 = vmor %vm2895_vm1, %vm2896_vm15  ;;  %vm2865_vm5 = vweird.f32 %v2851_v58 }
 0xbf4   : > { %v2928_v21 = vsel %vm2927_vm9, %v3678_v30, %v2924_v14  ;;  %v2891_v49 = vmul.f32 %v3684_v61, %v2890_v13  ;;  %v2943_v40 = vmul.f32 %v2908_v42, %v5241_v63  ;;  %vm2994_vm7 = vcmask 257024  }
 0xbf5   : > { %v2872_v1 = vmul.f32 0.5, %v2871_v51  ;;  %v2945_v55 = vmul.f32 %v2928_v21, %v5239_v37  ;;  %v2955_v37 = vmul.f32 %v5314_v36, %v2944_v59  ;;  %v2888_v12 = vsel %vm5365_vm13, %v5303_v11, %v2884_v28 }
 0xbf6   : > { %v2892_v7 = vmul.f32 0.5, %v2891_v49  ;;  %v2954_v43 = vmul.f32 %v5314_v36, %v2943_v40  ;;  %v2941_v25 = vmul.f32 %v2888_v12, %v5244_v62 }
 0xbf7   : > { %v2873_v45 = vsub.f32 1.5, %v2872_v1  ;;  %v2956_v26 = vmul.f32 %v5314_v36, %v2945_v55  ;;  %v2966_v4 = vadd.f32 %v5325_v34, %v2955_v37 }
 0xbf8   : > { %v3686_v54 = vpop.eup %3685  ;;  %v2893_v50 = vsub.f32 1.5, %v2892_v7  ;;  %v2965_v35 = vadd.f32 %v5325_v34, %v2954_v43  ;;  %v2952_v39 = vmul.f32 %v5314_v36, %v2941_v25 }
 0xbf9   : > { %v2874_v33 = vmul.f32 %v3682_v27, %v2873_v45  ;;  %v2860_v63 = vmul.f32 %v3686_v54, %v2851_v58  ;;  %v2967_v0 = vadd.f32 %v5325_v34, %v2956_v26  ;;  %vm2866_vm4 = vweird.f32 %v3686_v54 }
 0xbfa   : > { %v2894_v60 = vmul.f32 %v3684_v61, %v2893_v50  ;;  %vm2867_vm6 = vmor %vm2865_vm5, %vm2866_vm4 }
 0xbfb   : > { %v2861_v38 = vmul.f32 %v3686_v54, %v2860_v63  ;;  %v2878_v30 = vsel %vm5373_vm0, %v3682_v27, %v2874_v33  ;;  %2983 = vmatpush.msra.mxu0 %v2967_v0 }
 0xbfc   : > { %v2898_v11 = vsel %vm2897_vm3, %v3684_v61, %v2894_v60  ;;  %v2940_v57 = vmul.f32 %v2878_v30, %v5261_v17 }
 0xbfd   : > { %v2862_v22 = vmul.f32 0.5, %v2861_v38  ;;  %2984 = vmatpush.msra.mxu0 %v2966_v4  ;;  %v2942_v44 = vmul.f32 %v2898_v11, %v5253_v46  ;;  %v2963_v46 = vadd.f32 %v5325_v34, %v2952_v39 }
 0xbfe   : > { %v2951_v16 = vmul.f32 %v5314_v36, %v2940_v57 }
 0xbff   : > { %v2863_v2 = vsub.f32 1.5, %v2862_v22  ;;  %2985 = vmatpush.msra.mxu0 %v2965_v35  ;;  %v2953_v9 = vmul.f32 %v5314_v36, %v2942_v44 }
 0xc00   : > { %v2962_v29 = vadd.f32 %v5325_v34, %v2951_v16 }
 0xc01   : > { %v2864_v48 = vmul.f32 %v3686_v54, %v2863_v2  ;;  %v2964_v62 = vadd.f32 %v5325_v34, %v2953_v9 }
 0xc03   : > { %v2868_v18 = vsel %vm2867_vm6, %v3686_v54, %v2864_v48  ;;  %2986 = vmatpush.msra.mxu0 %v2964_v62 }
 0xc04   : > { %v2939_v17 = vmul.f32 %v2868_v18, %v5268_v41 }
 0xc05   : > { %2987 = vmatpush.msra.mxu0 %v2963_v46 }
 0xc06   : > { %v2950_v8 = vmul.f32 %v5314_v36, %v2939_v17 }
 0xc07   : > { %2988 = vmatpush.msra.mxu0 %v2962_v29 }
 0xc08   : > { %v2961_v6 = vadd.f32 %v5325_v34, %v2950_v8 }
 0xc0a   : > { %2989 = vmatpush.msra.mxu0 %v2961_v6 }
 0xc0b   : > { %3262 = vmatmul.msk.f32.vlgmr.msra.gmra.mxu0 %vm1092_vm14, %v2969_v5 }
 0xc88   : > { %v2991_v41 = vpop.f32.mrf.mxu0 }
 0xc89   : > { %2995 = vst.msk [vmem:[%s5505_s22] sm:$0xf] %vm2994_vm7, %v2991_v41 }
 0xc8a   : > { %3714 = shalt.err (!%p3711_p4)
}
 0xc8b   : > { %3277 = dma.vmem_to_hbm [thread:$0]  (%p3971_p5), %s3010_s19, 64, %s3012_s25, %s2997_s23  }
 0xc8c PF: > { %p3283_p7 = scmp.ge.s32.totalorder %s3785_s30, 2  ;;  %s3023_s24 = sand.u32 1, %s3773_s27  }
 0xc8d   : > { %s3024_s22 = scalar_lea.sflag [#allocation4], %s3023_s24 }
 0xc8e   : > { %p3280_p8 = pnand %p3283_p7, %p3975_p6 }
 0xc90   : > { %p3281_p9 = pneg %p3280_p8 }
 0xc92   : > { %3768 = dma.done.wait (%p3281_p9), %s3024_s22, 64  }
 0xc93   : > { %3770 = vsyncadd (%p3281_p9), %s3024_s22, 4294967232  ;;  %s5508_s30 = sld [smem:[#allocation7_spill]]  ;;  %s5511_s27 = smov %s3777_s28 }
 0xc94   : > { %s5509_s3 = sld [smem:[#allocation6_spill]] }
 0xc95   : > { %s5510_s29 = sld [smem:[#allocation8_spill]] }
 0xc99   : > { %p28_p10 = scmp.ge.s32.totalorder %s5508_s30, 4  }
 0xc9a   : > { %s5512_s28 = smov %s5509_s3 }
 0xc9b   :  { %30 = sbr.rel (!%p28_p10) target bundleno = 10 (0xa), region = 157 }
 0xca0   :  { %3030 = vsyncpa [#allocation4], 1 }
 0xca1   :  { %3032 = vsyncpa [#allocation4 + $0x1], 1 }

</bundles_post_ra>
